<compile_context>
chip_gen: v6e
topology: v6e:2x2x1
jax: 0.10.0
libtpu: 0.0.40
codegen_flags: <defaults>
</compile_context>

<pallas_src>
import functools

import jax
import jax.numpy as jnp
from jax import lax
from jax.experimental import pallas as pl
from jax.experimental.pallas import tpu as pltpu

NEG_SLOPE = 0.01  # PyTorch nn.LeakyReLU() default


def _round_up(a, b):
    return (a + b - 1) // b * b


def basic_block_kernel(x_ref, w_ref, o_ref, xflat_ref, col_ref, *,
                       b_tile, cin, height, width, pad,
                       kh, kw, cin_p, wpad, lc, po_pad):
    """B_tile batch elements per grid step.

    x_ref:     (B_tile, Cin, H*W)        raw (unpadded) input, spatial flattened row-major
    w_ref:     (Cout, KH*KW*Cin_p) bf16  conv weights, contraction rows ordered (kh, kw, cin_p)
    o_ref:     (B_tile, Cout, Po_pad)    pooled output, flat (h*Wpad + w), Po_pad % 128 == 0
    xflat_ref: (B_tile, Cin_p, Lin) f32  zero-padded flat image staging buffer (VMEM scratch)
    col_ref:   (KH*KW*Cin_p, B_tile*Lc) bf16 im2col slab (VMEM scratch)
    """
    # --- 1) Stage zero-padded flat images in VMEM (replaces wrapper-side jnp.pad HBM passes).
    # Zero every step (not only step 0): with "parallel" megacore sharding each core owns its
    # own scratch and its own subset of program_ids, so a pid==0 guard would be unsafe.
    xflat_ref[...] = jnp.zeros_like(xflat_ref)
    for b in range(b_tile):
        for r in range(height):
            dst = (r + pad) * wpad + pad
            xflat_ref[b, 0:cin, dst:dst + width] = x_ref[b, :, r * width:(r + 1) * width]

    # --- 2) Build the bf16 im2col slab: with stride 1 the tap (i, j) is the contiguous flat
    # slice at offset i*wpad + j.  Destination sublane offsets t*cin_p (cin_p = 16) are
    # bf16-tile aligned; destination lane offsets b*lc are multiples of 128.
    # TODO(synk): at production tile sizes, split lc into sub-chunks so slab build of chunk
    # i+1 co-issues with the MXU dot on chunk i (different VLIW slots).
    for b in range(b_tile):
        for i in range(kh):
            for j in range(kw):
                t = i * kw + j
                off = i * wpad + j
                col_ref[t * cin_p:(t + 1) * cin_p, b * lc:(b + 1) * lc] = (
                    xflat_ref[b, :, off:off + lc].astype(col_ref.dtype))

    # --- 3) Single MXU dot: bf16 operands, f32 accumulation, lane-dense (Cout, B_tile*Lc).
    y = jnp.dot(w_ref[...], col_ref[...], preferred_element_type=jnp.float32)

    # --- 4) LeakyReLU(0.01) in f32 (VPU; v5e has no bf16 VPU path).
    y = jnp.where(y >= 0, y, NEG_SLOPE * y)

    # --- 5) MaxPool2d(2, stride=1) on the flat layout with only 2 lane-shift relayouts:
    #        m = max(y, shift-by-1); p = max(m, shift-by-Wpad).
    # TODO(synk): at production Cout/Lc, stream this epilogue per Cout sub-tile to avoid
    # holding the full dot result plus shifted views live (vreg pressure / spills).
    mw = po_pad + wpad
    for b in range(b_tile):
        yb = y[:, b * lc:(b + 1) * lc]
        m = jnp.maximum(yb[:, 0:mw], yb[:, 1:mw + 1])
        p = jnp.maximum(m[:, 0:po_pad], m[:, wpad:wpad + po_pad])
        o_ref[b] = p.astype(o_ref.dtype)


def basic_block_pallas(x_nchw, w_oihw, *, padding=1, b_tile=None):
    """x_nchw: (N, Cin, H, W) float32;  w_oihw: (Cout, Cin, KH, KW) float32."""
    N, Cin, H, W = x_nchw.shape
    Cout, Cin2, KH, KW = w_oihw.shape
    assert Cin == Cin2
    # TODO(synk): stride > 1 not implemented (the module's forward uses the default stride=1).

    Hpad, Wpad = H + 2 * padding, W + 2 * padding
    Hc, Wc = Hpad - KH + 1, Wpad - KW + 1          # conv output size (stride=1)
    Hp, Wp = Hc - 1, Wc - 1                        # after MaxPool2d(2, stride=1)
    if Hc <= 1 or Wc <= 1:
        raise ValueError("spatial size too small for conv(5, pad=1) followed by maxpool(2, 1)")

    if b_tile is None:
        # Batch >=2 images per grid step when it keeps the grid length >= 2 (v7x: 2 TCs/chip).
        b_tile = 2 if (N >= 4 and N % 2 == 0) else 1
    if N % b_tile:
        raise ValueError("batch must be divisible by b_tile")

    Cin_p = 16                                     # bf16 min sublane tile -> pad Cin to 16
    if Cin > Cin_p:
        Cin_p = _round_up(Cin, 16)

    Po = Hp * Wpad                                 # valid pooled outputs live in flat [0, Po)
    Po_pad = _round_up(Po, 128)                    # lane-dense (unmasked) output stores
    Lc = _round_up(Po_pad + Wpad + 1, 128)         # per-image conv columns (128-aligned so the
                                                   # per-batch lane offsets b*Lc stay aligned)
    max_off = (KH - 1) * Wpad + (KW - 1)
    Lin = _round_up(max(max_off + Lc, Hpad * Wpad), 128)   # padded flat-image staging length

    # Free reshape only (view); all zero padding now happens inside the kernel.
    x_flat = x_nchw.reshape(N, Cin, H * W)

    # Weight matrix: (Cout, KH*KW*Cin_p) bf16, contraction rows ordered (kh, kw, cin_p).
    w = jnp.pad(w_oihw, ((0, 0), (0, Cin_p - Cin), (0, 0), (0, 0)))
    wmat = jnp.transpose(w, (0, 2, 3, 1)).reshape(Cout, KH * KW * Cin_p).astype(jnp.bfloat16)

    kernel = functools.partial(
        basic_block_kernel,
        b_tile=b_tile, cin=Cin, height=H, width=W, pad=padding,
        kh=KH, kw=KW, cin_p=Cin_p, wpad=Wpad, lc=Lc, po_pad=Po_pad,
    )

    # TODO(synk): at production scale (Cin~128, H,W~128) tile the flat-spatial axis into
    # bands with a (KH-1)*Wpad+KW-1 halo (v7x: col tile + buffers <= ~48 MiB, v6e/v5e: larger
    # tiles) and set vmem_limit_bytes; whole-image im2col does not fit v7x's 64 MiB VMEM.
    # TODO(synk): if xprof shows the x DMA exposed after spatial tiling, set
    # pipeline_mode=pl.Buffered(3) on the x BlockSpec.
    out_flat = pl.pallas_call(
        kernel,
        out_shape=jax.ShapeDtypeStruct((N, Cout, Po_pad), x_nchw.dtype),
        grid_spec=pltpu.PrefetchScalarGridSpec(
            num_scalar_prefetch=0,
            grid=(N // b_tile,),
            in_specs=[
                pl.BlockSpec((b_tile, Cin, H * W), lambda n: (n, 0, 0)),
                pl.BlockSpec((Cout, KH * KW * Cin_p), lambda n: (0, 0)),   # constant -> no re-DMA
            ],
            out_specs=pl.BlockSpec((b_tile, Cout, Po_pad), lambda n: (n, 0, 0)),
            scratch_shapes=[
                pltpu.VMEM((b_tile, Cin_p, Lin), x_nchw.dtype),            # padded flat images
                pltpu.VMEM((KH * KW * Cin_p, b_tile * Lc), jnp.bfloat16),  # im2col slab
            ],
        ),
        compiler_params=pltpu.CompilerParams(dimension_semantics=("parallel",)),
    )(x_flat, wmat)

    # TODO(synk): a fused downstream consumer should take the flat-padded (N, Cout, Po_pad)
    # layout directly; this trim (one strided HBM pass) exists only to return NCHW here.
    out = out_flat[:, :, :Po].reshape(N, Cout, Hp, Wpad)[:, :, :, :Wp]
    return out


def basic_block_reference(x_nchw, w_oihw, *, padding=1, bf16_operands=False):
    """Pure-JAX reference matching the PyTorch forward; optional bf16-rounded operands to
    mirror the kernel's bf16 MXU inputs (accumulation stays f32 in both)."""
    x, w = x_nchw, w_oihw
    if bf16_operands:
        x = x.astype(jnp.bfloat16).astype(jnp.float32)
        w = w.astype(jnp.bfloat16).astype(jnp.float32)
    y = lax.conv_general_dilated(
        x, w, window_strides=(1, 1),
        padding=((padding, padding), (padding, padding)),
        dimension_numbers=("NCHW", "OIHW", "NCHW"),
        precision=lax.Precision.HIGHEST,
    )
    y = jnp.where(y >= 0, y, NEG_SLOPE * y)
    y = lax.reduce_window(
        y, -jnp.inf, lax.max,
        window_dimensions=(1, 1, 2, 2),
        window_strides=(1, 1, 1, 1),
        padding="VALID",
    )
    return y


if __name__ == "__main__":
    # Small shapes consistent with the module: batch=4 (so b_tile=2 with a 2-step grid),
    # Cin=4, Cout=8, H=W=16; conv 5x5 pad=1 stride=1 -> 14x14; maxpool 2/1 -> 13x13.
    N, Cin, Cout, H, W, K = 4, 4, 8, 16, 16, 5

    key = jax.random.PRNGKey(0)
    kx, kw = jax.random.split(key)
    x = jax.random.normal(kx, (N, Cin, H, W), dtype=jnp.float32)
    weight = 0.1 * jax.random.normal(kw, (Cout, Cin, K, K), dtype=jnp.float32)  # bias=False

    out = basic_block_pallas(x, weight)
    out = jax.block_until_ready(out)
    assert out.shape == (N, Cout, H - 3, W - 3), out.shape

    # Exact-semantics check against a reference with the same bf16-rounded MXU operands.
    ref_bf16 = basic_block_reference(x, weight, bf16_operands=True)
    assert jnp.allclose(out, ref_bf16, rtol=1e-3, atol=1e-3), \
        float(jnp.max(jnp.abs(out - ref_bf16)))

    # Loose sanity check against the full-f32 reference (bf16 operand rounding only).
    ref_f32 = basic_block_reference(x, weight, bf16_operands=False)
    assert jnp.allclose(out, ref_f32, rtol=5e-2, atol=5e-2), \
        float(jnp.max(jnp.abs(out - ref_f32)))

    print("KERNEL_OK")
</pallas_src>

<mosaic_0001>
module attributes {stable_mosaic.version = 11 : i64} {
  func.func @basic_block_kernel(%arg0: i32, %arg1: memref<2x4x256xf32, #tpu.memory_space<vmem>>, %arg2: memref<8x400xbf16, #tpu.memory_space<vmem>>, %arg3: memref<2x8x256xf32, #tpu.memory_space<vmem>>, %arg4: memref<2x16x512xf32, #tpu.memory_space<vmem>>, %arg5: memref<400x768xbf16, #tpu.memory_space<vmem>>) attributes {dimension_semantics = [#tpu.dimension_semantics<parallel>], iteration_bounds = array<i64: 2>, scalar_prefetch = 0 : i64, scratch_operands = 2 : i64, tpu.core_type = #tpu.core_type<tc>, window_params = [{transform_indices = @transform_0, window_bounds = array<i64: 2, 4, 256>}, {pipeline_mode = #tpu.pipeline_mode<synchronous>, transform_indices = @transform_1, window_bounds = array<i64: 8, 400>}, {transform_indices = @transform_2, window_bounds = array<i64: 2, 8, 256>}]} {
    %cst = arith.constant 0.000000e+00 : f32
    %0 = vector.broadcast %cst : f32 to vector<2x16x512xf32>
    %c0 = arith.constant 0 : index
    %c0_0 = arith.constant 0 : index
    %c0_1 = arith.constant 0 : index
    %1 = vector.load %arg4[%c0, %c0_0, %c0_1] : memref<2x16x512xf32, #tpu.memory_space<vmem>>, vector<2x16x512xf32>
    tpu.vector_store %arg4[%c0, %c0_0, %c0_1], %0 {strides = array<i32>} : memref<2x16x512xf32, #tpu.memory_space<vmem>>, vector<2x16x512xf32>,
    %c0_2 = arith.constant 0 : index
    %c0_3 = arith.constant 0 : index
    %c0_4 = arith.constant 0 : index
    %2 = vector.load %arg1[%c0_2, %c0_3, %c0_4] : memref<2x4x256xf32, #tpu.memory_space<vmem>>, vector<1x4x16xf32>
    %3 = vector.shape_cast %2 : vector<1x4x16xf32> to vector<4x16xf32>
    %c0_5 = arith.constant 0 : index
    %c0_6 = arith.constant 0 : index
    %c19 = arith.constant 19 : index
    %4 = vector.load %arg4[%c0_5, %c0_6, %c19] : memref<2x16x512xf32, #tpu.memory_space<vmem>>, vector<1x4x16xf32>
    %5 = vector.shape_cast %4 : vector<1x4x16xf32> to vector<4x16xf32>
    %6 = vector.shape_cast %3 : vector<4x16xf32> to vector<1x4x16xf32>
    tpu.vector_store %arg4[%c0_5, %c0_6, %c19], %6 {strides = array<i32>} : memref<2x16x512xf32, #tpu.memory_space<vmem>>, vector<1x4x16xf32>,
    %c0_7 = arith.constant 0 : index
    %c0_8 = arith.constant 0 : index
    %c16 = arith.constant 16 : index
    %7 = vector.load %arg1[%c0_7, %c0_8, %c16] : memref<2x4x256xf32, #tpu.memory_space<vmem>>, vector<1x4x16xf32>
    %8 = vector.shape_cast %7 : vector<1x4x16xf32> to vector<4x16xf32>
    %c0_9 = arith.constant 0 : index
    %c0_10 = arith.constant 0 : index
    %c37 = arith.constant 37 : index
    %9 = vector.load %arg4[%c0_9, %c0_10, %c37] : memref<2x16x512xf32, #tpu.memory_space<vmem>>, vector<1x4x16xf32>
    %10 = vector.shape_cast %9 : vector<1x4x16xf32> to vector<4x16xf32>
    %11 = vector.shape_cast %8 : vector<4x16xf32> to vector<1x4x16xf32>
    tpu.vector_store %arg4[%c0_9, %c0_10, %c37], %11 {strides = array<i32>} : memref<2x16x512xf32, #tpu.memory_space<vmem>>, vector<1x4x16xf32>,
    %c0_11 = arith.constant 0 : index
    %c0_12 = arith.constant 0 : index
    %c32 = arith.constant 32 : index
    %12 = vector.load %arg1[%c0_11, %c0_12, %c32] : memref<2x4x256xf32, #tpu.memory_space<vmem>>, vector<1x4x16xf32>
    %13 = vector.shape_cast %12 : vector<1x4x16xf32> to vector<4x16xf32>
    %c0_13 = arith.constant 0 : index
    %c0_14 = arith.constant 0 : index
    %c55 = arith.constant 55 : index
    %14 = vector.load %arg4[%c0_13, %c0_14, %c55] : memref<2x16x512xf32, #tpu.memory_space<vmem>>, vector<1x4x16xf32>
    %15 = vector.shape_cast %14 : vector<1x4x16xf32> to vector<4x16xf32>
    %16 = vector.shape_cast %13 : vector<4x16xf32> to vector<1x4x16xf32>
    tpu.vector_store %arg4[%c0_13, %c0_14, %c55], %16 {strides = array<i32>} : memref<2x16x512xf32, #tpu.memory_space<vmem>>, vector<1x4x16xf32>,
    %c0_15 = arith.constant 0 : index
    %c0_16 = arith.constant 0 : index
    %c48 = arith.constant 48 : index
    %17 = vector.load %arg1[%c0_15, %c0_16, %c48] : memref<2x4x256xf32, #tpu.memory_space<vmem>>, vector<1x4x16xf32>
    %18 = vector.shape_cast %17 : vector<1x4x16xf32> to vector<4x16xf32>
    %c0_17 = arith.constant 0 : index
    %c0_18 = arith.constant 0 : index
    %c73 = arith.constant 73 : index
    %19 = vector.load %arg4[%c0_17, %c0_18, %c73] : memref<2x16x512xf32, #tpu.memory_space<vmem>>, vector<1x4x16xf32>
    %20 = vector.shape_cast %19 : vector<1x4x16xf32> to vector<4x16xf32>
    %21 = vector.shape_cast %18 : vector<4x16xf32> to vector<1x4x16xf32>
    tpu.vector_store %arg4[%c0_17, %c0_18, %c73], %21 {strides = array<i32>} : memref<2x16x512xf32, #tpu.memory_space<vmem>>, vector<1x4x16xf32>,
    %c0_19 = arith.constant 0 : index
    %c0_20 = arith.constant 0 : index
    %c64 = arith.constant 64 : index
    %22 = vector.load %arg1[%c0_19, %c0_20, %c64] : memref<2x4x256xf32, #tpu.memory_space<vmem>>, vector<1x4x16xf32>
    %23 = vector.shape_cast %22 : vector<1x4x16xf32> to vector<4x16xf32>
    %c0_21 = arith.constant 0 : index
    %c0_22 = arith.constant 0 : index
    %c91 = arith.constant 91 : index
    %24 = vector.load %arg4[%c0_21, %c0_22, %c91] : memref<2x16x512xf32, #tpu.memory_space<vmem>>, vector<1x4x16xf32>
    %25 = vector.shape_cast %24 : vector<1x4x16xf32> to vector<4x16xf32>
    %26 = vector.shape_cast %23 : vector<4x16xf32> to vector<1x4x16xf32>
    tpu.vector_store %arg4[%c0_21, %c0_22, %c91], %26 {strides = array<i32>} : memref<2x16x512xf32, #tpu.memory_space<vmem>>, vector<1x4x16xf32>,
    %c0_23 = arith.constant 0 : index
    %c0_24 = arith.constant 0 : index
    %c80 = arith.constant 80 : index
    %27 = vector.load %arg1[%c0_23, %c0_24, %c80] : memref<2x4x256xf32, #tpu.memory_space<vmem>>, vector<1x4x16xf32>
    %28 = vector.shape_cast %27 : vector<1x4x16xf32> to vector<4x16xf32>
    %c0_25 = arith.constant 0 : index
    %c0_26 = arith.constant 0 : index
    %c109 = arith.constant 109 : index
    %29 = vector.load %arg4[%c0_25, %c0_26, %c109] : memref<2x16x512xf32, #tpu.memory_space<vmem>>, vector<1x4x16xf32>
    %30 = vector.shape_cast %29 : vector<1x4x16xf32> to vector<4x16xf32>
    %31 = vector.shape_cast %28 : vector<4x16xf32> to vector<1x4x16xf32>
    tpu.vector_store %arg4[%c0_25, %c0_26, %c109], %31 {strides = array<i32>} : memref<2x16x512xf32, #tpu.memory_space<vmem>>, vector<1x4x16xf32>,
    %c0_27 = arith.constant 0 : index
    %c0_28 = arith.constant 0 : index
    %c96 = arith.constant 96 : index
    %32 = vector.load %arg1[%c0_27, %c0_28, %c96] : memref<2x4x256xf32, #tpu.memory_space<vmem>>, vector<1x4x16xf32>
    %33 = vector.shape_cast %32 : vector<1x4x16xf32> to vector<4x16xf32>
    %c0_29 = arith.constant 0 : index
    %c0_30 = arith.constant 0 : index
    %c127 = arith.constant 127 : index
    %34 = vector.load %arg4[%c0_29, %c0_30, %c127] : memref<2x16x512xf32, #tpu.memory_space<vmem>>, vector<1x4x16xf32>
    %35 = vector.shape_cast %34 : vector<1x4x16xf32> to vector<4x16xf32>
    %36 = vector.shape_cast %33 : vector<4x16xf32> to vector<1x4x16xf32>
    tpu.vector_store %arg4[%c0_29, %c0_30, %c127], %36 {strides = array<i32>} : memref<2x16x512xf32, #tpu.memory_space<vmem>>, vector<1x4x16xf32>,
    %c0_31 = arith.constant 0 : index
    %c0_32 = arith.constant 0 : index
    %c112 = arith.constant 112 : index
    %37 = vector.load %arg1[%c0_31, %c0_32, %c112] : memref<2x4x256xf32, #tpu.memory_space<vmem>>, vector<1x4x16xf32>
    %38 = vector.shape_cast %37 : vector<1x4x16xf32> to vector<4x16xf32>
    %c0_33 = arith.constant 0 : index
    %c0_34 = arith.constant 0 : index
    %c145 = arith.constant 145 : index
    %39 = vector.load %arg4[%c0_33, %c0_34, %c145] : memref<2x16x512xf32, #tpu.memory_space<vmem>>, vector<1x4x16xf32>
    %40 = vector.shape_cast %39 : vector<1x4x16xf32> to vector<4x16xf32>
    %41 = vector.shape_cast %38 : vector<4x16xf32> to vector<1x4x16xf32>
    tpu.vector_store %arg4[%c0_33, %c0_34, %c145], %41 {strides = array<i32>} : memref<2x16x512xf32, #tpu.memory_space<vmem>>, vector<1x4x16xf32>,
    %c0_35 = arith.constant 0 : index
    %c0_36 = arith.constant 0 : index
    %c128 = arith.constant 128 : index
    %42 = vector.load %arg1[%c0_35, %c0_36, %c128] : memref<2x4x256xf32, #tpu.memory_space<vmem>>, vector<1x4x16xf32>
    %43 = vector.shape_cast %42 : vector<1x4x16xf32> to vector<4x16xf32>
    %c0_37 = arith.constant 0 : index
    %c0_38 = arith.constant 0 : index
    %c163 = arith.constant 163 : index
    %44 = vector.load %arg4[%c0_37, %c0_38, %c163] : memref<2x16x512xf32, #tpu.memory_space<vmem>>, vector<1x4x16xf32>
    %45 = vector.shape_cast %44 : vector<1x4x16xf32> to vector<4x16xf32>
    %46 = vector.shape_cast %43 : vector<4x16xf32> to vector<1x4x16xf32>
    tpu.vector_store %arg4[%c0_37, %c0_38, %c163], %46 {strides = array<i32>} : memref<2x16x512xf32, #tpu.memory_space<vmem>>, vector<1x4x16xf32>,
    %c0_39 = arith.constant 0 : index
    %c0_40 = arith.constant 0 : index
    %c144 = arith.constant 144 : index
    %47 = vector.load %arg1[%c0_39, %c0_40, %c144] : memref<2x4x256xf32, #tpu.memory_space<vmem>>, vector<1x4x16xf32>
    %48 = vector.shape_cast %47 : vector<1x4x16xf32> to vector<4x16xf32>
    %c0_41 = arith.constant 0 : index
    %c0_42 = arith.constant 0 : index
    %c181 = arith.constant 181 : index
    %49 = vector.load %arg4[%c0_41, %c0_42, %c181] : memref<2x16x512xf32, #tpu.memory_space<vmem>>, vector<1x4x16xf32>
    %50 = vector.shape_cast %49 : vector<1x4x16xf32> to vector<4x16xf32>
    %51 = vector.shape_cast %48 : vector<4x16xf32> to vector<1x4x16xf32>
    tpu.vector_store %arg4[%c0_41, %c0_42, %c181], %51 {strides = array<i32>} : memref<2x16x512xf32, #tpu.memory_space<vmem>>, vector<1x4x16xf32>,
    %c0_43 = arith.constant 0 : index
    %c0_44 = arith.constant 0 : index
    %c160 = arith.constant 160 : index
    %52 = vector.load %arg1[%c0_43, %c0_44, %c160] : memref<2x4x256xf32, #tpu.memory_space<vmem>>, vector<1x4x16xf32>
    %53 = vector.shape_cast %52 : vector<1x4x16xf32> to vector<4x16xf32>
    %c0_45 = arith.constant 0 : index
    %c0_46 = arith.constant 0 : index
    %c199 = arith.constant 199 : index
    %54 = vector.load %arg4[%c0_45, %c0_46, %c199] : memref<2x16x512xf32, #tpu.memory_space<vmem>>, vector<1x4x16xf32>
    %55 = vector.shape_cast %54 : vector<1x4x16xf32> to vector<4x16xf32>
    %56 = vector.shape_cast %53 : vector<4x16xf32> to vector<1x4x16xf32>
    tpu.vector_store %arg4[%c0_45, %c0_46, %c199], %56 {strides = array<i32>} : memref<2x16x512xf32, #tpu.memory_space<vmem>>, vector<1x4x16xf32>,
    %c0_47 = arith.constant 0 : index
    %c0_48 = arith.constant 0 : index
    %c176 = arith.constant 176 : index
    %57 = vector.load %arg1[%c0_47, %c0_48, %c176] : memref<2x4x256xf32, #tpu.memory_space<vmem>>, vector<1x4x16xf32>
    %58 = vector.shape_cast %57 : vector<1x4x16xf32> to vector<4x16xf32>
    %c0_49 = arith.constant 0 : index
    %c0_50 = arith.constant 0 : index
    %c217 = arith.constant 217 : index
    %59 = vector.load %arg4[%c0_49, %c0_50, %c217] : memref<2x16x512xf32, #tpu.memory_space<vmem>>, vector<1x4x16xf32>
    %60 = vector.shape_cast %59 : vector<1x4x16xf32> to vector<4x16xf32>
    %61 = vector.shape_cast %58 : vector<4x16xf32> to vector<1x4x16xf32>
    tpu.vector_store %arg4[%c0_49, %c0_50, %c217], %61 {strides = array<i32>} : memref<2x16x512xf32, #tpu.memory_space<vmem>>, vector<1x4x16xf32>,
    %c0_51 = arith.constant 0 : index
    %c0_52 = arith.constant 0 : index
    %c192 = arith.constant 192 : index
    %62 = vector.load %arg1[%c0_51, %c0_52, %c192] : memref<2x4x256xf32, #tpu.memory_space<vmem>>, vector<1x4x16xf32>
    %63 = vector.shape_cast %62 : vector<1x4x16xf32> to vector<4x16xf32>
    %c0_53 = arith.constant 0 : index
    %c0_54 = arith.constant 0 : index
    %c235 = arith.constant 235 : index
    %64 = vector.load %arg4[%c0_53, %c0_54, %c235] : memref<2x16x512xf32, #tpu.memory_space<vmem>>, vector<1x4x16xf32>
    %65 = vector.shape_cast %64 : vector<1x4x16xf32> to vector<4x16xf32>
    %66 = vector.shape_cast %63 : vector<4x16xf32> to vector<1x4x16xf32>
    tpu.vector_store %arg4[%c0_53, %c0_54, %c235], %66 {strides = array<i32>} : memref<2x16x512xf32, #tpu.memory_space<vmem>>, vector<1x4x16xf32>,
    %c0_55 = arith.constant 0 : index
    %c0_56 = arith.constant 0 : index
    %c208 = arith.constant 208 : index
    %67 = vector.load %arg1[%c0_55, %c0_56, %c208] : memref<2x4x256xf32, #tpu.memory_space<vmem>>, vector<1x4x16xf32>
    %68 = vector.shape_cast %67 : vector<1x4x16xf32> to vector<4x16xf32>
    %c0_57 = arith.constant 0 : index
    %c0_58 = arith.constant 0 : index
    %c253 = arith.constant 253 : index
    %69 = vector.load %arg4[%c0_57, %c0_58, %c253] : memref<2x16x512xf32, #tpu.memory_space<vmem>>, vector<1x4x16xf32>
    %70 = vector.shape_cast %69 : vector<1x4x16xf32> to vector<4x16xf32>
    %71 = vector.shape_cast %68 : vector<4x16xf32> to vector<1x4x16xf32>
    tpu.vector_store %arg4[%c0_57, %c0_58, %c253], %71 {strides = array<i32>} : memref<2x16x512xf32, #tpu.memory_space<vmem>>, vector<1x4x16xf32>,
    %c0_59 = arith.constant 0 : index
    %c0_60 = arith.constant 0 : index
    %c224 = arith.constant 224 : index
    %72 = vector.load %arg1[%c0_59, %c0_60, %c224] : memref<2x4x256xf32, #tpu.memory_space<vmem>>, vector<1x4x16xf32>
    %73 = vector.shape_cast %72 : vector<1x4x16xf32> to vector<4x16xf32>
    %c0_61 = arith.constant 0 : index
    %c0_62 = arith.constant 0 : index
    %c271 = arith.constant 271 : index
    %74 = vector.load %arg4[%c0_61, %c0_62, %c271] : memref<2x16x512xf32, #tpu.memory_space<vmem>>, vector<1x4x16xf32>
    %75 = vector.shape_cast %74 : vector<1x4x16xf32> to vector<4x16xf32>
    %76 = vector.shape_cast %73 : vector<4x16xf32> to vector<1x4x16xf32>
    tpu.vector_store %arg4[%c0_61, %c0_62, %c271], %76 {strides = array<i32>} : memref<2x16x512xf32, #tpu.memory_space<vmem>>, vector<1x4x16xf32>,
    %c0_63 = arith.constant 0 : index
    %c0_64 = arith.constant 0 : index
    %c240 = arith.constant 240 : index
    %77 = vector.load %arg1[%c0_63, %c0_64, %c240] : memref<2x4x256xf32, #tpu.memory_space<vmem>>, vector<1x4x16xf32>
    %78 = vector.shape_cast %77 : vector<1x4x16xf32> to vector<4x16xf32>
    %c0_65 = arith.constant 0 : index
    %c0_66 = arith.constant 0 : index
    %c289 = arith.constant 289 : index
    %79 = vector.load %arg4[%c0_65, %c0_66, %c289] : memref<2x16x512xf32, #tpu.memory_space<vmem>>, vector<1x4x16xf32>
    %80 = vector.shape_cast %79 : vector<1x4x16xf32> to vector<4x16xf32>
    %81 = vector.shape_cast %78 : vector<4x16xf32> to vector<1x4x16xf32>
    tpu.vector_store %arg4[%c0_65, %c0_66, %c289], %81 {strides = array<i32>} : memref<2x16x512xf32, #tpu.memory_space<vmem>>, vector<1x4x16xf32>,
    %c1 = arith.constant 1 : index
    %c0_67 = arith.constant 0 : index
    %c0_68 = arith.constant 0 : index
    %82 = vector.load %arg1[%c1, %c0_67, %c0_68] : memref<2x4x256xf32, #tpu.memory_space<vmem>>, vector<1x4x16xf32>
    %83 = vector.shape_cast %82 : vector<1x4x16xf32> to vector<4x16xf32>
    %c1_69 = arith.constant 1 : index
    %c0_70 = arith.constant 0 : index
    %c19_71 = arith.constant 19 : index
    %84 = vector.load %arg4[%c1_69, %c0_70, %c19_71] : memref<2x16x512xf32, #tpu.memory_space<vmem>>, vector<1x4x16xf32>
    %85 = vector.shape_cast %84 : vector<1x4x16xf32> to vector<4x16xf32>
    %86 = vector.shape_cast %83 : vector<4x16xf32> to vector<1x4x16xf32>
    tpu.vector_store %arg4[%c1_69, %c0_70, %c19_71], %86 {strides = array<i32>} : memref<2x16x512xf32, #tpu.memory_space<vmem>>, vector<1x4x16xf32>,
    %c1_72 = arith.constant 1 : index
    %c0_73 = arith.constant 0 : index
    %c16_74 = arith.constant 16 : index
    %87 = vector.load %arg1[%c1_72, %c0_73, %c16_74] : memref<2x4x256xf32, #tpu.memory_space<vmem>>, vector<1x4x16xf32>
    %88 = vector.shape_cast %87 : vector<1x4x16xf32> to vector<4x16xf32>
    %c1_75 = arith.constant 1 : index
    %c0_76 = arith.constant 0 : index
    %c37_77 = arith.constant 37 : index
    %89 = vector.load %arg4[%c1_75, %c0_76, %c37_77] : memref<2x16x512xf32, #tpu.memory_space<vmem>>, vector<1x4x16xf32>
    %90 = vector.shape_cast %89 : vector<1x4x16xf32> to vector<4x16xf32>
    %91 = vector.shape_cast %88 : vector<4x16xf32> to vector<1x4x16xf32>
    tpu.vector_store %arg4[%c1_75, %c0_76, %c37_77], %91 {strides = array<i32>} : memref<2x16x512xf32, #tpu.memory_space<vmem>>, vector<1x4x16xf32>,
    %c1_78 = arith.constant 1 : index
    %c0_79 = arith.constant 0 : index
    %c32_80 = arith.constant 32 : index
    %92 = vector.load %arg1[%c1_78, %c0_79, %c32_80] : memref<2x4x256xf32, #tpu.memory_space<vmem>>, vector<1x4x16xf32>
    %93 = vector.shape_cast %92 : vector<1x4x16xf32> to vector<4x16xf32>
    %c1_81 = arith.constant 1 : index
    %c0_82 = arith.constant 0 : index
    %c55_83 = arith.constant 55 : index
    %94 = vector.load %arg4[%c1_81, %c0_82, %c55_83] : memref<2x16x512xf32, #tpu.memory_space<vmem>>, vector<1x4x16xf32>
    %95 = vector.shape_cast %94 : vector<1x4x16xf32> to vector<4x16xf32>
    %96 = vector.shape_cast %93 : vector<4x16xf32> to vector<1x4x16xf32>
    tpu.vector_store %arg4[%c1_81, %c0_82, %c55_83], %96 {strides = array<i32>} : memref<2x16x512xf32, #tpu.memory_space<vmem>>, vector<1x4x16xf32>,
    %c1_84 = arith.constant 1 : index
    %c0_85 = arith.constant 0 : index
    %c48_86 = arith.constant 48 : index
    %97 = vector.load %arg1[%c1_84, %c0_85, %c48_86] : memref<2x4x256xf32, #tpu.memory_space<vmem>>, vector<1x4x16xf32>
    %98 = vector.shape_cast %97 : vector<1x4x16xf32> to vector<4x16xf32>
    %c1_87 = arith.constant 1 : index
    %c0_88 = arith.constant 0 : index
    %c73_89 = arith.constant 73 : index
    %99 = vector.load %arg4[%c1_87, %c0_88, %c73_89] : memref<2x16x512xf32, #tpu.memory_space<vmem>>, vector<1x4x16xf32>
    %100 = vector.shape_cast %99 : vector<1x4x16xf32> to vector<4x16xf32>
    %101 = vector.shape_cast %98 : vector<4x16xf32> to vector<1x4x16xf32>
    tpu.vector_store %arg4[%c1_87, %c0_88, %c73_89], %101 {strides = array<i32>} : memref<2x16x512xf32, #tpu.memory_space<vmem>>, vector<1x4x16xf32>,
    %c1_90 = arith.constant 1 : index
    %c0_91 = arith.constant 0 : index
    %c64_92 = arith.constant 64 : index
    %102 = vector.load %arg1[%c1_90, %c0_91, %c64_92] : memref<2x4x256xf32, #tpu.memory_space<vmem>>, vector<1x4x16xf32>
    %103 = vector.shape_cast %102 : vector<1x4x16xf32> to vector<4x16xf32>
    %c1_93 = arith.constant 1 : index
    %c0_94 = arith.constant 0 : index
    %c91_95 = arith.constant 91 : index
    %104 = vector.load %arg4[%c1_93, %c0_94, %c91_95] : memref<2x16x512xf32, #tpu.memory_space<vmem>>, vector<1x4x16xf32>
    %105 = vector.shape_cast %104 : vector<1x4x16xf32> to vector<4x16xf32>
    %106 = vector.shape_cast %103 : vector<4x16xf32> to vector<1x4x16xf32>
    tpu.vector_store %arg4[%c1_93, %c0_94, %c91_95], %106 {strides = array<i32>} : memref<2x16x512xf32, #tpu.memory_space<vmem>>, vector<1x4x16xf32>,
    %c1_96 = arith.constant 1 : index
    %c0_97 = arith.constant 0 : index
    %c80_98 = arith.constant 80 : index
    %107 = vector.load %arg1[%c1_96, %c0_97, %c80_98] : memref<2x4x256xf32, #tpu.memory_space<vmem>>, vector<1x4x16xf32>
    %108 = vector.shape_cast %107 : vector<1x4x16xf32> to vector<4x16xf32>
    %c1_99 = arith.constant 1 : index
    %c0_100 = arith.constant 0 : index
    %c109_101 = arith.constant 109 : index
    %109 = vector.load %arg4[%c1_99, %c0_100, %c109_101] : memref<2x16x512xf32, #tpu.memory_space<vmem>>, vector<1x4x16xf32>
    %110 = vector.shape_cast %109 : vector<1x4x16xf32> to vector<4x16xf32>
    %111 = vector.shape_cast %108 : vector<4x16xf32> to vector<1x4x16xf32>
    tpu.vector_store %arg4[%c1_99, %c0_100, %c109_101], %111 {strides = array<i32>} : memref<2x16x512xf32, #tpu.memory_space<vmem>>, vector<1x4x16xf32>,
    %c1_102 = arith.constant 1 : index
    %c0_103 = arith.constant 0 : index
    %c96_104 = arith.constant 96 : index
    %112 = vector.load %arg1[%c1_102, %c0_103, %c96_104] : memref<2x4x256xf32, #tpu.memory_space<vmem>>, vector<1x4x16xf32>
    %113 = vector.shape_cast %112 : vector<1x4x16xf32> to vector<4x16xf32>
    %c1_105 = arith.constant 1 : index
    %c0_106 = arith.constant 0 : index
    %c127_107 = arith.constant 127 : index
    %114 = vector.load %arg4[%c1_105, %c0_106, %c127_107] : memref<2x16x512xf32, #tpu.memory_space<vmem>>, vector<1x4x16xf32>
    %115 = vector.shape_cast %114 : vector<1x4x16xf32> to vector<4x16xf32>
    %116 = vector.shape_cast %113 : vector<4x16xf32> to vector<1x4x16xf32>
    tpu.vector_store %arg4[%c1_105, %c0_106, %c127_107], %116 {strides = array<i32>} : memref<2x16x512xf32, #tpu.memory_space<vmem>>, vector<1x4x16xf32>,
    %c1_108 = arith.constant 1 : index
    %c0_109 = arith.constant 0 : index
    %c112_110 = arith.constant 112 : index
    %117 = vector.load %arg1[%c1_108, %c0_109, %c112_110] : memref<2x4x256xf32, #tpu.memory_space<vmem>>, vector<1x4x16xf32>
    %118 = vector.shape_cast %117 : vector<1x4x16xf32> to vector<4x16xf32>
    %c1_111 = arith.constant 1 : index
    %c0_112 = arith.constant 0 : index
    %c145_113 = arith.constant 145 : index
    %119 = vector.load %arg4[%c1_111, %c0_112, %c145_113] : memref<2x16x512xf32, #tpu.memory_space<vmem>>, vector<1x4x16xf32>
    %120 = vector.shape_cast %119 : vector<1x4x16xf32> to vector<4x16xf32>
    %121 = vector.shape_cast %118 : vector<4x16xf32> to vector<1x4x16xf32>
    tpu.vector_store %arg4[%c1_111, %c0_112, %c145_113], %121 {strides = array<i32>} : memref<2x16x512xf32, #tpu.memory_space<vmem>>, vector<1x4x16xf32>,
    %c1_114 = arith.constant 1 : index
    %c0_115 = arith.constant 0 : index
    %c128_116 = arith.constant 128 : index
    %122 = vector.load %arg1[%c1_114, %c0_115, %c128_116] : memref<2x4x256xf32, #tpu.memory_space<vmem>>, vector<1x4x16xf32>
    %123 = vector.shape_cast %122 : vector<1x4x16xf32> to vector<4x16xf32>
    %c1_117 = arith.constant 1 : index
    %c0_118 = arith.constant 0 : index
    %c163_119 = arith.constant 163 : index
    %124 = vector.load %arg4[%c1_117, %c0_118, %c163_119] : memref<2x16x512xf32, #tpu.memory_space<vmem>>, vector<1x4x16xf32>
    %125 = vector.shape_cast %124 : vector<1x4x16xf32> to vector<4x16xf32>
    %126 = vector.shape_cast %123 : vector<4x16xf32> to vector<1x4x16xf32>
    tpu.vector_store %arg4[%c1_117, %c0_118, %c163_119], %126 {strides = array<i32>} : memref<2x16x512xf32, #tpu.memory_space<vmem>>, vector<1x4x16xf32>,
    %c1_120 = arith.constant 1 : index
    %c0_121 = arith.constant 0 : index
    %c144_122 = arith.constant 144 : index
    %127 = vector.load %arg1[%c1_120, %c0_121, %c144_122] : memref<2x4x256xf32, #tpu.memory_space<vmem>>, vector<1x4x16xf32>
    %128 = vector.shape_cast %127 : vector<1x4x16xf32> to vector<4x16xf32>
    %c1_123 = arith.constant 1 : index
    %c0_124 = arith.constant 0 : index
    %c181_125 = arith.constant 181 : index
    %129 = vector.load %arg4[%c1_123, %c0_124, %c181_125] : memref<2x16x512xf32, #tpu.memory_space<vmem>>, vector<1x4x16xf32>
    %130 = vector.shape_cast %129 : vector<1x4x16xf32> to vector<4x16xf32>
    %131 = vector.shape_cast %128 : vector<4x16xf32> to vector<1x4x16xf32>
    tpu.vector_store %arg4[%c1_123, %c0_124, %c181_125], %131 {strides = array<i32>} : memref<2x16x512xf32, #tpu.memory_space<vmem>>, vector<1x4x16xf32>,
    %c1_126 = arith.constant 1 : index
    %c0_127 = arith.constant 0 : index
    %c160_128 = arith.constant 160 : index
    %132 = vector.load %arg1[%c1_126, %c0_127, %c160_128] : memref<2x4x256xf32, #tpu.memory_space<vmem>>, vector<1x4x16xf32>
    %133 = vector.shape_cast %132 : vector<1x4x16xf32> to vector<4x16xf32>
    %c1_129 = arith.constant 1 : index
    %c0_130 = arith.constant 0 : index
    %c199_131 = arith.constant 199 : index
    %134 = vector.load %arg4[%c1_129, %c0_130, %c199_131] : memref<2x16x512xf32, #tpu.memory_space<vmem>>, vector<1x4x16xf32>
    %135 = vector.shape_cast %134 : vector<1x4x16xf32> to vector<4x16xf32>
    %136 = vector.shape_cast %133 : vector<4x16xf32> to vector<1x4x16xf32>
    tpu.vector_store %arg4[%c1_129, %c0_130, %c199_131], %136 {strides = array<i32>} : memref<2x16x512xf32, #tpu.memory_space<vmem>>, vector<1x4x16xf32>,
    %c1_132 = arith.constant 1 : index
    %c0_133 = arith.constant 0 : index
    %c176_134 = arith.constant 176 : index
    %137 = vector.load %arg1[%c1_132, %c0_133, %c176_134] : memref<2x4x256xf32, #tpu.memory_space<vmem>>, vector<1x4x16xf32>
    %138 = vector.shape_cast %137 : vector<1x4x16xf32> to vector<4x16xf32>
    %c1_135 = arith.constant 1 : index
    %c0_136 = arith.constant 0 : index
    %c217_137 = arith.constant 217 : index
    %139 = vector.load %arg4[%c1_135, %c0_136, %c217_137] : memref<2x16x512xf32, #tpu.memory_space<vmem>>, vector<1x4x16xf32>
    %140 = vector.shape_cast %139 : vector<1x4x16xf32> to vector<4x16xf32>
    %141 = vector.shape_cast %138 : vector<4x16xf32> to vector<1x4x16xf32>
    tpu.vector_store %arg4[%c1_135, %c0_136, %c217_137], %141 {strides = array<i32>} : memref<2x16x512xf32, #tpu.memory_space<vmem>>, vector<1x4x16xf32>,
    %c1_138 = arith.constant 1 : index
    %c0_139 = arith.constant 0 : index
    %c192_140 = arith.constant 192 : index
    %142 = vector.load %arg1[%c1_138, %c0_139, %c192_140] : memref<2x4x256xf32, #tpu.memory_space<vmem>>, vector<1x4x16xf32>
    %143 = vector.shape_cast %142 : vector<1x4x16xf32> to vector<4x16xf32>
    %c1_141 = arith.constant 1 : index
    %c0_142 = arith.constant 0 : index
    %c235_143 = arith.constant 235 : index
    %144 = vector.load %arg4[%c1_141, %c0_142, %c235_143] : memref<2x16x512xf32, #tpu.memory_space<vmem>>, vector<1x4x16xf32>
    %145 = vector.shape_cast %144 : vector<1x4x16xf32> to vector<4x16xf32>
    %146 = vector.shape_cast %143 : vector<4x16xf32> to vector<1x4x16xf32>
    tpu.vector_store %arg4[%c1_141, %c0_142, %c235_143], %146 {strides = array<i32>} : memref<2x16x512xf32, #tpu.memory_space<vmem>>, vector<1x4x16xf32>,
    %c1_144 = arith.constant 1 : index
    %c0_145 = arith.constant 0 : index
    %c208_146 = arith.constant 208 : index
    %147 = vector.load %arg1[%c1_144, %c0_145, %c208_146] : memref<2x4x256xf32, #tpu.memory_space<vmem>>, vector<1x4x16xf32>
    %148 = vector.shape_cast %147 : vector<1x4x16xf32> to vector<4x16xf32>
    %c1_147 = arith.constant 1 : index
    %c0_148 = arith.constant 0 : index
    %c253_149 = arith.constant 253 : index
    %149 = vector.load %arg4[%c1_147, %c0_148, %c253_149] : memref<2x16x512xf32, #tpu.memory_space<vmem>>, vector<1x4x16xf32>
    %150 = vector.shape_cast %149 : vector<1x4x16xf32> to vector<4x16xf32>
    %151 = vector.shape_cast %148 : vector<4x16xf32> to vector<1x4x16xf32>
    tpu.vector_store %arg4[%c1_147, %c0_148, %c253_149], %151 {strides = array<i32>} : memref<2x16x512xf32, #tpu.memory_space<vmem>>, vector<1x4x16xf32>,
    %c1_150 = arith.constant 1 : index
    %c0_151 = arith.constant 0 : index
    %c224_152 = arith.constant 224 : index
    %152 = vector.load %arg1[%c1_150, %c0_151, %c224_152] : memref<2x4x256xf32, #tpu.memory_space<vmem>>, vector<1x4x16xf32>
    %153 = vector.shape_cast %152 : vector<1x4x16xf32> to vector<4x16xf32>
    %c1_153 = arith.constant 1 : index
    %c0_154 = arith.constant 0 : index
    %c271_155 = arith.constant 271 : index
    %154 = vector.load %arg4[%c1_153, %c0_154, %c271_155] : memref<2x16x512xf32, #tpu.memory_space<vmem>>, vector<1x4x16xf32>
    %155 = vector.shape_cast %154 : vector<1x4x16xf32> to vector<4x16xf32>
    %156 = vector.shape_cast %153 : vector<4x16xf32> to vector<1x4x16xf32>
    tpu.vector_store %arg4[%c1_153, %c0_154, %c271_155], %156 {strides = array<i32>} : memref<2x16x512xf32, #tpu.memory_space<vmem>>, vector<1x4x16xf32>,
    %c1_156 = arith.constant 1 : index
    %c0_157 = arith.constant 0 : index
    %c240_158 = arith.constant 240 : index
    %157 = vector.load %arg1[%c1_156, %c0_157, %c240_158] : memref<2x4x256xf32, #tpu.memory_space<vmem>>, vector<1x4x16xf32>
    %158 = vector.shape_cast %157 : vector<1x4x16xf32> to vector<4x16xf32>
    %c1_159 = arith.constant 1 : index
    %c0_160 = arith.constant 0 : index
    %c289_161 = arith.constant 289 : index
    %159 = vector.load %arg4[%c1_159, %c0_160, %c289_161] : memref<2x16x512xf32, #tpu.memory_space<vmem>>, vector<1x4x16xf32>
    %160 = vector.shape_cast %159 : vector<1x4x16xf32> to vector<4x16xf32>
    %161 = vector.shape_cast %158 : vector<4x16xf32> to vector<1x4x16xf32>
    tpu.vector_store %arg4[%c1_159, %c0_160, %c289_161], %161 {strides = array<i32>} : memref<2x16x512xf32, #tpu.memory_space<vmem>>, vector<1x4x16xf32>,
    %c0_162 = arith.constant 0 : index
    %c0_163 = arith.constant 0 : index
    %c0_164 = arith.constant 0 : index
    %162 = vector.load %arg4[%c0_162, %c0_163, %c0_164] : memref<2x16x512xf32, #tpu.memory_space<vmem>>, vector<1x16x384xf32>
    %163 = vector.shape_cast %162 : vector<1x16x384xf32> to vector<16x384xf32>
    %164 = arith.truncf %163 : vector<16x384xf32> to vector<16x384xbf16>
    %c0_165 = arith.constant 0 : index
    %c0_166 = arith.constant 0 : index
    %165 = vector.load %arg5[%c0_165, %c0_166] : memref<400x768xbf16, #tpu.memory_space<vmem>>, vector<16x384xbf16>
    tpu.vector_store %arg5[%c0_165, %c0_166], %164 {strides = array<i32>} : memref<400x768xbf16, #tpu.memory_space<vmem>>, vector<16x384xbf16>,
    %c0_167 = arith.constant 0 : index
    %c0_168 = arith.constant 0 : index
    %c1_169 = arith.constant 1 : index
    %166 = vector.load %arg4[%c0_167, %c0_168, %c1_169] : memref<2x16x512xf32, #tpu.memory_space<vmem>>, vector<1x16x384xf32>
    %167 = vector.shape_cast %166 : vector<1x16x384xf32> to vector<16x384xf32>
    %168 = arith.truncf %167 : vector<16x384xf32> to vector<16x384xbf16>
    %c16_170 = arith.constant 16 : index
    %c0_171 = arith.constant 0 : index
    %169 = vector.load %arg5[%c16_170, %c0_171] : memref<400x768xbf16, #tpu.memory_space<vmem>>, vector<16x384xbf16>
    tpu.vector_store %arg5[%c16_170, %c0_171], %168 {strides = array<i32>} : memref<400x768xbf16, #tpu.memory_space<vmem>>, vector<16x384xbf16>,
    %c0_172 = arith.constant 0 : index
    %c0_173 = arith.constant 0 : index
    %c2 = arith.constant 2 : index
    %170 = vector.load %arg4[%c0_172, %c0_173, %c2] : memref<2x16x512xf32, #tpu.memory_space<vmem>>, vector<1x16x384xf32>
    %171 = vector.shape_cast %170 : vector<1x16x384xf32> to vector<16x384xf32>
    %172 = arith.truncf %171 : vector<16x384xf32> to vector<16x384xbf16>
    %c32_174 = arith.constant 32 : index
    %c0_175 = arith.constant 0 : index
    %173 = vector.load %arg5[%c32_174, %c0_175] : memref<400x768xbf16, #tpu.memory_space<vmem>>, vector<16x384xbf16>
    tpu.vector_store %arg5[%c32_174, %c0_175], %172 {strides = array<i32>} : memref<400x768xbf16, #tpu.memory_space<vmem>>, vector<16x384xbf16>,
    %c0_176 = arith.constant 0 : index
    %c0_177 = arith.constant 0 : index
    %c3 = arith.constant 3 : index
    %174 = vector.load %arg4[%c0_176, %c0_177, %c3] : memref<2x16x512xf32, #tpu.memory_space<vmem>>, vector<1x16x384xf32>
    %175 = vector.shape_cast %174 : vector<1x16x384xf32> to vector<16x384xf32>
    %176 = arith.truncf %175 : vector<16x384xf32> to vector<16x384xbf16>
    %c48_178 = arith.constant 48 : index
    %c0_179 = arith.constant 0 : index
    %177 = vector.load %arg5[%c48_178, %c0_179] : memref<400x768xbf16, #tpu.memory_space<vmem>>, vector<16x384xbf16>
    tpu.vector_store %arg5[%c48_178, %c0_179], %176 {strides = array<i32>} : memref<400x768xbf16, #tpu.memory_space<vmem>>, vector<16x384xbf16>,
    %c0_180 = arith.constant 0 : index
    %c0_181 = arith.constant 0 : index
    %c4 = arith.constant 4 : index
    %178 = vector.load %arg4[%c0_180, %c0_181, %c4] : memref<2x16x512xf32, #tpu.memory_space<vmem>>, vector<1x16x384xf32>
    %179 = vector.shape_cast %178 : vector<1x16x384xf32> to vector<16x384xf32>
    %180 = arith.truncf %179 : vector<16x384xf32> to vector<16x384xbf16>
    %c64_182 = arith.constant 64 : index
    %c0_183 = arith.constant 0 : index
    %181 = vector.load %arg5[%c64_182, %c0_183] : memref<400x768xbf16, #tpu.memory_space<vmem>>, vector<16x384xbf16>
    tpu.vector_store %arg5[%c64_182, %c0_183], %180 {strides = array<i32>} : memref<400x768xbf16, #tpu.memory_space<vmem>>, vector<16x384xbf16>,
    %c0_184 = arith.constant 0 : index
    %c0_185 = arith.constant 0 : index
    %c18 = arith.constant 18 : index
    %182 = vector.load %arg4[%c0_184, %c0_185, %c18] : memref<2x16x512xf32, #tpu.memory_space<vmem>>, vector<1x16x384xf32>
    %183 = vector.shape_cast %182 : vector<1x16x384xf32> to vector<16x384xf32>
    %184 = arith.truncf %183 : vector<16x384xf32> to vector<16x384xbf16>
    %c80_186 = arith.constant 80 : index
    %c0_187 = arith.constant 0 : index
    %185 = vector.load %arg5[%c80_186, %c0_187] : memref<400x768xbf16, #tpu.memory_space<vmem>>, vector<16x384xbf16>
    tpu.vector_store %arg5[%c80_186, %c0_187], %184 {strides = array<i32>} : memref<400x768xbf16, #tpu.memory_space<vmem>>, vector<16x384xbf16>,
    %c0_188 = arith.constant 0 : index
    %c0_189 = arith.constant 0 : index
    %c19_190 = arith.constant 19 : index
    %186 = vector.load %arg4[%c0_188, %c0_189, %c19_190] : memref<2x16x512xf32, #tpu.memory_space<vmem>>, vector<1x16x384xf32>
    %187 = vector.shape_cast %186 : vector<1x16x384xf32> to vector<16x384xf32>
    %188 = arith.truncf %187 : vector<16x384xf32> to vector<16x384xbf16>
    %c96_191 = arith.constant 96 : index
    %c0_192 = arith.constant 0 : index
    %189 = vector.load %arg5[%c96_191, %c0_192] : memref<400x768xbf16, #tpu.memory_space<vmem>>, vector<16x384xbf16>
    tpu.vector_store %arg5[%c96_191, %c0_192], %188 {strides = array<i32>} : memref<400x768xbf16, #tpu.memory_space<vmem>>, vector<16x384xbf16>,
    %c0_193 = arith.constant 0 : index
    %c0_194 = arith.constant 0 : index
    %c20 = arith.constant 20 : index
    %190 = vector.load %arg4[%c0_193, %c0_194, %c20] : memref<2x16x512xf32, #tpu.memory_space<vmem>>, vector<1x16x384xf32>
    %191 = vector.shape_cast %190 : vector<1x16x384xf32> to vector<16x384xf32>
    %192 = arith.truncf %191 : vector<16x384xf32> to vector<16x384xbf16>
    %c112_195 = arith.constant 112 : index
    %c0_196 = arith.constant 0 : index
    %193 = vector.load %arg5[%c112_195, %c0_196] : memref<400x768xbf16, #tpu.memory_space<vmem>>, vector<16x384xbf16>
    tpu.vector_store %arg5[%c112_195, %c0_196], %192 {strides = array<i32>} : memref<400x768xbf16, #tpu.memory_space<vmem>>, vector<16x384xbf16>,
    %c0_197 = arith.constant 0 : index
    %c0_198 = arith.constant 0 : index
    %c21 = arith.constant 21 : index
    %194 = vector.load %arg4[%c0_197, %c0_198, %c21] : memref<2x16x512xf32, #tpu.memory_space<vmem>>, vector<1x16x384xf32>
    %195 = vector.shape_cast %194 : vector<1x16x384xf32> to vector<16x384xf32>
    %196 = arith.truncf %195 : vector<16x384xf32> to vector<16x384xbf16>
    %c128_199 = arith.constant 128 : index
    %c0_200 = arith.constant 0 : index
    %197 = vector.load %arg5[%c128_199, %c0_200] : memref<400x768xbf16, #tpu.memory_space<vmem>>, vector<16x384xbf16>
    tpu.vector_store %arg5[%c128_199, %c0_200], %196 {strides = array<i32>} : memref<400x768xbf16, #tpu.memory_space<vmem>>, vector<16x384xbf16>,
    %c0_201 = arith.constant 0 : index
    %c0_202 = arith.constant 0 : index
    %c22 = arith.constant 22 : index
    %198 = vector.load %arg4[%c0_201, %c0_202, %c22] : memref<2x16x512xf32, #tpu.memory_space<vmem>>, vector<1x16x384xf32>
    %199 = vector.shape_cast %198 : vector<1x16x384xf32> to vector<16x384xf32>
    %200 = arith.truncf %199 : vector<16x384xf32> to vector<16x384xbf16>
    %c144_203 = arith.constant 144 : index
    %c0_204 = arith.constant 0 : index
    %201 = vector.load %arg5[%c144_203, %c0_204] : memref<400x768xbf16, #tpu.memory_space<vmem>>, vector<16x384xbf16>
    tpu.vector_store %arg5[%c144_203, %c0_204], %200 {strides = array<i32>} : memref<400x768xbf16, #tpu.memory_space<vmem>>, vector<16x384xbf16>,
    %c0_205 = arith.constant 0 : index
    %c0_206 = arith.constant 0 : index
    %c36 = arith.constant 36 : index
    %202 = vector.load %arg4[%c0_205, %c0_206, %c36] : memref<2x16x512xf32, #tpu.memory_space<vmem>>, vector<1x16x384xf32>
    %203 = vector.shape_cast %202 : vector<1x16x384xf32> to vector<16x384xf32>
    %204 = arith.truncf %203 : vector<16x384xf32> to vector<16x384xbf16>
    %c160_207 = arith.constant 160 : index
    %c0_208 = arith.constant 0 : index
    %205 = vector.load %arg5[%c160_207, %c0_208] : memref<400x768xbf16, #tpu.memory_space<vmem>>, vector<16x384xbf16>
    tpu.vector_store %arg5[%c160_207, %c0_208], %204 {strides = array<i32>} : memref<400x768xbf16, #tpu.memory_space<vmem>>, vector<16x384xbf16>,
    %c0_209 = arith.constant 0 : index
    %c0_210 = arith.constant 0 : index
    %c37_211 = arith.constant 37 : index
    %206 = vector.load %arg4[%c0_209, %c0_210, %c37_211] : memref<2x16x512xf32, #tpu.memory_space<vmem>>, vector<1x16x384xf32>
    %207 = vector.shape_cast %206 : vector<1x16x384xf32> to vector<16x384xf32>
    %208 = arith.truncf %207 : vector<16x384xf32> to vector<16x384xbf16>
    %c176_212 = arith.constant 176 : index
    %c0_213 = arith.constant 0 : index
    %209 = vector.load %arg5[%c176_212, %c0_213] : memref<400x768xbf16, #tpu.memory_space<vmem>>, vector<16x384xbf16>
    tpu.vector_store %arg5[%c176_212, %c0_213], %208 {strides = array<i32>} : memref<400x768xbf16, #tpu.memory_space<vmem>>, vector<16x384xbf16>,
    %c0_214 = arith.constant 0 : index
    %c0_215 = arith.constant 0 : index
    %c38 = arith.constant 38 : index
    %210 = vector.load %arg4[%c0_214, %c0_215, %c38] : memref<2x16x512xf32, #tpu.memory_space<vmem>>, vector<1x16x384xf32>
    %211 = vector.shape_cast %210 : vector<1x16x384xf32> to vector<16x384xf32>
    %212 = arith.truncf %211 : vector<16x384xf32> to vector<16x384xbf16>
    %c192_216 = arith.constant 192 : index
    %c0_217 = arith.constant 0 : index
    %213 = vector.load %arg5[%c192_216, %c0_217] : memref<400x768xbf16, #tpu.memory_space<vmem>>, vector<16x384xbf16>
    tpu.vector_store %arg5[%c192_216, %c0_217], %212 {strides = array<i32>} : memref<400x768xbf16, #tpu.memory_space<vmem>>, vector<16x384xbf16>,
    %c0_218 = arith.constant 0 : index
    %c0_219 = arith.constant 0 : index
    %c39 = arith.constant 39 : index
    %214 = vector.load %arg4[%c0_218, %c0_219, %c39] : memref<2x16x512xf32, #tpu.memory_space<vmem>>, vector<1x16x384xf32>
    %215 = vector.shape_cast %214 : vector<1x16x384xf32> to vector<16x384xf32>
    %216 = arith.truncf %215 : vector<16x384xf32> to vector<16x384xbf16>
    %c208_220 = arith.constant 208 : index
    %c0_221 = arith.constant 0 : index
    %217 = vector.load %arg5[%c208_220, %c0_221] : memref<400x768xbf16, #tpu.memory_space<vmem>>, vector<16x384xbf16>
    tpu.vector_store %arg5[%c208_220, %c0_221], %216 {strides = array<i32>} : memref<400x768xbf16, #tpu.memory_space<vmem>>, vector<16x384xbf16>,
    %c0_222 = arith.constant 0 : index
    %c0_223 = arith.constant 0 : index
    %c40 = arith.constant 40 : index
    %218 = vector.load %arg4[%c0_222, %c0_223, %c40] : memref<2x16x512xf32, #tpu.memory_space<vmem>>, vector<1x16x384xf32>
    %219 = vector.shape_cast %218 : vector<1x16x384xf32> to vector<16x384xf32>
    %220 = arith.truncf %219 : vector<16x384xf32> to vector<16x384xbf16>
    %c224_224 = arith.constant 224 : index
    %c0_225 = arith.constant 0 : index
    %221 = vector.load %arg5[%c224_224, %c0_225] : memref<400x768xbf16, #tpu.memory_space<vmem>>, vector<16x384xbf16>
    tpu.vector_store %arg5[%c224_224, %c0_225], %220 {strides = array<i32>} : memref<400x768xbf16, #tpu.memory_space<vmem>>, vector<16x384xbf16>,
    %c0_226 = arith.constant 0 : index
    %c0_227 = arith.constant 0 : index
    %c54 = arith.constant 54 : index
    %222 = vector.load %arg4[%c0_226, %c0_227, %c54] : memref<2x16x512xf32, #tpu.memory_space<vmem>>, vector<1x16x384xf32>
    %223 = vector.shape_cast %222 : vector<1x16x384xf32> to vector<16x384xf32>
    %224 = arith.truncf %223 : vector<16x384xf32> to vector<16x384xbf16>
    %c240_228 = arith.constant 240 : index
    %c0_229 = arith.constant 0 : index
    %225 = vector.load %arg5[%c240_228, %c0_229] : memref<400x768xbf16, #tpu.memory_space<vmem>>, vector<16x384xbf16>
    tpu.vector_store %arg5[%c240_228, %c0_229], %224 {strides = array<i32>} : memref<400x768xbf16, #tpu.memory_space<vmem>>, vector<16x384xbf16>,
    %c0_230 = arith.constant 0 : index
    %c0_231 = arith.constant 0 : index
    %c55_232 = arith.constant 55 : index
    %226 = vector.load %arg4[%c0_230, %c0_231, %c55_232] : memref<2x16x512xf32, #tpu.memory_space<vmem>>, vector<1x16x384xf32>
    %227 = vector.shape_cast %226 : vector<1x16x384xf32> to vector<16x384xf32>
    %228 = arith.truncf %227 : vector<16x384xf32> to vector<16x384xbf16>
    %c256 = arith.constant 256 : index
    %c0_233 = arith.constant 0 : index
    %229 = vector.load %arg5[%c256, %c0_233] : memref<400x768xbf16, #tpu.memory_space<vmem>>, vector<16x384xbf16>
    tpu.vector_store %arg5[%c256, %c0_233], %228 {strides = array<i32>} : memref<400x768xbf16, #tpu.memory_space<vmem>>, vector<16x384xbf16>,
    %c0_234 = arith.constant 0 : index
    %c0_235 = arith.constant 0 : index
    %c56 = arith.constant 56 : index
    %230 = vector.load %arg4[%c0_234, %c0_235, %c56] : memref<2x16x512xf32, #tpu.memory_space<vmem>>, vector<1x16x384xf32>
    %231 = vector.shape_cast %230 : vector<1x16x384xf32> to vector<16x384xf32>
    %232 = arith.truncf %231 : vector<16x384xf32> to vector<16x384xbf16>
    %c272 = arith.constant 272 : index
    %c0_236 = arith.constant 0 : index
    %233 = vector.load %arg5[%c272, %c0_236] : memref<400x768xbf16, #tpu.memory_space<vmem>>, vector<16x384xbf16>
    tpu.vector_store %arg5[%c272, %c0_236], %232 {strides = array<i32>} : memref<400x768xbf16, #tpu.memory_space<vmem>>, vector<16x384xbf16>,
    %c0_237 = arith.constant 0 : index
    %c0_238 = arith.constant 0 : index
    %c57 = arith.constant 57 : index
    %234 = vector.load %arg4[%c0_237, %c0_238, %c57] : memref<2x16x512xf32, #tpu.memory_space<vmem>>, vector<1x16x384xf32>
    %235 = vector.shape_cast %234 : vector<1x16x384xf32> to vector<16x384xf32>
    %236 = arith.truncf %235 : vector<16x384xf32> to vector<16x384xbf16>
    %c288 = arith.constant 288 : index
    %c0_239 = arith.constant 0 : index
    %237 = vector.load %arg5[%c288, %c0_239] : memref<400x768xbf16, #tpu.memory_space<vmem>>, vector<16x384xbf16>
    tpu.vector_store %arg5[%c288, %c0_239], %236 {strides = array<i32>} : memref<400x768xbf16, #tpu.memory_space<vmem>>, vector<16x384xbf16>,
    %c0_240 = arith.constant 0 : index
    %c0_241 = arith.constant 0 : index
    %c58 = arith.constant 58 : index
    %238 = vector.load %arg4[%c0_240, %c0_241, %c58] : memref<2x16x512xf32, #tpu.memory_space<vmem>>, vector<1x16x384xf32>
    %239 = vector.shape_cast %238 : vector<1x16x384xf32> to vector<16x384xf32>
    %240 = arith.truncf %239 : vector<16x384xf32> to vector<16x384xbf16>
    %c304 = arith.constant 304 : index
    %c0_242 = arith.constant 0 : index
    %241 = vector.load %arg5[%c304, %c0_242] : memref<400x768xbf16, #tpu.memory_space<vmem>>, vector<16x384xbf16>
    tpu.vector_store %arg5[%c304, %c0_242], %240 {strides = array<i32>} : memref<400x768xbf16, #tpu.memory_space<vmem>>, vector<16x384xbf16>,
    %c0_243 = arith.constant 0 : index
    %c0_244 = arith.constant 0 : index
    %c72 = arith.constant 72 : index
    %242 = vector.load %arg4[%c0_243, %c0_244, %c72] : memref<2x16x512xf32, #tpu.memory_space<vmem>>, vector<1x16x384xf32>
    %243 = vector.shape_cast %242 : vector<1x16x384xf32> to vector<16x384xf32>
    %244 = arith.truncf %243 : vector<16x384xf32> to vector<16x384xbf16>
    %c320 = arith.constant 320 : index
    %c0_245 = arith.constant 0 : index
    %245 = vector.load %arg5[%c320, %c0_245] : memref<400x768xbf16, #tpu.memory_space<vmem>>, vector<16x384xbf16>
    tpu.vector_store %arg5[%c320, %c0_245], %244 {strides = array<i32>} : memref<400x768xbf16, #tpu.memory_space<vmem>>, vector<16x384xbf16>,
    %c0_246 = arith.constant 0 : index
    %c0_247 = arith.constant 0 : index
    %c73_248 = arith.constant 73 : index
    %246 = vector.load %arg4[%c0_246, %c0_247, %c73_248] : memref<2x16x512xf32, #tpu.memory_space<vmem>>, vector<1x16x384xf32>
    %247 = vector.shape_cast %246 : vector<1x16x384xf32> to vector<16x384xf32>
    %248 = arith.truncf %247 : vector<16x384xf32> to vector<16x384xbf16>
    %c336 = arith.constant 336 : index
    %c0_249 = arith.constant 0 : index
    %249 = vector.load %arg5[%c336, %c0_249] : memref<400x768xbf16, #tpu.memory_space<vmem>>, vector<16x384xbf16>
    tpu.vector_store %arg5[%c336, %c0_249], %248 {strides = array<i32>} : memref<400x768xbf16, #tpu.memory_space<vmem>>, vector<16x384xbf16>,
    %c0_250 = arith.constant 0 : index
    %c0_251 = arith.constant 0 : index
    %c74 = arith.constant 74 : index
    %250 = vector.load %arg4[%c0_250, %c0_251, %c74] : memref<2x16x512xf32, #tpu.memory_space<vmem>>, vector<1x16x384xf32>
    %251 = vector.shape_cast %250 : vector<1x16x384xf32> to vector<16x384xf32>
    %252 = arith.truncf %251 : vector<16x384xf32> to vector<16x384xbf16>
    %c352 = arith.constant 352 : index
    %c0_252 = arith.constant 0 : index
    %253 = vector.load %arg5[%c352, %c0_252] : memref<400x768xbf16, #tpu.memory_space<vmem>>, vector<16x384xbf16>
    tpu.vector_store %arg5[%c352, %c0_252], %252 {strides = array<i32>} : memref<400x768xbf16, #tpu.memory_space<vmem>>, vector<16x384xbf16>,
    %c0_253 = arith.constant 0 : index
    %c0_254 = arith.constant 0 : index
    %c75 = arith.constant 75 : index
    %254 = vector.load %arg4[%c0_253, %c0_254, %c75] : memref<2x16x512xf32, #tpu.memory_space<vmem>>, vector<1x16x384xf32>
    %255 = vector.shape_cast %254 : vector<1x16x384xf32> to vector<16x384xf32>
    %256 = arith.truncf %255 : vector<16x384xf32> to vector<16x384xbf16>
    %c368 = arith.constant 368 : index
    %c0_255 = arith.constant 0 : index
    %257 = vector.load %arg5[%c368, %c0_255] : memref<400x768xbf16, #tpu.memory_space<vmem>>, vector<16x384xbf16>
    tpu.vector_store %arg5[%c368, %c0_255], %256 {strides = array<i32>} : memref<400x768xbf16, #tpu.memory_space<vmem>>, vector<16x384xbf16>,
    %c0_256 = arith.constant 0 : index
    %c0_257 = arith.constant 0 : index
    %c76 = arith.constant 76 : index
    %258 = vector.load %arg4[%c0_256, %c0_257, %c76] : memref<2x16x512xf32, #tpu.memory_space<vmem>>, vector<1x16x384xf32>
    %259 = vector.shape_cast %258 : vector<1x16x384xf32> to vector<16x384xf32>
    %260 = arith.truncf %259 : vector<16x384xf32> to vector<16x384xbf16>
    %c384 = arith.constant 384 : index
    %c0_258 = arith.constant 0 : index
    %261 = vector.load %arg5[%c384, %c0_258] : memref<400x768xbf16, #tpu.memory_space<vmem>>, vector<16x384xbf16>
    tpu.vector_store %arg5[%c384, %c0_258], %260 {strides = array<i32>} : memref<400x768xbf16, #tpu.memory_space<vmem>>, vector<16x384xbf16>,
    %c1_259 = arith.constant 1 : index
    %c0_260 = arith.constant 0 : index
    %c0_261 = arith.constant 0 : index
    %262 = vector.load %arg4[%c1_259, %c0_260, %c0_261] : memref<2x16x512xf32, #tpu.memory_space<vmem>>, vector<1x16x384xf32>
    %263 = vector.shape_cast %262 : vector<1x16x384xf32> to vector<16x384xf32>
    %264 = arith.truncf %263 : vector<16x384xf32> to vector<16x384xbf16>
    %c0_262 = arith.constant 0 : index
    %c384_263 = arith.constant 384 : index
    %265 = vector.load %arg5[%c0_262, %c384_263] : memref<400x768xbf16, #tpu.memory_space<vmem>>, vector<16x384xbf16>
    tpu.vector_store %arg5[%c0_262, %c384_263], %264 {strides = array<i32>} : memref<400x768xbf16, #tpu.memory_space<vmem>>, vector<16x384xbf16>,
    %c1_264 = arith.constant 1 : index
    %c0_265 = arith.constant 0 : index
    %c1_266 = arith.constant 1 : index
    %266 = vector.load %arg4[%c1_264, %c0_265, %c1_266] : memref<2x16x512xf32, #tpu.memory_space<vmem>>, vector<1x16x384xf32>
    %267 = vector.shape_cast %266 : vector<1x16x384xf32> to vector<16x384xf32>
    %268 = arith.truncf %267 : vector<16x384xf32> to vector<16x384xbf16>
    %c16_267 = arith.constant 16 : index
    %c384_268 = arith.constant 384 : index
    %269 = vector.load %arg5[%c16_267, %c384_268] : memref<400x768xbf16, #tpu.memory_space<vmem>>, vector<16x384xbf16>
    tpu.vector_store %arg5[%c16_267, %c384_268], %268 {strides = array<i32>} : memref<400x768xbf16, #tpu.memory_space<vmem>>, vector<16x384xbf16>,
    %c1_269 = arith.constant 1 : index
    %c0_270 = arith.constant 0 : index
    %c2_271 = arith.constant 2 : index
    %270 = vector.load %arg4[%c1_269, %c0_270, %c2_271] : memref<2x16x512xf32, #tpu.memory_space<vmem>>, vector<1x16x384xf32>
    %271 = vector.shape_cast %270 : vector<1x16x384xf32> to vector<16x384xf32>
    %272 = arith.truncf %271 : vector<16x384xf32> to vector<16x384xbf16>
    %c32_272 = arith.constant 32 : index
    %c384_273 = arith.constant 384 : index
    %273 = vector.load %arg5[%c32_272, %c384_273] : memref<400x768xbf16, #tpu.memory_space<vmem>>, vector<16x384xbf16>
    tpu.vector_store %arg5[%c32_272, %c384_273], %272 {strides = array<i32>} : memref<400x768xbf16, #tpu.memory_space<vmem>>, vector<16x384xbf16>,
    %c1_274 = arith.constant 1 : index
    %c0_275 = arith.constant 0 : index
    %c3_276 = arith.constant 3 : index
    %274 = vector.load %arg4[%c1_274, %c0_275, %c3_276] : memref<2x16x512xf32, #tpu.memory_space<vmem>>, vector<1x16x384xf32>
    %275 = vector.shape_cast %274 : vector<1x16x384xf32> to vector<16x384xf32>
    %276 = arith.truncf %275 : vector<16x384xf32> to vector<16x384xbf16>
    %c48_277 = arith.constant 48 : index
    %c384_278 = arith.constant 384 : index
    %277 = vector.load %arg5[%c48_277, %c384_278] : memref<400x768xbf16, #tpu.memory_space<vmem>>, vector<16x384xbf16>
    tpu.vector_store %arg5[%c48_277, %c384_278], %276 {strides = array<i32>} : memref<400x768xbf16, #tpu.memory_space<vmem>>, vector<16x384xbf16>,
    %c1_279 = arith.constant 1 : index
    %c0_280 = arith.constant 0 : index
    %c4_281 = arith.constant 4 : index
    %278 = vector.load %arg4[%c1_279, %c0_280, %c4_281] : memref<2x16x512xf32, #tpu.memory_space<vmem>>, vector<1x16x384xf32>
    %279 = vector.shape_cast %278 : vector<1x16x384xf32> to vector<16x384xf32>
    %280 = arith.truncf %279 : vector<16x384xf32> to vector<16x384xbf16>
    %c64_282 = arith.constant 64 : index
    %c384_283 = arith.constant 384 : index
    %281 = vector.load %arg5[%c64_282, %c384_283] : memref<400x768xbf16, #tpu.memory_space<vmem>>, vector<16x384xbf16>
    tpu.vector_store %arg5[%c64_282, %c384_283], %280 {strides = array<i32>} : memref<400x768xbf16, #tpu.memory_space<vmem>>, vector<16x384xbf16>,
    %c1_284 = arith.constant 1 : index
    %c0_285 = arith.constant 0 : index
    %c18_286 = arith.constant 18 : index
    %282 = vector.load %arg4[%c1_284, %c0_285, %c18_286] : memref<2x16x512xf32, #tpu.memory_space<vmem>>, vector<1x16x384xf32>
    %283 = vector.shape_cast %282 : vector<1x16x384xf32> to vector<16x384xf32>
    %284 = arith.truncf %283 : vector<16x384xf32> to vector<16x384xbf16>
    %c80_287 = arith.constant 80 : index
    %c384_288 = arith.constant 384 : index
    %285 = vector.load %arg5[%c80_287, %c384_288] : memref<400x768xbf16, #tpu.memory_space<vmem>>, vector<16x384xbf16>
    tpu.vector_store %arg5[%c80_287, %c384_288], %284 {strides = array<i32>} : memref<400x768xbf16, #tpu.memory_space<vmem>>, vector<16x384xbf16>,
    %c1_289 = arith.constant 1 : index
    %c0_290 = arith.constant 0 : index
    %c19_291 = arith.constant 19 : index
    %286 = vector.load %arg4[%c1_289, %c0_290, %c19_291] : memref<2x16x512xf32, #tpu.memory_space<vmem>>, vector<1x16x384xf32>
    %287 = vector.shape_cast %286 : vector<1x16x384xf32> to vector<16x384xf32>
    %288 = arith.truncf %287 : vector<16x384xf32> to vector<16x384xbf16>
    %c96_292 = arith.constant 96 : index
    %c384_293 = arith.constant 384 : index
    %289 = vector.load %arg5[%c96_292, %c384_293] : memref<400x768xbf16, #tpu.memory_space<vmem>>, vector<16x384xbf16>
    tpu.vector_store %arg5[%c96_292, %c384_293], %288 {strides = array<i32>} : memref<400x768xbf16, #tpu.memory_space<vmem>>, vector<16x384xbf16>,
    %c1_294 = arith.constant 1 : index
    %c0_295 = arith.constant 0 : index
    %c20_296 = arith.constant 20 : index
    %290 = vector.load %arg4[%c1_294, %c0_295, %c20_296] : memref<2x16x512xf32, #tpu.memory_space<vmem>>, vector<1x16x384xf32>
    %291 = vector.shape_cast %290 : vector<1x16x384xf32> to vector<16x384xf32>
    %292 = arith.truncf %291 : vector<16x384xf32> to vector<16x384xbf16>
    %c112_297 = arith.constant 112 : index
    %c384_298 = arith.constant 384 : index
    %293 = vector.load %arg5[%c112_297, %c384_298] : memref<400x768xbf16, #tpu.memory_space<vmem>>, vector<16x384xbf16>
    tpu.vector_store %arg5[%c112_297, %c384_298], %292 {strides = array<i32>} : memref<400x768xbf16, #tpu.memory_space<vmem>>, vector<16x384xbf16>,
    %c1_299 = arith.constant 1 : index
    %c0_300 = arith.constant 0 : index
    %c21_301 = arith.constant 21 : index
    %294 = vector.load %arg4[%c1_299, %c0_300, %c21_301] : memref<2x16x512xf32, #tpu.memory_space<vmem>>, vector<1x16x384xf32>
    %295 = vector.shape_cast %294 : vector<1x16x384xf32> to vector<16x384xf32>
    %296 = arith.truncf %295 : vector<16x384xf32> to vector<16x384xbf16>
    %c128_302 = arith.constant 128 : index
    %c384_303 = arith.constant 384 : index
    %297 = vector.load %arg5[%c128_302, %c384_303] : memref<400x768xbf16, #tpu.memory_space<vmem>>, vector<16x384xbf16>
    tpu.vector_store %arg5[%c128_302, %c384_303], %296 {strides = array<i32>} : memref<400x768xbf16, #tpu.memory_space<vmem>>, vector<16x384xbf16>,
    %c1_304 = arith.constant 1 : index
    %c0_305 = arith.constant 0 : index
    %c22_306 = arith.constant 22 : index
    %298 = vector.load %arg4[%c1_304, %c0_305, %c22_306] : memref<2x16x512xf32, #tpu.memory_space<vmem>>, vector<1x16x384xf32>
    %299 = vector.shape_cast %298 : vector<1x16x384xf32> to vector<16x384xf32>
    %300 = arith.truncf %299 : vector<16x384xf32> to vector<16x384xbf16>
    %c144_307 = arith.constant 144 : index
    %c384_308 = arith.constant 384 : index
    %301 = vector.load %arg5[%c144_307, %c384_308] : memref<400x768xbf16, #tpu.memory_space<vmem>>, vector<16x384xbf16>
    tpu.vector_store %arg5[%c144_307, %c384_308], %300 {strides = array<i32>} : memref<400x768xbf16, #tpu.memory_space<vmem>>, vector<16x384xbf16>,
    %c1_309 = arith.constant 1 : index
    %c0_310 = arith.constant 0 : index
    %c36_311 = arith.constant 36 : index
    %302 = vector.load %arg4[%c1_309, %c0_310, %c36_311] : memref<2x16x512xf32, #tpu.memory_space<vmem>>, vector<1x16x384xf32>
    %303 = vector.shape_cast %302 : vector<1x16x384xf32> to vector<16x384xf32>
    %304 = arith.truncf %303 : vector<16x384xf32> to vector<16x384xbf16>
    %c160_312 = arith.constant 160 : index
    %c384_313 = arith.constant 384 : index
    %305 = vector.load %arg5[%c160_312, %c384_313] : memref<400x768xbf16, #tpu.memory_space<vmem>>, vector<16x384xbf16>
    tpu.vector_store %arg5[%c160_312, %c384_313], %304 {strides = array<i32>} : memref<400x768xbf16, #tpu.memory_space<vmem>>, vector<16x384xbf16>,
    %c1_314 = arith.constant 1 : index
    %c0_315 = arith.constant 0 : index
    %c37_316 = arith.constant 37 : index
    %306 = vector.load %arg4[%c1_314, %c0_315, %c37_316] : memref<2x16x512xf32, #tpu.memory_space<vmem>>, vector<1x16x384xf32>
    %307 = vector.shape_cast %306 : vector<1x16x384xf32> to vector<16x384xf32>
    %308 = arith.truncf %307 : vector<16x384xf32> to vector<16x384xbf16>
    %c176_317 = arith.constant 176 : index
    %c384_318 = arith.constant 384 : index
    %309 = vector.load %arg5[%c176_317, %c384_318] : memref<400x768xbf16, #tpu.memory_space<vmem>>, vector<16x384xbf16>
    tpu.vector_store %arg5[%c176_317, %c384_318], %308 {strides = array<i32>} : memref<400x768xbf16, #tpu.memory_space<vmem>>, vector<16x384xbf16>,
    %c1_319 = arith.constant 1 : index
    %c0_320 = arith.constant 0 : index
    %c38_321 = arith.constant 38 : index
    %310 = vector.load %arg4[%c1_319, %c0_320, %c38_321] : memref<2x16x512xf32, #tpu.memory_space<vmem>>, vector<1x16x384xf32>
    %311 = vector.shape_cast %310 : vector<1x16x384xf32> to vector<16x384xf32>
    %312 = arith.truncf %311 : vector<16x384xf32> to vector<16x384xbf16>
    %c192_322 = arith.constant 192 : index
    %c384_323 = arith.constant 384 : index
    %313 = vector.load %arg5[%c192_322, %c384_323] : memref<400x768xbf16, #tpu.memory_space<vmem>>, vector<16x384xbf16>
    tpu.vector_store %arg5[%c192_322, %c384_323], %312 {strides = array<i32>} : memref<400x768xbf16, #tpu.memory_space<vmem>>, vector<16x384xbf16>,
    %c1_324 = arith.constant 1 : index
    %c0_325 = arith.constant 0 : index
    %c39_326 = arith.constant 39 : index
    %314 = vector.load %arg4[%c1_324, %c0_325, %c39_326] : memref<2x16x512xf32, #tpu.memory_space<vmem>>, vector<1x16x384xf32>
    %315 = vector.shape_cast %314 : vector<1x16x384xf32> to vector<16x384xf32>
    %316 = arith.truncf %315 : vector<16x384xf32> to vector<16x384xbf16>
    %c208_327 = arith.constant 208 : index
    %c384_328 = arith.constant 384 : index
    %317 = vector.load %arg5[%c208_327, %c384_328] : memref<400x768xbf16, #tpu.memory_space<vmem>>, vector<16x384xbf16>
    tpu.vector_store %arg5[%c208_327, %c384_328], %316 {strides = array<i32>} : memref<400x768xbf16, #tpu.memory_space<vmem>>, vector<16x384xbf16>,
    %c1_329 = arith.constant 1 : index
    %c0_330 = arith.constant 0 : index
    %c40_331 = arith.constant 40 : index
    %318 = vector.load %arg4[%c1_329, %c0_330, %c40_331] : memref<2x16x512xf32, #tpu.memory_space<vmem>>, vector<1x16x384xf32>
    %319 = vector.shape_cast %318 : vector<1x16x384xf32> to vector<16x384xf32>
    %320 = arith.truncf %319 : vector<16x384xf32> to vector<16x384xbf16>
    %c224_332 = arith.constant 224 : index
    %c384_333 = arith.constant 384 : index
    %321 = vector.load %arg5[%c224_332, %c384_333] : memref<400x768xbf16, #tpu.memory_space<vmem>>, vector<16x384xbf16>
    tpu.vector_store %arg5[%c224_332, %c384_333], %320 {strides = array<i32>} : memref<400x768xbf16, #tpu.memory_space<vmem>>, vector<16x384xbf16>,
    %c1_334 = arith.constant 1 : index
    %c0_335 = arith.constant 0 : index
    %c54_336 = arith.constant 54 : index
    %322 = vector.load %arg4[%c1_334, %c0_335, %c54_336] : memref<2x16x512xf32, #tpu.memory_space<vmem>>, vector<1x16x384xf32>
    %323 = vector.shape_cast %322 : vector<1x16x384xf32> to vector<16x384xf32>
    %324 = arith.truncf %323 : vector<16x384xf32> to vector<16x384xbf16>
    %c240_337 = arith.constant 240 : index
    %c384_338 = arith.constant 384 : index
    %325 = vector.load %arg5[%c240_337, %c384_338] : memref<400x768xbf16, #tpu.memory_space<vmem>>, vector<16x384xbf16>
    tpu.vector_store %arg5[%c240_337, %c384_338], %324 {strides = array<i32>} : memref<400x768xbf16, #tpu.memory_space<vmem>>, vector<16x384xbf16>,
    %c1_339 = arith.constant 1 : index
    %c0_340 = arith.constant 0 : index
    %c55_341 = arith.constant 55 : index
    %326 = vector.load %arg4[%c1_339, %c0_340, %c55_341] : memref<2x16x512xf32, #tpu.memory_space<vmem>>, vector<1x16x384xf32>
    %327 = vector.shape_cast %326 : vector<1x16x384xf32> to vector<16x384xf32>
    %328 = arith.truncf %327 : vector<16x384xf32> to vector<16x384xbf16>
    %c256_342 = arith.constant 256 : index
    %c384_343 = arith.constant 384 : index
    %329 = vector.load %arg5[%c256_342, %c384_343] : memref<400x768xbf16, #tpu.memory_space<vmem>>, vector<16x384xbf16>
    tpu.vector_store %arg5[%c256_342, %c384_343], %328 {strides = array<i32>} : memref<400x768xbf16, #tpu.memory_space<vmem>>, vector<16x384xbf16>,
    %c1_344 = arith.constant 1 : index
    %c0_345 = arith.constant 0 : index
    %c56_346 = arith.constant 56 : index
    %330 = vector.load %arg4[%c1_344, %c0_345, %c56_346] : memref<2x16x512xf32, #tpu.memory_space<vmem>>, vector<1x16x384xf32>
    %331 = vector.shape_cast %330 : vector<1x16x384xf32> to vector<16x384xf32>
    %332 = arith.truncf %331 : vector<16x384xf32> to vector<16x384xbf16>
    %c272_347 = arith.constant 272 : index
    %c384_348 = arith.constant 384 : index
    %333 = vector.load %arg5[%c272_347, %c384_348] : memref<400x768xbf16, #tpu.memory_space<vmem>>, vector<16x384xbf16>
    tpu.vector_store %arg5[%c272_347, %c384_348], %332 {strides = array<i32>} : memref<400x768xbf16, #tpu.memory_space<vmem>>, vector<16x384xbf16>,
    %c1_349 = arith.constant 1 : index
    %c0_350 = arith.constant 0 : index
    %c57_351 = arith.constant 57 : index
    %334 = vector.load %arg4[%c1_349, %c0_350, %c57_351] : memref<2x16x512xf32, #tpu.memory_space<vmem>>, vector<1x16x384xf32>
    %335 = vector.shape_cast %334 : vector<1x16x384xf32> to vector<16x384xf32>
    %336 = arith.truncf %335 : vector<16x384xf32> to vector<16x384xbf16>
    %c288_352 = arith.constant 288 : index
    %c384_353 = arith.constant 384 : index
    %337 = vector.load %arg5[%c288_352, %c384_353] : memref<400x768xbf16, #tpu.memory_space<vmem>>, vector<16x384xbf16>
    tpu.vector_store %arg5[%c288_352, %c384_353], %336 {strides = array<i32>} : memref<400x768xbf16, #tpu.memory_space<vmem>>, vector<16x384xbf16>,
    %c1_354 = arith.constant 1 : index
    %c0_355 = arith.constant 0 : index
    %c58_356 = arith.constant 58 : index
    %338 = vector.load %arg4[%c1_354, %c0_355, %c58_356] : memref<2x16x512xf32, #tpu.memory_space<vmem>>, vector<1x16x384xf32>
    %339 = vector.shape_cast %338 : vector<1x16x384xf32> to vector<16x384xf32>
    %340 = arith.truncf %339 : vector<16x384xf32> to vector<16x384xbf16>
    %c304_357 = arith.constant 304 : index
    %c384_358 = arith.constant 384 : index
    %341 = vector.load %arg5[%c304_357, %c384_358] : memref<400x768xbf16, #tpu.memory_space<vmem>>, vector<16x384xbf16>
    tpu.vector_store %arg5[%c304_357, %c384_358], %340 {strides = array<i32>} : memref<400x768xbf16, #tpu.memory_space<vmem>>, vector<16x384xbf16>,
    %c1_359 = arith.constant 1 : index
    %c0_360 = arith.constant 0 : index
    %c72_361 = arith.constant 72 : index
    %342 = vector.load %arg4[%c1_359, %c0_360, %c72_361] : memref<2x16x512xf32, #tpu.memory_space<vmem>>, vector<1x16x384xf32>
    %343 = vector.shape_cast %342 : vector<1x16x384xf32> to vector<16x384xf32>
    %344 = arith.truncf %343 : vector<16x384xf32> to vector<16x384xbf16>
    %c320_362 = arith.constant 320 : index
    %c384_363 = arith.constant 384 : index
    %345 = vector.load %arg5[%c320_362, %c384_363] : memref<400x768xbf16, #tpu.memory_space<vmem>>, vector<16x384xbf16>
    tpu.vector_store %arg5[%c320_362, %c384_363], %344 {strides = array<i32>} : memref<400x768xbf16, #tpu.memory_space<vmem>>, vector<16x384xbf16>,
    %c1_364 = arith.constant 1 : index
    %c0_365 = arith.constant 0 : index
    %c73_366 = arith.constant 73 : index
    %346 = vector.load %arg4[%c1_364, %c0_365, %c73_366] : memref<2x16x512xf32, #tpu.memory_space<vmem>>, vector<1x16x384xf32>
    %347 = vector.shape_cast %346 : vector<1x16x384xf32> to vector<16x384xf32>
    %348 = arith.truncf %347 : vector<16x384xf32> to vector<16x384xbf16>
    %c336_367 = arith.constant 336 : index
    %c384_368 = arith.constant 384 : index
    %349 = vector.load %arg5[%c336_367, %c384_368] : memref<400x768xbf16, #tpu.memory_space<vmem>>, vector<16x384xbf16>
    tpu.vector_store %arg5[%c336_367, %c384_368], %348 {strides = array<i32>} : memref<400x768xbf16, #tpu.memory_space<vmem>>, vector<16x384xbf16>,
    %c1_369 = arith.constant 1 : index
    %c0_370 = arith.constant 0 : index
    %c74_371 = arith.constant 74 : index
    %350 = vector.load %arg4[%c1_369, %c0_370, %c74_371] : memref<2x16x512xf32, #tpu.memory_space<vmem>>, vector<1x16x384xf32>
    %351 = vector.shape_cast %350 : vector<1x16x384xf32> to vector<16x384xf32>
    %352 = arith.truncf %351 : vector<16x384xf32> to vector<16x384xbf16>
    %c352_372 = arith.constant 352 : index
    %c384_373 = arith.constant 384 : index
    %353 = vector.load %arg5[%c352_372, %c384_373] : memref<400x768xbf16, #tpu.memory_space<vmem>>, vector<16x384xbf16>
    tpu.vector_store %arg5[%c352_372, %c384_373], %352 {strides = array<i32>} : memref<400x768xbf16, #tpu.memory_space<vmem>>, vector<16x384xbf16>,
    %c1_374 = arith.constant 1 : index
    %c0_375 = arith.constant 0 : index
    %c75_376 = arith.constant 75 : index
    %354 = vector.load %arg4[%c1_374, %c0_375, %c75_376] : memref<2x16x512xf32, #tpu.memory_space<vmem>>, vector<1x16x384xf32>
    %355 = vector.shape_cast %354 : vector<1x16x384xf32> to vector<16x384xf32>
    %356 = arith.truncf %355 : vector<16x384xf32> to vector<16x384xbf16>
    %c368_377 = arith.constant 368 : index
    %c384_378 = arith.constant 384 : index
    %357 = vector.load %arg5[%c368_377, %c384_378] : memref<400x768xbf16, #tpu.memory_space<vmem>>, vector<16x384xbf16>
    tpu.vector_store %arg5[%c368_377, %c384_378], %356 {strides = array<i32>} : memref<400x768xbf16, #tpu.memory_space<vmem>>, vector<16x384xbf16>,
    %c1_379 = arith.constant 1 : index
    %c0_380 = arith.constant 0 : index
    %c76_381 = arith.constant 76 : index
    %358 = vector.load %arg4[%c1_379, %c0_380, %c76_381] : memref<2x16x512xf32, #tpu.memory_space<vmem>>, vector<1x16x384xf32>
    %359 = vector.shape_cast %358 : vector<1x16x384xf32> to vector<16x384xf32>
    %360 = arith.truncf %359 : vector<16x384xf32> to vector<16x384xbf16>
    %c384_382 = arith.constant 384 : index
    %c384_383 = arith.constant 384 : index
    %361 = vector.load %arg5[%c384_382, %c384_383] : memref<400x768xbf16, #tpu.memory_space<vmem>>, vector<16x384xbf16>
    tpu.vector_store %arg5[%c384_382, %c384_383], %360 {strides = array<i32>} : memref<400x768xbf16, #tpu.memory_space<vmem>>, vector<16x384xbf16>,
    %c0_384 = arith.constant 0 : index
    %c0_385 = arith.constant 0 : index
    %362 = vector.load %arg2[%c0_384, %c0_385] : memref<8x400xbf16, #tpu.memory_space<vmem>>, vector<8x400xbf16>
    %c0_386 = arith.constant 0 : index
    %c0_387 = arith.constant 0 : index
    %363 = vector.load %arg5[%c0_386, %c0_387] : memref<400x768xbf16, #tpu.memory_space<vmem>>, vector<400x768xbf16>
    %cst_388 = arith.constant dense<0.000000e+00> : vector<8x768xf32>
    %364 = tpu.matmul %362, %363, %cst_388 {dimension_numbers = #tpu.dot_dimension_numbers<[1], [0], [0], [1], [0, 0, 1, 1], [], []>} : vector<8x400xbf16>, vector<400x768xbf16>, vector<8x768xf32> -> vector<8x768xf32>
    %cst_389 = arith.constant 0.000000e+00 : f32
    %365 = vector.broadcast %cst_389 : f32 to vector<8x768xf32>
    %366 = arith.cmpf oge, %364, %365 : vector<8x768xf32>
    %cst_390 = arith.constant 0.00999999977 : f32
    %367 = vector.broadcast %cst_390 : f32 to vector<8x768xf32>
    %368 = arith.mulf %367, %364 : vector<8x768xf32>
    %369 = arith.select %366, %364, %368 : vector<8x768xi1>, vector<8x768xf32>
    %370 = vector.extract_strided_slice %369 {offsets = [0, 0], sizes = [8, 384], strides = [1, 1]} : vector<8x768xf32> to vector<8x384xf32>
    %371 = vector.extract_strided_slice %370 {offsets = [0, 0], sizes = [8, 274], strides = [1, 1]} : vector<8x384xf32> to vector<8x274xf32>
    %372 = vector.extract_strided_slice %370 {offsets = [0, 1], sizes = [8, 274], strides = [1, 1]} : vector<8x384xf32> to vector<8x274xf32>
    %373 = arith.maximumf %371, %372 : vector<8x274xf32>
    %374 = vector.extract_strided_slice %373 {offsets = [0, 0], sizes = [8, 256], strides = [1, 1]} : vector<8x274xf32> to vector<8x256xf32>
    %375 = vector.extract_strided_slice %373 {offsets = [0, 18], sizes = [8, 256], strides = [1, 1]} : vector<8x274xf32> to vector<8x256xf32>
    %376 = arith.maximumf %374, %375 : vector<8x256xf32>
    %c0_391 = arith.constant 0 : index
    %c0_392 = arith.constant 0 : index
    %c0_393 = arith.constant 0 : index
    %377 = vector.load %arg3[%c0_391, %c0_392, %c0_393] : memref<2x8x256xf32, #tpu.memory_space<vmem>>, vector<1x8x256xf32>
    %378 = vector.shape_cast %377 : vector<1x8x256xf32> to vector<8x256xf32>
    %379 = vector.shape_cast %376 : vector<8x256xf32> to vector<1x8x256xf32>
    tpu.vector_store %arg3[%c0_391, %c0_392, %c0_393], %379 {strides = array<i32>} : memref<2x8x256xf32, #tpu.memory_space<vmem>>, vector<1x8x256xf32>,
    %380 = vector.extract_strided_slice %369 {offsets = [0, 384], sizes = [8, 384], strides = [1, 1]} : vector<8x768xf32> to vector<8x384xf32>
    %381 = vector.extract_strided_slice %380 {offsets = [0, 0], sizes = [8, 274], strides = [1, 1]} : vector<8x384xf32> to vector<8x274xf32>
    %382 = vector.extract_strided_slice %380 {offsets = [0, 1], sizes = [8, 274], strides = [1, 1]} : vector<8x384xf32> to vector<8x274xf32>
    %383 = arith.maximumf %381, %382 : vector<8x274xf32>
    %384 = vector.extract_strided_slice %383 {offsets = [0, 0], sizes = [8, 256], strides = [1, 1]} : vector<8x274xf32> to vector<8x256xf32>
    %385 = vector.extract_strided_slice %383 {offsets = [0, 18], sizes = [8, 256], strides = [1, 1]} : vector<8x274xf32> to vector<8x256xf32>
    %386 = arith.maximumf %384, %385 : vector<8x256xf32>
    %c1_394 = arith.constant 1 : index
    %c0_395 = arith.constant 0 : index
    %c0_396 = arith.constant 0 : index
    %387 = vector.load %arg3[%c1_394, %c0_395, %c0_396] : memref<2x8x256xf32, #tpu.memory_space<vmem>>, vector<1x8x256xf32>
    %388 = vector.shape_cast %387 : vector<1x8x256xf32> to vector<8x256xf32>
    %389 = vector.shape_cast %386 : vector<8x256xf32> to vector<1x8x256xf32>
    tpu.vector_store %arg3[%c1_394, %c0_395, %c0_396], %389 {strides = array<i32>} : memref<2x8x256xf32, #tpu.memory_space<vmem>>, vector<1x8x256xf32>,
    return
  }
  func.func @transform_0(%arg0: i32) -> (i32, i32, i32) {
    %c0_i32 = arith.constant 0 : i32
    %c0_i32_0 = arith.constant 0 : i32
    %c0_i32_1 = arith.constant 0 : i32
    return %arg0, %c0_i32, %c0_i32_0 : i32, i32, i32
  }
  func.func @transform_1(%arg0: i32) -> (i32, i32) {
    %c0_i32 = arith.constant 0 : i32
    %c0_i32_0 = arith.constant 0 : i32
    %c0_i32_1 = arith.constant 0 : i32
    return %c0_i32, %c0_i32_0 : i32, i32
  }
  func.func @transform_2(%arg0: i32) -> (i32, i32, i32) {
    %c0_i32 = arith.constant 0 : i32
    %c0_i32_0 = arith.constant 0 : i32
    %c0_i32_1 = arith.constant 0 : i32
    return %arg0, %c0_i32, %c0_i32_0 : i32, i32, i32
  }
}

</mosaic_0001>

<bundles_post_ra>
// kernel: tpu_custom_call.1
= control target key start
LH: loop header
LB: loop body
LE: loop exit
PB: predicated region body
PF: predicated region fallthrough
CT: control target
= control target key end

     0   :  { %7 = vsyncpa [#allocation5], 0  ;;  %s6590_s0 = inlined_call_operand.hbm [shape: f32[4,4,256], index: 0, kind: input, shape index: {}]   ;;  %s6591_s1 = inlined_call_operand.hbm [shape: bf16[8,400], index: 1, kind: input, shape index: {}]   ;;  %s6592_s2 = inlined_call_operand.hbm [shape: f32[4,8,256], index: 2, kind: output, shape index: {}]  }
   0x1   :  { %9 = vsyncpa [#allocation5 + $0x1], 0 }
   0x2   :  { %10 = vsyncpa [#allocation8], 0 }
   0x3   :  { %11 = vsyncpa [#allocation6], 0 }
   0x4   :  { %13 = vsyncpa [#allocation6 + $0x1], 0  ;;  %s5484_s9 = smov 0   ;;  %s5486_s10 = smov 0  }
   0x5   :  { %s5488_s11 = smov 0   ;;  %s5490_s12 = smov 0  }
   0x6 LB: > { %s5505_s13 = sadd.s32 4294967295, %s5418_s12   ;;  %s4440_s14 = sadd.s32 4294967294, %s5418_s12   ;;  %s5418_s12 = sphi %s5490_s12, %s6691_s12   ;;  %s5414_s11 = sphi %s5488_s11, %s6690_s11   ;;  %s5410_s10 = sphi %s5486_s10, %s6689_s10   ;;  %s5406_s9 = sphi %s5484_s9, %s6688_s9  }
   0x7   : > { %s5509_s15 = sadd.s32 1, %s5418_s12   ;;  %s26_s16 = sadd.s32 1, %s5414_s11 }
   0x8   : > { %s23_s17 = ssub.s32 %s5418_s12, %s5509_s15  ;;  %p33_p0 = scmp.ne.s32.totalorder %s5414_s11, %s5410_s10 }
   0x9   : > { %p24_p1 = scmp.eq.s32.totalorder %s23_s17, 0  ;;  %p34_p2 = scmp.eq.s32.totalorder %s5418_s12, 0 }
   0xa   : > { %p39_p3 = scmp.ne.s32.totalorder %s5410_s10, %s5406_s9  ;;  %p6593_p4 = scmp.eq.s32.totalorder %s5505_s13, 0 }
   0xb   : > { %s5521_s18 = scalar_select %p24_p1, %s5414_s11, %s26_s16  }
   0xc   : > { %p5523_p5 = por %p34_p2, %p33_p0  ;;  %p5529_p6 = por %p6593_p4, %p39_p3 }
   0xd   : > { %p84_p7 = scmp.eq.s32.totalorder %s5505_s13, 1  ;;  %p90_p8 = scmp.eq.s32.totalorder %s4440_s14, 1 }
   0xe   : > { %s6622_s20 = scalar_select %p5529_p6, 1, 0 }
   0xf   : > { %p4441_p9 = scmp.ge.s32.totalorder %s5418_s12, 1  ;;  %p97_p10 = scmp.lt.s32.totalorder %s5418_s12, 3 }
  0x10   : > { %p5536_p11 = por %p84_p7, %p33_p0  ;;  %p5540_p12 = por %p90_p8, %p39_p3 }
  0x11   : > { %p5544_p13 = pnand %p4441_p9, %p97_p10  ;;  %s5420_s24 = smov [#allocation7]  }
  0x12   : > { %s6623_s21 = scalar_select %p5536_p11, 1, 0 }
  0x13   : > { %s6624_s22 = scalar_select %p5540_p12, 1, 0 }
  0x14   : > { %s6625_s23 = scalar_select %p5544_p13, 1, 0 }
  0x15   : > { %p5045_p2 = pneg %p5544_p13  ;;  %s110_s25 = sshll.u32 %s5420_s24, 4  ;;  %s111_s25 = int_to_ptr.vmem [resolvable:$true] %s110_s25 }
  0x16   : > { %p5058_p4 = scmp.lt.s32.totalorder %s5418_s12, 2  ;;  %p6626_p0 = scmp.eq.s32.totalorder %s5505_s13, 0 }
  0x17   : > { %s121_s27 = sand.u32 1, %s5414_s11   ;;  %s5307_s30 = scalar_lea.vmem %s111_s25, 256 }
  0x18   : > { %p5554_p7 = pnand %p5045_p2, %p6626_p0  ;;  %p5561_p3 = pnand %p5058_p4, %p5523_p5 }
  0x19   : > { %s4444_s29 = sshll.u32 %s121_s27, 4  ;;  %p5308_p9 = scmp.ne.s32.totalorder %s111_s25, %s5307_s30 }
  0x1a   : > { %p5298_p8 = pneg %p5554_p7  ;;  %p5315_p12 = scmp.lt.s32.totalorder %s111_s25, %s111_s25 }
  0x1b   : > { %p5316_p11 = scmp.lt.s32.totalorder %s5307_s30, %s5307_s30 }
  0x1c   : > { %p5310_p10 = pnand %p5308_p9, %p5298_p8 }
  0x1d   : > { %p5317_p2 = por %p5316_p11, %p5315_p12 }
  0x1e   : > { %p5311_p1 = pneg %p5310_p10 }
  0x20   : > { %p5318_p0 = pnand %p5317_p2, %p5311_p1 }
  0x22   : > { %5321 = shalt.err (!%p5318_p0)
}
  0x23   : > { %5048 = dma.hbm_to_vmem [thread:$0]  (!%p5554_p7), %s6591_s1, 256, %s111_s25, [#allocation8]  }
  0x24   : > { %s4834_s5 = sshll.u32 %s5418_s12, 8  ;;  %s125_s6 = scalar_lea.vmem [#allocation4], %s4444_s29 }
  0x25   : > { %s133_s7 = sshll.u32 %s125_s6, 4  ;;  %s5576_s16 = scalar_lea.hbm %s6590_s0, %s4834_s5  ;;  %s5578_s7 = int_to_ptr.vmem [resolvable:$true] %s133_s7 }
  0x26   : > { %s5580_s17 = scalar_lea.sflag [#allocation5], %s121_s27  ;;  %s5322_s19 = scalar_lea.hbm %s5576_s16, 256 }
  0x27   : > { %p5323_p4 = scmp.ne.s32.totalorder %s5576_s16, %s5322_s19  ;;  %p5324_p5 = pneg %p5561_p3 }
  0x28   : > { %s5327_s26 = scalar_lea.hbm %s6590_s0, 512  ;;  %p5328_p1 = scmp.lt.s32.totalorder %s5576_s16, %s6590_s0 }
  0x29   : > { %p5325_p11 = pnand %p5324_p5, %p5323_p4  ;;  %p5329_p7 = scmp.lt.s32.totalorder %s5327_s26, %s5322_s19 }
  0x2b   : > { %p5326_p12 = pneg %p5325_p11  ;;  %p5330_p8 = por %p5329_p7, %p5328_p1 }
  0x2d   : > { %p5331_p9 = pnand %p5330_p8, %p5326_p12 }
  0x2f   : > { %5334 = shalt.err (!%p5331_p9)
}
  0x30   : > { %s5335_s27 = scalar_lea.vmem %s5578_s7, 256  ;;  %s5421_s3 = smov [#allocation4]  }
  0x31   : > { %p5336_p10 = scmp.ne.s32.totalorder %s5578_s7, %s5335_s27  ;;  %s5340_s4 = sshll.u32 %s5421_s3, 4  ;;  %s5341_s4 = int_to_ptr.vmem [resolvable:$false] %s5340_s4 }
  0x32   : > { %s5342_s5 = scalar_lea.vmem %s5341_s4, 512  ;;  %p5343_p4 = scmp.lt.s32.totalorder %s5578_s7, %s5341_s4 }
  0x33   : > { %p5338_p2 = pnand %p5336_p10, %p5324_p5  ;;  %p5344_p11 = scmp.lt.s32.totalorder %s5342_s5, %s5335_s27 }
  0x35   : > { %p5339_p0 = pneg %p5338_p2  ;;  %p5345_p6 = por %p5344_p11, %p5343_p4 }
  0x37   : > { %p5346_p13 = pnand %p5345_p6, %p5339_p0 }
  0x39   : > { %5349 = shalt.err (!%p5346_p13)
}
  0x3a   : > { %s5422_s6 = smov 128   ;;  %s5423_s8 = smov 8  }
  0x3b   : > { %5052 = dma.hbm_to_vmem [thread:$0]  (!%p5561_p3), %s5576_s16, 256, %s5578_s7, %s5580_s17, %s5422_s6, %s5422_s6, %s5423_s8  }
  0x3c   : > { %p6629_p5 = scmp.ne.s32.totalorder %s6625_s23, 0 }
  0x3d   : > { %s5604_s14 = sand.u32 (!%p6629_p5), 1, %s5410_s10   ;;  %p6630_p6 = scmp.ne.s32.totalorder (!%p6629_p5), %s6622_s20, 0 }
  0x3e   : > { %145 = sbr.rel (%p6629_p5) target bundleno = 1190 (0x4a6), region = 28  ;;  %s4449_s19 = sshll.u32 (!%p6629_p5), %s5604_s14, 4 }
  0x3f   : > { %s148_s24 = scalar_lea.sflag (!%p6629_p5), [#allocation5], %s5604_s14  ;;  %s5608_s25 = scalar_lea.vmem (!%p6629_p5), [#allocation4], %s4449_s19 }
  0x43   : > { %5393 = dma.done.wait (%p6630_p6), %s148_s24, 256  }
  0x44   : > { %5395 = vsyncadd (%p6630_p6), %s148_s24, 4294967040  ;;  %p6631_p13 = scmp.eq.s32.totalorder %s5505_s13, 0 }
  0x46   : > { %5397 = dma.done.wait (%p6631_p13), [#allocation8], 256   ;;  %p6632_p3 = pmov %p6631_p13 }
  0x47   : > { %v5424_v0 = vmov 0.0   ;;  %v246_v1 = vld [vmem:[%s5608_s25] sm:$0xf]  ;;  %s5425_s20 = smov 33   ;;  %s5426_s23 = smov 31   ;;  %v5437_v15 = vmov 0.0|0.0  }
  0x48   : > { %5399 = vsyncadd (%p6632_p3), [#allocation8], 4294967040  ;;  %183 = vst [vmem:[#allocation2 + $0x20] sm:$0xff] %v5424_v0  ;;  %v237_v2 = vld [vmem:[%s5608_s25] sm:$0xf]  ;;  %248 = vrot.lane.b32.xlu1 %v246_v1, %s5425_s20  ;;  %s5427_s28 = smov 21  }
  0x49   : > { %179 = vst [vmem:[#allocation2] sm:$0xff] %v5424_v0  ;;  %180 = vst [vmem:[#allocation2 + $0x8] sm:$0xff] %v5424_v0  ;;  %239 = vrot.lane.b32.xlu0 %v237_v2, %s5426_s23  ;;  %v202_v3 = vld [vmem:[%s5608_s25] sm:$0xf]  ;;  %s5428_s7 = smov 19   ;;  %s5429_s16 = smov 23  }
  0x4a   : > { %181 = vst [vmem:[#allocation2 + $0x10] sm:$0xff] %v5424_v0  ;;  %187 = vst [vmem:[#allocation2 + $0x40] sm:$0xff] %v5424_v0  ;;  %v195_v4 = vld [vmem:[%s5608_s25] sm:$0xf]  ;;  %v253_v6 = vld [vmem:[%s5608_s25 + $0x4] sm:$0xf] }
  0x4b   : > { %188 = vst [vmem:[#allocation2 + $0x48] sm:$0xff] %v5424_v0  ;;  %189 = vst [vmem:[#allocation2 + $0x50] sm:$0xff] %v5424_v0  ;;  %v209_v5 = vld [vmem:[%s5608_s25] sm:$0xf]  ;;  %s5430_s17 = smov 35   ;;  %s5431_s26 = smov 25  }
  0x4c   : > { %204 = vrot.lane.b32.xlu1 %v202_v3, %s5427_s28  ;;  %v216_v7 = vld [vmem:[%s5608_s25] sm:$0xf]  ;;  %v260_v8 = vld [vmem:[%s5608_s25 + $0x4] sm:$0xf]  ;;  %s5432_s29 = smov 37   ;;  %s5433_s30 = smov 27  }
  0x4d   : > { %197 = vrot.lane.b32.xlu0 %v195_v4, %s5428_s7  ;;  %v223_v9 = vld [vmem:[%s5608_s25] sm:$0xf]  ;;  %v267_v10 = vld [vmem:[%s5608_s25 + $0x4] sm:$0xf]  ;;  %s5434_s27 = smov 39   ;;  %s5435_s3 = smov 45  }
  0x4e   : > { %v288_v11 = vld [vmem:[%s5608_s25 + $0x4] sm:$0xf]  ;;  %s5436_s4 = smov 41   ;;  %v230_v14 = vld [vmem:[%s5608_s25] sm:$0xf]  ;;  %439 = vst [vmem:[#allocation3 + $0x18] sm:$0xff] %v5437_v15 }
  0x4f   : > { %v274_v12 = vld [vmem:[%s5608_s25 + $0x4] sm:$0xf]  ;;  %s5438_s5 = smov 43   ;;  %s5439_s6 = smov 29   ;;  %v4452_v18 = vld [vmem:[%s5608_s25 + $0x8] sm:$0xf] }
  0x50   : > { %211 = vrot.lane.b32.xlu1 %v209_v5, %s5429_s16  ;;  %v281_v13 = vld [vmem:[%s5608_s25 + $0x4] sm:$0xf]  ;;  %s5440_s8 = smov 49   ;;  %s5441_s19 = smov 47   ;;  %v4458_v19 = vld [vmem:[%s5608_s25 + $0x8] sm:$0xf] }
  0x51   : > { %255 = vrot.lane.b32.xlu0 %v253_v6, %s5430_s17  ;;  %v304_v16 = vld [vmem:[%s5608_s25 + $0x4] sm:$0xf]  ;;  %v4453_v20 = vld [vmem:[%s5608_s25 + $0x8] sm:$0xf]  ;;  %v4460_v23 = vld [vmem:[%s5608_s25 + $0xc] sm:$0xf] }
  0x52   : > { %v297_v17 = vld [vmem:[%s5608_s25 + $0x4] sm:$0xf]  ;;  %v4459_v21 = vld [vmem:[%s5608_s25 + $0x8] sm:$0xf]  ;;  %v4461_v25 = vld [vmem:[%s5608_s25 + $0xc] sm:$0xf] }
  0x53   : > { %v4454_v22 = vld [vmem:[%s5608_s25 + $0x8] sm:$0xf]  ;;  %v4462_v27 = vld [vmem:[%s5608_s25 + $0xc] sm:$0xf]  ;;  %440 = vst [vmem:[#allocation3 + $0x20] sm:$0xf] %v5437_v15 }
  0x54   : > { %218 = vrot.lane.b32.xlu1 %v216_v7, %s5431_s26  ;;  %v4455_v24 = vld [vmem:[%s5608_s25 + $0x8] sm:$0xf]  ;;  %v4465_v28 = vld [vmem:[%s5608_s25 + $0xc] sm:$0xf]  ;;  %1790 = vst [vmem:[#allocation3 + $0x24] sm:$0xff] %v5437_v15  ;;  %s5442_s24 = smov 108  }
  0x55   : > { %262 = vrot.lane.b32.xlu0 %v260_v8, %s5432_s29  ;;  %v4456_v26 = vld [vmem:[%s5608_s25 + $0x8] sm:$0xf]  ;;  %v4463_v29 = vld [vmem:[%s5608_s25 + $0xc] sm:$0xf]  ;;  %1791 = vst [vmem:[#allocation3 + $0x2c] sm:$0xf] %v5437_v15 }
  0x56   : > { %v4464_v30 = vld [vmem:[%s5608_s25 + $0xc] sm:$0xf]  ;;  %v4457_v31 = vld [vmem:[%s5608_s25 + $0x8] sm:$0xf]  ;;  %vm244_vm0 = vcmask 117760   ;;  %vm251_vm1 = vcmask 265352  }
  0x57   : > { %v4466_v32 = vld [vmem:[%s5608_s25 + $0xc] sm:$0xf]  ;;  %vm200_vm2 = vcmask 281752   ;;  %vm207_vm3 = vcmask 429352   ;;  %vm214_vm4 = vcmask 576952   ;;  %vm258_vm5 = vcmask 412952  }
  0x58   : > { %225 = vrot.lane.b32.xlu1 %v223_v9, %s5433_s30  ;;  %v4467_v33 = vld [vmem:[%s5608_s25 + $0xc] sm:$0xf]  ;;  %s5445_s25 = smov 124   ;;  %vm221_vm6 = vcmask 724552   ;;  %vm265_vm7 = vcmask 560552   ;;  %vm6598_vm8 = vcmask 872152  }
  0x59   : > { %269 = vrot.lane.b32.xlu0 %v267_v10, %s5434_s27  ;;  %vm6597_vm9 = vcmask 708152   ;;  %vm295_vm10 = vcmask 101376   ;;  %vm279_vm11 = vcmask 855752   ;;  %vm286_vm12 = vcmask 1003352   ;;  %p6685_p1 = scmp.ne.s32.totalorder %s6623_s21, 0 }
  0x5a   : > { %vm235_vm13 = vcmask 1019752   ;;  %vm293_vm14 = vcmask 1044456   ;;  %vm242_vm15 = vcmask 1044472  }
  0x5c   : > { %290 = vrot.lane.b32.xlu1 %v288_v11, %s5435_s3 }
  0x5d   : > { %276 = vrot.lane.b32.xlu0 %v274_v12, %s5436_s4 }
  0x60   : > { %283 = vrot.lane.b32.xlu1 %v281_v13, %s5438_s5 }
  0x61   : > { %232 = vrot.lane.b32.xlu0 %v230_v14, %s5439_s6 }
  0x64   : > { %306 = vrot.lane.b32.xlu1 %v304_v16, %s5440_s8 }
  0x65   : > { %299 = vrot.lane.b32.xlu0 %v297_v17, %s5441_s19 }
  0x68   : > { %314 = vrot.lane.b32.xlu1 %v4452_v18, %s5428_s7  ;;  %s5447_s7 = smov 126  }
  0x69   : > { %351 = vrot.lane.b32.xlu0 %v4458_v19, %s5426_s23  ;;  %s5444_s23 = smov 110  }
  0x6c   : > { %321 = vrot.lane.b32.xlu1 %v4453_v20, %s5427_s28  ;;  %s5446_s28 = smov 125  }
  0x6d   : > { %358 = vrot.lane.b32.xlu0 %v4459_v21, %s5425_s20  ;;  %s5443_s20 = smov 109  }
  0x70   : > { %327 = vrot.lane.b32.xlu1 %v4454_v22, %s5429_s16  ;;  %s5448_s16 = smov 127  }
  0x71   : > { %364 = vrot.lane.b32.xlu0 %v4460_v23, %s5430_s17  ;;  %s5449_s17 = smov 53  }
  0x74   : > { %333 = vrot.lane.b32.xlu1 %v4455_v24, %s5431_s26  ;;  %s5450_s26 = smov 74  }
  0x75   : > { %370 = vrot.lane.b32.xlu0 %v4461_v25, %s5432_s29  ;;  %s5451_s29 = smov 54  }
  0x78   : > { %339 = vrot.lane.b32.xlu1 %v4456_v26, %s5433_s30  ;;  %s6609_s30 = smov 88  }
  0x79   : > { %376 = vrot.lane.b32.xlu0 %v4462_v27, %s5434_s27  ;;  %s5453_s27 = smov 55  }
  0x7c   : > { %394 = vrot.lane.b32.xlu1 %v4465_v28, %s5435_s3  ;;  %s6603_s3 = smov 89  }
  0x7d   : > { %382 = vrot.lane.b32.xlu0 %v4463_v29, %s5436_s4  ;;  %s5455_s4 = smov 56  }
  0x80   : > { %388 = vrot.lane.b32.xlu1 %v4464_v30, %s5438_s5  ;;  %s6599_s5 = smov 90  }
  0x81   : > { %345 = vrot.lane.b32.xlu0 %v4457_v31, %s5439_s6  ;;  %s5457_s6 = smov 70  }
  0x84   : > { %407 = vrot.lane.b32.xlu1 %v4467_v33, %s5440_s8  ;;  %s6601_s8 = smov 91  }
  0x85   : > { %401 = vrot.lane.b32.xlu0 %v4466_v32, %s5441_s19  ;;  %s5459_s19 = smov 71  }
  0x88   : > { %806 = vrot.lane.b32.xlu1 %v5437_v15, %s5442_s24 }
  0x89   : > { %804 = vrot.lane.b32.xlu0 %v5437_v15, %s5442_s24 }
  0x8c   : > { %751 = vrot.lane.b32.xlu1 %v5437_v15, %s5443_s20 }
  0x8d   : > { %749 = vrot.lane.b32.xlu0 %v5437_v15, %s5443_s20 }
  0x90   : > { %696 = vrot.lane.b32.xlu1 %v5437_v15, %s5444_s23 }
  0x91   : > { %694 = vrot.lane.b32.xlu0 %v5437_v15, %s5444_s23 }
  0x94   : > { %641 = vrot.lane.b32.xlu1 %v5437_v15, %s5445_s25 }
  0x95   : > { %639 = vrot.lane.b32.xlu0 %v5437_v15, %s5445_s25 }
  0x98   : > { %586 = vrot.lane.b32.xlu1 %v5437_v15, %s5446_s28 }
  0x99   : > { %584 = vrot.lane.b32.xlu0 %v5437_v15, %s5446_s28 }
  0x9c   : > { %531 = vrot.lane.b32.xlu1 %v5437_v15, %s5447_s7 }
  0x9d   : > { %529 = vrot.lane.b32.xlu0 %v5437_v15, %s5447_s7 }
  0xa0   : > { %475 = vrot.lane.b32.xlu1 %v5437_v15, %s5448_s16 }
  0xa1   : > { %473 = vrot.lane.b32.xlu0 %v5437_v15, %s5448_s16 }
  0xa4   : > { %1686 = vrot.lane.b32.xlu1 %v5437_v15, %s5449_s17 }
  0xa5   : > { %1684 = vrot.lane.b32.xlu0 %v5437_v15, %s5449_s17 }
  0xa8   : > { %1246 = vrot.lane.b32.xlu1 %v5437_v15, %s5450_s26 }
  0xa9   : > { %1244 = vrot.lane.b32.xlu0 %v5437_v15, %s5450_s26 }
  0xad   : > { %1629 = vrot.lane.b32.xlu0 %v5437_v15, %s5451_s29 }
  0xba   : > { %v249_v34 = vpop.permute.xlu1 %248 }
  0xbb   : > { %v240_v35 = vpop.permute.xlu0 %239 }
  0xbc   : > { %245 = vst.msk [vmem:[#allocation2 + $0x8] sm:$0xf] %vm244_vm0, %v240_v35 }
  0xbd   : > { %252 = vst.msk [vmem:[#allocation2 + $0x8] sm:$0xf] %vm251_vm1, %v249_v34 }
  0xbe   : > { %v205_v36 = vpop.permute.xlu1 %204 }
  0xbf   : > { %v198_v37 = vpop.permute.xlu0 %197 }
  0xc0   : > { %201 = vst.msk [vmem:[#allocation2] sm:$0xf] %vm200_vm2, %v198_v37 }
  0xc1   : > { %208 = vst.msk [vmem:[#allocation2] sm:$0xf] %vm207_vm3, %v205_v36 }
  0xc2   : > { %v212_v38 = vpop.permute.xlu1 %211 }
  0xc3   : > { %v256_v39 = vpop.permute.xlu0 %255  ;;  %215 = vst.msk [vmem:[#allocation2] sm:$0xf] %vm214_vm4, %v212_v38 }
  0xc4   : > { %259 = vst.msk [vmem:[#allocation2 + $0x8] sm:$0xf] %vm258_vm5, %v256_v39 }
  0xc6   : > { %v219_v40 = vpop.permute.xlu1 %218 }
  0xc7   : > { %v263_v41 = vpop.permute.xlu0 %262  ;;  %222 = vst.msk [vmem:[#allocation2] sm:$0xf] %vm221_vm6, %v219_v40 }
  0xc8   : > { %266 = vst.msk [vmem:[#allocation2 + $0x8] sm:$0xf] %vm265_vm7, %v263_v41 }
  0xca   : > { %v226_v42 = vpop.permute.xlu1 %225 }
  0xcb   : > { %v270_v43 = vpop.permute.xlu0 %269  ;;  %229 = vst.msk [vmem:[#allocation2] sm:$0xf] %vm6598_vm8, %v226_v42  ;;  %vm309_vm8 = vcmask 396552  }
  0xcc   : > { %273 = vst.msk [vmem:[#allocation2 + $0x8] sm:$0xf] %vm6597_vm9, %v270_v43  ;;  %vm302_vm9 = vcmask 248952  }
  0xce   : > { %v291_v44 = vpop.permute.xlu1 %290 }
  0xcf   : > { %v277_v45 = vpop.permute.xlu0 %276  ;;  %296 = vst.msk [vmem:[#allocation2 + $0x10] sm:$0xf] %vm295_vm10, %v291_v44 }
  0xd0   : > { %280 = vst.msk [vmem:[#allocation2 + $0x8] sm:$0xf] %vm279_vm11, %v277_v45 }
  0xd2   : > { %v284_v46 = vpop.permute.xlu1 %283 }
  0xd3   : > { %v233_v47 = vpop.permute.xlu0 %232  ;;  %287 = vst.msk [vmem:[#allocation2 + $0x8] sm:$0xf] %vm286_vm12, %v284_v46 }
  0xd4   : > { %236 = vst.msk [vmem:[#allocation2] sm:$0xf] %vm235_vm13, %v233_v47 }
  0xd5   : > { %294 = vst.msk [vmem:[#allocation2 + $0x8] sm:$0xf] %vm293_vm14, %v291_v44 }
  0xd6   : > { %243 = vst.msk [vmem:[#allocation2] sm:$0xf] %vm242_vm15, %v240_v35  ;;  %v307_v48 = vpop.permute.xlu1 %306 }
  0xd7   : > { %v300_v49 = vpop.permute.xlu0 %299 }
  0xd8   : > { %303 = vst.msk [vmem:[#allocation2 + $0x10] sm:$0xf] %vm302_vm9, %v300_v49 }
  0xd9   : > { %310 = vst.msk [vmem:[#allocation2 + $0x10] sm:$0xf] %vm309_vm8, %v307_v48 }
  0xda   : > { %v315_v50 = vpop.permute.xlu1 %314 }
  0xdb   : > { %v352_v51 = vpop.permute.xlu0 %351  ;;  %318 = vst.msk [vmem:[#allocation2 + $0x40] sm:$0xf] %vm200_vm2, %v315_v50  ;;  %vm481_vm2 = vcmask 1043456  }
  0xdc   : > { %v412_v52 = vld [vmem:[#allocation2 + $0x8] sm:$0xff]  ;;  %355 = vst.msk [vmem:[#allocation2 + $0x48] sm:$0xf] %vm244_vm0, %v352_v51  ;;  %vm6633_vm0 = vcmask 872152  }
  0xdd   : > { %v411_v53 = vld [vmem:[#allocation2] sm:$0xff] }
  0xde   : > { %v5751_v54 = vpack.c.bf16 %v412_v52, %v411_v53  ;;  %v322_v55 = vpop.permute.xlu1 %321 }
  0xdf   : > { %v359_v56 = vpop.permute.xlu0 %358  ;;  %324 = vst.msk [vmem:[#allocation2 + $0x40] sm:$0xf] %vm207_vm3, %v322_v55  ;;  %vm813_vm3 = vcmask 883712  }
  0xe0   : > { %800 = vrot.lane.b32.xlu0 %v5751_v54, %s5442_s24  ;;  %361 = vst.msk [vmem:[#allocation2 + $0x48] sm:$0xf] %vm251_vm1, %v359_v56  ;;  %v774_v57 = vld [vmem:[#allocation2 + $0x10] sm:$0xff]  ;;  %vm6634_vm1 = vcmask 708152  }
  0xe1   : > { %v413_v58 = vld [vmem:[#allocation2 + $0x10] sm:$0xff]  ;;  %v5758_v59 = vpack.c.bf16 %v5424_v0, %v774_v57 }
  0xe2   : > { %v4836_v60 = vpack.c.bf16 %v413_v58, %v413_v58  ;;  %v328_v61 = vpop.permute.xlu1 %327 }
  0xe3   : > { %v365_v62 = vpop.permute.xlu0 %364  ;;  %802 = vrot.lane.b32.xlu1 %v5758_v59, %s5442_s24  ;;  %330 = vst.msk [vmem:[#allocation2 + $0x40] sm:$0xf] %vm214_vm4, %v328_v61  ;;  %vm758_vm4 = vcmask 891904  }
  0xe4   : > { %745 = vrot.lane.b32.xlu0 %v5751_v54, %s5443_s20  ;;  %438 = vst [vmem:[#allocation3 + $0x8] sm:$0xf] %v4836_v60  ;;  %367 = vst.msk [vmem:[#allocation2 + $0x48] sm:$0xf] %vm258_vm5, %v365_v62  ;;  %vm703_vm5 = vcmask 900096  }
  0xe6   : > { %v334_v63 = vpop.permute.xlu1 %333 }
  0xe7   : > { %v371_v1 = vpop.permute.xlu0 %370  ;;  %747 = vrot.lane.b32.xlu1 %v5758_v59, %s5443_s20  ;;  %336 = vst.msk [vmem:[#allocation2 + $0x40] sm:$0xf] %vm221_vm6, %v334_v63  ;;  %vm648_vm6 = vcmask 1014784  }
  0xe8   : > { %690 = vrot.lane.b32.xlu0 %v5751_v54, %s5444_s23  ;;  %373 = vst.msk [vmem:[#allocation2 + $0x48] sm:$0xf] %vm265_vm7, %v371_v1  ;;  %vm593_vm7 = vcmask 1022976  }
  0xea   : > { %v340_v0 = vpop.permute.xlu1 %339 }
  0xeb   : > { %v377_v2 = vpop.permute.xlu0 %376  ;;  %692 = vrot.lane.b32.xlu1 %v5758_v59, %s5444_s23  ;;  %342 = vst.msk [vmem:[#allocation2 + $0x40] sm:$0xf] %vm6633_vm0, %v340_v0  ;;  %vm6611_vm0 = vcmask 728064  }
  0xec   : > { %635 = vrot.lane.b32.xlu0 %v5751_v54, %s5445_s25  ;;  %379 = vst.msk [vmem:[#allocation2 + $0x48] sm:$0xf] %vm6634_vm1, %v377_v2  ;;  %vm1528_vm1 = vcmask 457728  }
  0xee   : > { %v395_v3 = vpop.permute.xlu1 %394 }
  0xef   : > { %v383_v4 = vpop.permute.xlu0 %382  ;;  %637 = vrot.lane.b32.xlu1 %v5758_v59, %s5445_s25  ;;  %398 = vst.msk [vmem:[#allocation2 + $0x50] sm:$0xf] %vm295_vm10, %v395_v3  ;;  %vm1693_vm10 = vcmask 433152  }
  0xf0   : > { %580 = vrot.lane.b32.xlu0 %v5751_v54, %s5446_s28  ;;  %385 = vst.msk [vmem:[#allocation2 + $0x48] sm:$0xf] %vm279_vm11, %v383_v4  ;;  %vm6614_vm11 = vcmask 605184  }
  0xf2   : > { %v389_v5 = vpop.permute.xlu1 %388 }
  0xf3   : > { %v346_v6 = vpop.permute.xlu0 %345  ;;  %582 = vrot.lane.b32.xlu1 %v5758_v59, %s5446_s28  ;;  %391 = vst.msk [vmem:[#allocation2 + $0x48] sm:$0xf] %vm286_vm12, %v389_v5  ;;  %vm1638_vm12 = vcmask 441344  }
  0xf4   : > { %525 = vrot.lane.b32.xlu0 %v5751_v54, %s5447_s7  ;;  %348 = vst.msk [vmem:[#allocation2 + $0x40] sm:$0xf] %vm235_vm13, %v346_v6  ;;  %vm6612_vm13 = vcmask 719872  }
  0xf5   : > { %397 = vst.msk [vmem:[#allocation2 + $0x48] sm:$0xf] %vm293_vm14, %v395_v3  ;;  %vm4003_vm14 = vcmask 130048  }
  0xf6   : > { %354 = vst.msk [vmem:[#allocation2 + $0x40] sm:$0xf] %vm242_vm15, %v352_v51  ;;  %v408_v8 = vpop.permute.xlu1 %407  ;;  %vm1583_vm15 = vcmask 449536  }
  0xf7   : > { %527 = vrot.lane.b32.xlu1 %v5758_v59, %s5447_s7  ;;  %v402_v7 = vpop.permute.xlu0 %401 }
  0xf8   : > { %469 = vrot.lane.b32.xlu0 %v5751_v54, %s5448_s16  ;;  %404 = vst.msk [vmem:[#allocation2 + $0x50] sm:$0xf] %vm302_vm9, %v402_v7  ;;  %vm6616_vm9 = vcmask 1039360  }
  0xf9   : > { %410 = vst.msk [vmem:[#allocation2 + $0x50] sm:$0xf] %vm309_vm8, %v408_v8  ;;  %vm538_vm8 = vcmask 1031168  }
  0xfa   : > { %v807_v10 = vpop.permute.xlu1 %806 }
  0xfb   : > { %471 = vrot.lane.b32.xlu1 %v5758_v59, %s5448_s16  ;;  %v805_v9 = vpop.permute.xlu0 %804  ;;  %v811_v14 = vrot.slane %v807_v10, 4 }
  0xfc   : > { %1680 = vrot.lane.b32.xlu0 %v5751_v54, %s5449_s17  ;;  %v1763_v11 = vld [vmem:[#allocation2 + $0x48] sm:$0xff]  ;;  %v810_v13 = vrot.slane %v805_v9, 4 }
  0xfd   : > { %v1762_v12 = vld [vmem:[#allocation2 + $0x40] sm:$0xff]  ;;  %v818_v18 = vsel %vm813_vm3, %v807_v10, %v811_v14 }
  0xfe   : > { %v5802_v16 = vpack.c.bf16 %v1763_v11, %v1762_v12  ;;  %v816_v17 = vsel %vm481_vm2, %v810_v13, %v811_v14  ;;  %826 = vst [vmem:[#allocation3 + $0x170] sm:$0xf] %v818_v18  ;;  %v752_v21 = vpop.permute.xlu1 %751 }
  0xff   : > { %1682 = vrot.lane.b32.xlu1 %v5758_v59, %s5449_s17  ;;  %v750_v19 = vpop.permute.xlu0 %749  ;;  %v5811_v20 = vsel %vm813_vm3, %v805_v9, %v816_v17  ;;  %v756_v24 = vrot.slane %v752_v21, 4 }
 0x100   : > { %1240 = vrot.lane.b32.xlu0 %v5751_v54, %s5450_s26  ;;  %1788 = vst [vmem:[#allocation3 + $0xc] sm:$0xff] %v5802_v16  ;;  %v5814_v22 = vld [vmem:[#allocation2 + $0x50] sm:$0xff]  ;;  %v755_v23 = vrot.slane %v750_v19, 4 }
 0x101   : > { %v4936_v25 = vpack.c.bf16 %v5814_v22, %v5814_v22  ;;  %v763_v27 = vsel %vm758_vm4, %v752_v21, %v756_v24 }
 0x102   : > { %v761_v26 = vsel %vm481_vm2, %v755_v23, %v756_v24  ;;  %771 = vst [vmem:[#allocation3 + $0x140] sm:$0xf] %v763_v27  ;;  %v697_v30 = vpop.permute.xlu1 %696 }
 0x103   : > { %1242 = vrot.lane.b32.xlu1 %v5758_v59, %s5450_s26  ;;  %1789 = vst [vmem:[#allocation3 + $0x14] sm:$0xf] %v4936_v25  ;;  %v695_v28 = vpop.permute.xlu0 %694  ;;  %v5825_v29 = vsel %vm758_vm4, %v750_v19, %v761_v26  ;;  %v701_v32 = vrot.slane %v697_v30, 4 }
 0x104   : > { %1625 = vrot.lane.b32.xlu0 %v5751_v54, %s5451_s29  ;;  %v700_v31 = vrot.slane %v695_v28, 4 }
 0x105   : > { %v708_v34 = vsel %vm703_vm5, %v697_v30, %v701_v32 }
 0x106   : > { %v706_v33 = vsel %vm481_vm2, %v700_v31, %v701_v32  ;;  %716 = vst [vmem:[#allocation3 + $0x110] sm:$0xf] %v708_v34  ;;  %v642_v37 = vpop.permute.xlu1 %641 }
 0x107   : > { %1627 = vrot.lane.b32.xlu1 %v5758_v59, %s5451_s29  ;;  %v640_v35 = vpop.permute.xlu0 %639  ;;  %v5834_v36 = vsel %vm703_vm5, %v695_v28, %v706_v33  ;;  %v646_v39 = vrot.slane %v642_v37, 4 }
 0x108   : > { %1185 = vrot.lane.b32.xlu0 %v5751_v54, %s6609_s30  ;;  %v645_v38 = vrot.slane %v640_v35, 4 }
 0x109   : > { %v653_v41 = vsel %vm648_vm6, %v642_v37, %v646_v39 }
 0x10a   : > { %v651_v40 = vsel %vm481_vm2, %v645_v38, %v646_v39  ;;  %661 = vst [vmem:[#allocation3 + $0xe0] sm:$0xf] %v653_v41  ;;  %v587_v44 = vpop.permute.xlu1 %586 }
 0x10b   : > { %1631 = vrot.lane.b32.xlu1 %v5437_v15, %s5451_s29  ;;  %v585_v42 = vpop.permute.xlu0 %584  ;;  %v5843_v43 = vsel %vm648_vm6, %v640_v35, %v651_v40  ;;  %v591_v46 = vrot.slane %v587_v44, 4 }
 0x10c   : > { %1189 = vrot.lane.b32.xlu0 %v5437_v15, %s6609_s30  ;;  %v590_v45 = vrot.slane %v585_v42, 4 }
 0x10d   : > { %v598_v48 = vsel %vm593_vm7, %v587_v44, %v591_v46 }
 0x10e   : > { %v596_v47 = vsel %vm481_vm2, %v590_v45, %v591_v46  ;;  %606 = vst [vmem:[#allocation3 + $0xb0] sm:$0xf] %v598_v48  ;;  %v532_v51 = vpop.permute.xlu1 %531 }
 0x10f   : > { %1187 = vrot.lane.b32.xlu1 %v5758_v59, %s6609_s30  ;;  %v530_v49 = vpop.permute.xlu0 %529  ;;  %v5852_v50 = vsel %vm593_vm7, %v585_v42, %v596_v47  ;;  %v536_v53 = vrot.slane %v532_v51, 4 }
 0x110   : > { %1570 = vrot.lane.b32.xlu0 %v5751_v54, %s5453_s27  ;;  %v535_v52 = vrot.slane %v530_v49, 4 }
 0x111   : > { %v543_v56 = vsel %vm538_vm8, %v532_v51, %v536_v53 }
 0x112   : > { %v541_v55 = vsel %vm481_vm2, %v535_v52, %v536_v53  ;;  %551 = vst [vmem:[#allocation3 + $0x80] sm:$0xf] %v543_v56  ;;  %v476_v60 = vpop.permute.xlu1 %475 }
 0x113   : > { %1191 = vrot.lane.b32.xlu1 %v5437_v15, %s6609_s30  ;;  %v474_v57 = vpop.permute.xlu0 %473  ;;  %v5861_v58 = vsel %vm538_vm8, %v530_v49, %v541_v55  ;;  %v480_v62 = vrot.slane %v476_v60, 4  ;;  %s5465_s30 = smov 52  }
 0x114   : > { %1574 = vrot.lane.b32.xlu0 %v5437_v15, %s5453_s27  ;;  %v479_v61 = vrot.slane %v474_v57, 4 }
 0x115   : > { %v488_v1 = vsel %vm6616_vm9, %v476_v60, %v480_v62 }
 0x116   : > { %v486_v63 = vsel %vm481_vm2, %v479_v61, %v480_v62  ;;  %496 = vst [vmem:[#allocation3 + $0x50] sm:$0xf] %v488_v1  ;;  %v1687_v3 = vpop.permute.xlu1 %1686 }
 0x117   : > { %1572 = vrot.lane.b32.xlu1 %v5758_v59, %s5453_s27  ;;  %v1685_v0 = vpop.permute.xlu0 %1684  ;;  %v5870_v2 = vsel %vm6616_vm9, %v474_v57, %v486_v63  ;;  %v1691_v5 = vrot.slane %v1687_v3, 4 }
 0x118   : > { %1130 = vrot.lane.b32.xlu0 %v5751_v54, %s6603_s3  ;;  %v1690_v4 = vrot.slane %v1685_v0, 4 }
 0x119   : > { %v1698_v7 = vsel %vm1693_vm10, %v1687_v3, %v1691_v5 }
 0x11a   : > { %v1696_v6 = vsel %vm481_vm2, %v1690_v4, %v1691_v5  ;;  %1706 = vst [vmem:[#allocation3 + $0x470] sm:$0xf] %v1698_v7  ;;  %v1247_v10 = vpop.permute.xlu1 %1246 }
 0x11b   : > { %1576 = vrot.lane.b32.xlu1 %v5437_v15, %s5453_s27  ;;  %v1245_v8 = vpop.permute.xlu0 %1244  ;;  %v5879_v9 = vsel %vm1693_vm10, %v1685_v0, %v1696_v6  ;;  %v1251_v12 = vrot.slane %v1247_v10, 4 }
 0x11c   : > { %1134 = vrot.lane.b32.xlu0 %v5437_v15, %s6603_s3  ;;  %v1250_v11 = vrot.slane %v1245_v8, 4 }
 0x11d   : > { %v1258_v14 = vsel %vm6614_vm11, %v1247_v10, %v1251_v12  ;;  %v1707_v10 = vld [vmem:[#allocation2] sm:$0xff] }
 0x11e   : > { %v1256_v13 = vsel %vm481_vm2, %v1250_v11, %v1251_v12  ;;  %1266 = vst [vmem:[#allocation3 + $0x2f0] sm:$0xf] %v1258_v14  ;;  %v1708_v11 = vld [vmem:[#allocation2 + $0x8] sm:$0xff] }
 0x11f   : > { %1132 = vrot.lane.b32.xlu1 %v5758_v59, %s6603_s3  ;;  %v5888_v17 = vsel %vm6614_vm11, %v1245_v8, %v1256_v13  ;;  %v5934_v18 = vpop.permute.xlu0 %1629 }
 0x120   : > { %1515 = vrot.lane.b32.xlu0 %v5751_v54, %s5455_s4 }
 0x123   : > { %1136 = vrot.lane.b32.xlu1 %v5437_v15, %s6603_s3  ;;  %s6607_s3 = smov 106  }
 0x124   : > { %1519 = vrot.lane.b32.xlu0 %v5437_v15, %s5455_s4 }
 0x127   : > { %1517 = vrot.lane.b32.xlu1 %v5758_v59, %s5455_s4 }
 0x128   : > { %1075 = vrot.lane.b32.xlu0 %v5751_v54, %s6599_s5 }
 0x12b   : > { %1521 = vrot.lane.b32.xlu1 %v5437_v15, %s5455_s4 }
 0x12c   : > { %1079 = vrot.lane.b32.xlu0 %v5437_v15, %s6599_s5 }
 0x12f   : > { %1077 = vrot.lane.b32.xlu1 %v5758_v59, %s6599_s5 }
 0x130   : > { %1460 = vrot.lane.b32.xlu0 %v5751_v54, %s5457_s6 }
 0x133   : > { %1081 = vrot.lane.b32.xlu1 %v5437_v15, %s6599_s5  ;;  %s6605_s5 = smov 92  }
 0x134   : > { %1464 = vrot.lane.b32.xlu0 %v5437_v15, %s5457_s6 }
 0x137   : > { %1462 = vrot.lane.b32.xlu1 %v5758_v59, %s5457_s6 }
 0x138   : > { %1020 = vrot.lane.b32.xlu0 %v5751_v54, %s6601_s8 }
 0x13b   : > { %1466 = vrot.lane.b32.xlu1 %v5437_v15, %s5457_s6 }
 0x13c   : > { %1024 = vrot.lane.b32.xlu0 %v5437_v15, %s6601_s8 }
 0x13f   : > { %1022 = vrot.lane.b32.xlu1 %v5758_v59, %s6601_s8 }
 0x140   : > { %1405 = vrot.lane.b32.xlu0 %v5751_v54, %s5459_s19 }
 0x143   : > { %1026 = vrot.lane.b32.xlu1 %v5437_v15, %s6601_s8  ;;  %s5461_s8 = smov 72  }
 0x144   : > { %1409 = vrot.lane.b32.xlu0 %v5437_v15, %s5459_s19 }
 0x147   : > { %1407 = vrot.lane.b32.xlu1 %v5758_v59, %s5459_s19 }
 0x148   : > { %965 = vrot.lane.b32.xlu0 %v5751_v54, %s6605_s5 }
 0x14b   : > { %1411 = vrot.lane.b32.xlu1 %v5437_v15, %s5459_s19 }
 0x14c   : > { %969 = vrot.lane.b32.xlu0 %v5437_v15, %s6605_s5 }
 0x14f   : > { %967 = vrot.lane.b32.xlu1 %v5758_v59, %s6605_s5 }
 0x150   : > { %1350 = vrot.lane.b32.xlu0 %v5751_v54, %s5461_s8 }
 0x152   : > { %v801_v19 = vpop.permute.xlu0 %800 }
 0x153   : > { %971 = vrot.lane.b32.xlu1 %v5437_v15, %s6605_s5  ;;  %v808_v24 = vrot.slane %v801_v19, 4  ;;  %s5463_s5 = smov 73  }
 0x154   : > { %1354 = vrot.lane.b32.xlu0 %v5437_v15, %s5461_s8 }
 0x155   : > { %v803_v21 = vpop.permute.xlu1 %802 }
 0x156   : > { %v746_v23 = vpop.permute.xlu0 %745  ;;  %v809_v25 = vrot.slane %v803_v21, 4 }
 0x157   : > { %1352 = vrot.lane.b32.xlu1 %v5758_v59, %s5461_s8  ;;  %v753_v32 = vrot.slane %v746_v23, 4 }
 0x158   : > { %910 = vrot.lane.b32.xlu0 %v5751_v54, %s6607_s3  ;;  %v812_v26 = vsel %vm481_vm2, %v808_v24, %v809_v25  ;;  %v815_v27 = vsel %vm813_vm3, %v803_v21, %v809_v25  ;;  %v4931_v25 = vpack.c.bf16 %v1708_v11, %v1707_v10 }
 0x159   : > { %v814_v28 = vsel %vm813_vm3, %v801_v19, %v812_v26  ;;  %824 = vst [vmem:[#allocation3 + $0x158] sm:$0xf] %v815_v27  ;;  %v748_v30 = vpop.permute.xlu1 %747 }
 0x15a   : > { %v691_v31 = vpop.permute.xlu0 %690  ;;  %v754_v33 = vrot.slane %v748_v30, 4  ;;  %v4715_v34 = vcombine.high %v814_v28, %v5811_v20  ;;  %v4714_v35 = vcombine.low %v814_v28, %v5811_v20 }
 0x15b   : > { %1356 = vrot.lane.b32.xlu1 %v5437_v15, %s5461_s8  ;;  %v698_v42 = vrot.slane %v691_v31, 4 }
 0x15c   : > { %914 = vrot.lane.b32.xlu0 %v5437_v15, %s6607_s3  ;;  %v757_v37 = vsel %vm481_vm2, %v753_v32, %v754_v33  ;;  %v760_v38 = vsel %vm758_vm4, %v748_v30, %v754_v33  ;;  %4007 = vmatprep.subr.bf16.mxu0 %v4715_v34 }
 0x15d   : > { %v759_v39 = vsel %vm758_vm4, %v746_v23, %v757_v37  ;;  %769 = vst [vmem:[#allocation3 + $0x128] sm:$0xf] %v760_v38  ;;  %v693_v40 = vpop.permute.xlu1 %692  ;;  %4008 = vmatpush1.bf16.msra.mxu0 %v4714_v35 }
 0x15e   : > { %v636_v41 = vpop.permute.xlu0 %635  ;;  %v699_v44 = vrot.slane %v693_v40, 4  ;;  %v4709_v20 = vcombine.high %v759_v39, %v5825_v29  ;;  %v4708_v45 = vcombine.low %v759_v39, %v5825_v29 }
 0x15f   : > { %912 = vrot.lane.b32.xlu1 %v5758_v59, %s6607_s3  ;;  %v643_v52 = vrot.slane %v636_v41, 4 }
 0x160   : > { %1295 = vrot.lane.b32.xlu0 %v5751_v54, %s5463_s5  ;;  %v702_v46 = vsel %vm481_vm2, %v698_v42, %v699_v44  ;;  %v705_v47 = vsel %vm703_vm5, %v693_v40, %v699_v44  ;;  %4009 = vmatprep.subr.bf16.mxu0 %v4709_v20 }
 0x161   : > { %v704_v48 = vsel %vm703_vm5, %v691_v31, %v702_v46  ;;  %714 = vst [vmem:[#allocation3 + $0xf8] sm:$0xf] %v705_v47  ;;  %v638_v49 = vpop.permute.xlu1 %637  ;;  %4010 = vmatpush1.bf16.msra.mxu0 %v4708_v45 }
 0x162   : > { %v581_v51 = vpop.permute.xlu0 %580  ;;  %v644_v29 = vrot.slane %v638_v49, 4  ;;  %v4703_v53 = vcombine.high %v704_v48, %v5834_v36  ;;  %v4702_v55 = vcombine.low %v704_v48, %v5834_v36 }
 0x163   : > { %916 = vrot.lane.b32.xlu1 %v5437_v15, %s6607_s3  ;;  %v588_v63 = vrot.slane %v581_v51, 4  ;;  %s5464_s3 = smov 107  }
 0x164   : > { %1299 = vrot.lane.b32.xlu0 %v5437_v15, %s5463_s5  ;;  %v647_v56 = vsel %vm481_vm2, %v643_v52, %v644_v29  ;;  %v650_v57 = vsel %vm648_vm6, %v638_v49, %v644_v29  ;;  %4011 = vmatprep.subr.bf16.mxu0 %v4703_v53 }
 0x165   : > { %v649_v60 = vsel %vm648_vm6, %v636_v41, %v647_v56  ;;  %659 = vst [vmem:[#allocation3 + $0xc8] sm:$0xf] %v650_v57  ;;  %v583_v61 = vpop.permute.xlu1 %582  ;;  %4012 = vmatpush1.bf16.msra.mxu0 %v4702_v55  ;;  %v4673_v41 = vcombine.high %v5751_v54, %v5437_v15 }
 0x166   : > { %v526_v62 = vpop.permute.xlu0 %525  ;;  %v589_v1 = vrot.slane %v583_v61, 4  ;;  %v4697_v36 = vcombine.high %v649_v60, %v5843_v43  ;;  %v4696_v0 = vcombine.low %v649_v60, %v5843_v43  ;;  %v2980_v60 = vld [vmem:[#allocation2 + $0x40] sm:$0xff] }
 0x167   : > { %1297 = vrot.lane.b32.xlu1 %v5758_v59, %s5463_s5  ;;  %v533_v8 = vrot.slane %v526_v62, 4 }
 0x168   : > { %855 = vrot.lane.b32.xlu0 %v5751_v54, %s5464_s3  ;;  %v592_v3 = vsel %vm481_vm2, %v588_v63, %v589_v1  ;;  %v595_v4 = vsel %vm593_vm7, %v583_v61, %v589_v1  ;;  %4013 = vmatprep.subr.bf16.mxu0 %v4697_v36 }
 0x169   : > { %v594_v5 = vsel %vm593_vm7, %v581_v51, %v592_v3  ;;  %604 = vst [vmem:[#allocation3 + $0x98] sm:$0xf] %v595_v4  ;;  %v528_v6 = vpop.permute.xlu1 %527  ;;  %4014 = vmatpush1.bf16.msra.mxu0 %v4696_v0  ;;  %v4672_v51 = vcombine.low %v5751_v54, %v5437_v15  ;;  %v1635_v4 = vrot.slane %v5934_v18, 4 }
 0x16a   : > { %v470_v7 = vpop.permute.xlu0 %469  ;;  %v534_v43 = vrot.slane %v528_v6, 4  ;;  %v4691_v12 = vcombine.high %v594_v5, %v5852_v50  ;;  %v4690_v13 = vcombine.low %v594_v5, %v5852_v50 }
 0x16b   : > { %1301 = vrot.lane.b32.xlu1 %v5437_v15, %s5463_s5  ;;  %v477_v26 = vrot.slane %v470_v7, 4 }
 0x16c   : > { %859 = vrot.lane.b32.xlu0 %v5437_v15, %s5464_s3  ;;  %v537_v14 = vsel %vm481_vm2, %v533_v8, %v534_v43  ;;  %v540_v19 = vsel %vm538_vm8, %v528_v6, %v534_v43  ;;  %4015 = vmatprep.subr.bf16.mxu0 %v4691_v12  ;;  %v6049_v43 = vld [vmem:[#allocation7 + $0x8] sm:$0xff]  ;;  %v2982_v12 = vld [vmem:[#allocation2 + $0x50] sm:$0xff] }
 0x16d   : > { %v539_v21 = vsel %vm538_vm8, %v526_v62, %v537_v14  ;;  %549 = vst [vmem:[#allocation3 + $0x68] sm:$0xf] %v540_v19  ;;  %v472_v23 = vpop.permute.xlu1 %471  ;;  %4016 = vmatpush1.bf16.msra.mxu0 %v4690_v13  ;;  %v6051_v19 = vld [vmem:[#allocation3 + $0x18] sm:$0xff] }
 0x16e   : > { %v1681_v24 = vpop.permute.xlu0 %1680  ;;  %v478_v50 = vrot.slane %v472_v23, 4  ;;  %v4685_v27 = vcombine.high %v539_v21, %v5861_v58  ;;  %v4684_v28 = vcombine.low %v539_v21, %v5861_v58  ;;  %v1709_v58 = vld [vmem:[#allocation2 + $0x10] sm:$0xff] }
 0x16f   : > { %857 = vrot.lane.b32.xlu1 %v5758_v59, %s5464_s3  ;;  %v1688_v35 = vrot.slane %v1681_v24, 4 }
 0x170   : > { %1735 = vrot.lane.b32.xlu0 %v4931_v25, %s5465_s30  ;;  %v482_v30 = vsel %vm481_vm2, %v477_v26, %v478_v50  ;;  %v485_v31 = vsel %vm6616_vm9, %v472_v23, %v478_v50  ;;  %4017 = vmatprep.subr.bf16.mxu0 %v4685_v27 }
 0x171   : > { %v484_v32 = vsel %vm6616_vm9, %v470_v7, %v482_v30  ;;  %494 = vst [vmem:[#allocation3 + $0x38] sm:$0xf] %v485_v31  ;;  %v1683_v33 = vpop.permute.xlu1 %1682  ;;  %4018 = vmatpush1.bf16.msra.mxu0 %v4684_v28  ;;  %v6069_v28 = vld [vmem:[#allocation7] sm:$0xff]  ;;  %vm6618_vm9 = vcmask 588800  }
 0x172   : > { %v1241_v34 = vpop.permute.xlu0 %1240  ;;  %v1689_v37 = vrot.slane %v1683_v33, 4  ;;  %v4679_v38 = vcombine.high %v484_v32, %v5870_v2  ;;  %v4678_v59 = vcombine.low %v484_v32, %v5870_v2  ;;  %v6015_v2 = vld [vmem:[#allocation2 + $0x20] sm:$0xff]  ;;  %v6073_v31 = vcombine.high %v6069_v28, %v6069_v28 }
 0x173   : > { %861 = vrot.lane.b32.xlu1 %v5437_v15, %s5464_s3  ;;  %v4932_v45 = vpack.c.bf16 %v6015_v2, %v1709_v58  ;;  %v1248_v46 = vrot.slane %v1241_v34, 4  ;;  %v4964_v3 = vpack.c.bf16 %v6015_v2, %v5814_v22  ;;  %v6065_v27 = vpack.c.bf16 %v6015_v2, %v2982_v12 }
 0x174   : > { %1739 = vrot.lane.b32.xlu0 %v5437_v15, %s5465_s30  ;;  %v1692_v39 = vsel %vm481_vm2, %v1688_v35, %v1689_v37  ;;  %v1695_v40 = vsel %vm1693_vm10, %v1683_v33, %v1689_v37  ;;  %4019 = vmatprep.subr.bf16.mxu0 %v4679_v38 }
 0x175   : > { %v1694_v42 = vsel %vm1693_vm10, %v1681_v24, %v1692_v39  ;;  %1704 = vst [vmem:[#allocation3 + $0x458] sm:$0xf] %v1695_v40  ;;  %v1243_v44 = vpop.permute.xlu1 %1242  ;;  %4020 = vmatpush1.bf16.msra.mxu0 %v4678_v59  ;;  %4039 = vmatprep.mubr.bf16.mxu0 %v6073_v31 }
 0x176   : > { %v1626_v20 = vpop.permute.xlu0 %1625  ;;  %v1249_v47 = vrot.slane %v1243_v44, 4  ;;  %4021 = vmatprep.subr.bf16.mxu0 %v4673_v41  ;;  %v4811_v48 = vcombine.high %v1694_v42, %v5879_v9  ;;  %v4810_v49 = vcombine.low %v1694_v42, %v5879_v9 }
 0x177   : > { %1737 = vrot.lane.b32.xlu1 %v4932_v45, %s5465_s30  ;;  %v1633_v9 = vrot.slane %v1626_v20, 4 }
 0x178   : > { %2144 = vrot.lane.b32.xlu0 %v5802_v16, %s5442_s24  ;;  %v1252_v52 = vsel %vm481_vm2, %v1248_v46, %v1249_v47  ;;  %v1255_v29 = vsel %vm6614_vm11, %v1243_v44, %v1249_v47  ;;  %4048 = vmatprep.subr.bf16.mxu1 %v4811_v48  ;;  %v2981_v16 = vld [vmem:[#allocation2 + $0x48] sm:$0xff] }
 0x179   : > { %v1254_v53 = vsel %vm6614_vm11, %v1241_v34, %v1252_v52  ;;  %1264 = vst [vmem:[#allocation3 + $0x2d8] sm:$0xf] %v1255_v29  ;;  %v1628_v55 = vpop.permute.xlu1 %1627  ;;  %4049 = vmatpush1.bf16.msra.mxu1 %v4810_v49  ;;  %4022 = vmatpush1.bf16.msra.mxu0 %v4672_v51  ;;  %vm1418_vm11 = vcmask 580608  }
 0x17a   : > { %v1186_v56 = vpop.permute.xlu0 %1185  ;;  %v1634_v57 = vrot.slane %v1628_v55, 4  ;;  %v4763_v61 = vcombine.high %v1254_v53, %v5888_v17  ;;  %v4762_v54 = vcombine.low %v1254_v53, %v5888_v17  ;;  %v6039_v17 = vpack.c.bf16 %v2981_v16, %v2980_v60 }
 0x17b   : > { %1741 = vrot.lane.b32.xlu1 %v5437_v15, %s5465_s30  ;;  %v1193_v10 = vrot.slane %v1186_v56, 4 }
 0x17c   : > { %2148 = vrot.lane.b32.xlu0 %v5437_v15, %s5442_s24  ;;  %v1637_v62 = vsel %vm481_vm2, %v1633_v9, %v1634_v57  ;;  %v1640_v63 = vsel %vm1638_vm12, %v1628_v55, %v1634_v57  ;;  %4023 = vmatprep.subr.bf16.mxu0 %v4763_v61 }
 0x17d   : > { %v1639_v1 = vsel %vm1638_vm12, %v1626_v20, %v1637_v62  ;;  %1649 = vst [vmem:[#allocation3 + $0x428] sm:$0xf] %v1640_v63  ;;  %v1632_v36 = vpop.permute.xlu1 %1631  ;;  %4024 = vmatpush2.bf16.msra.mxu0 %v4762_v54 }
 0x17e   : > { %v1190_v0 = vpop.permute.xlu0 %1189  ;;  %v1636_v5 = vrot.slane %v1632_v36, 4 }
 0x17f   : > { %2146 = vrot.lane.b32.xlu1 %v4964_v3, %s5442_s24  ;;  %v1195_v21 = vrot.slane %v1190_v0, 4 }
 0x180   : > { %3008 = vrot.lane.b32.xlu0 %v6039_v17, %s5449_s17  ;;  %v1641_v15 = vsel %vm481_vm2, %v1635_v4, %v1636_v5  ;;  %v1643_v6 = vsel %vm1638_vm12, %v1632_v36, %v1636_v5 }
 0x181   : > { %v1642_v7 = vsel %vm1638_vm12, %v5934_v18, %v1641_v15  ;;  %1651 = vst [vmem:[#allocation3 + $0x440] sm:$0xf] %v1643_v6  ;;  %v1188_v22 = vpop.permute.xlu1 %1187  ;;  %v6059_v18 = vcombine.high %v6049_v43, %v6049_v43 }
 0x182   : > { %v1571_v8 = vpop.permute.xlu0 %1570  ;;  %v1194_v11 = vrot.slane %v1188_v22, 4  ;;  %v4805_v13 = vcombine.high %v1639_v1, %v1642_v7  ;;  %v4804_v14 = vcombine.low %v1639_v1, %v1642_v7 }
 0x183   : > { %2150 = vrot.lane.b32.xlu1 %v6051_v19, %s5442_s24  ;;  %4822 = vmatprep.mubr.msk.bf16.mxu1 %vm4003_vm14, %v6059_v18  ;;  %v1578_v58 = vrot.slane %v1571_v8, 4  ;;  %s6635_s24 = smov 88  }
 0x184   : > { %3012 = vrot.lane.b32.xlu0 %v6051_v19, %s5449_s17  ;;  %v1197_v23 = vsel %vm481_vm2, %v1193_v10, %v1194_v11  ;;  %v1200_v24 = vsel %vm6612_vm13, %v1188_v22, %v1194_v11  ;;  %4050 = vmatprep.subr.bf16.mxu1 %v4805_v13 }
 0x185   : > { %v1199_v25 = vsel %vm6612_vm13, %v1186_v56, %v1197_v23  ;;  %1209 = vst [vmem:[#allocation3 + $0x2a8] sm:$0xf] %v1200_v24  ;;  %v1192_v26 = vpop.permute.xlu1 %1191  ;;  %4051 = vmatpush1.bf16.msra.mxu1 %v4804_v14 }
 0x186   : > { %v1575_v50 = vpop.permute.xlu0 %1574  ;;  %v1196_v30 = vrot.slane %v1192_v26, 4 }
 0x187   : > { %3010 = vrot.lane.b32.xlu1 %v6065_v27, %s5449_s17  ;;  %v1580_v40 = vrot.slane %v1575_v50, 4 }
 0x188   : > { %2090 = vrot.lane.b32.xlu0 %v6039_v17, %s5443_s20  ;;  %v1201_v32 = vsel %vm481_vm2, %v1195_v21, %v1196_v30  ;;  %v1203_v33 = vsel %vm6612_vm13, %v1192_v26, %v1196_v30 }
 0x189   : > { %v1202_v34 = vsel %vm6612_vm13, %v1190_v0, %v1201_v32  ;;  %1211 = vst [vmem:[#allocation3 + $0x2c0] sm:$0xf] %v1203_v33  ;;  %v1573_v35 = vpop.permute.xlu1 %1572  ;;  %vm1473_vm13 = vcmask 572416  }
 0x18a   : > { %v1131_v37 = vpop.permute.xlu0 %1130  ;;  %v1579_v38 = vrot.slane %v1573_v35, 4  ;;  %v4757_v59 = vcombine.high %v1199_v25, %v1202_v34  ;;  %v4756_v39 = vcombine.low %v1199_v25, %v1202_v34 }
 0x18b   : > { %3014 = vrot.lane.b32.xlu1 %v6051_v19, %s5449_s17  ;;  %v1138_v29 = vrot.slane %v1131_v37, 4  ;;  %s6640_s17 = smov 106  }
 0x18c   : > { %2094 = vrot.lane.b32.xlu0 %v6051_v19, %s5443_s20  ;;  %v1582_v41 = vsel %vm481_vm2, %v1578_v58, %v1579_v38  ;;  %v1585_v42 = vsel %vm1583_vm15, %v1573_v35, %v1579_v38  ;;  %4025 = vmatprep.subr.bf16.mxu0 %v4757_v59 }
 0x18d   : > { %v1584_v44 = vsel %vm1583_vm15, %v1571_v8, %v1582_v41  ;;  %1594 = vst [vmem:[#allocation3 + $0x3f8] sm:$0xf] %v1585_v42  ;;  %v1577_v20 = vpop.permute.xlu1 %1576  ;;  %4026 = vmatpush2.bf16.msra.mxu0 %v4756_v39 }
 0x18e   : > { %v1135_v45 = vpop.permute.xlu0 %1134  ;;  %v1581_v46 = vrot.slane %v1577_v20, 4 }
 0x18f   : > { %2092 = vrot.lane.b32.xlu1 %v6065_v27, %s5443_s20  ;;  %v1140_v9 = vrot.slane %v1135_v45, 4 }
 0x190   : > { %2954 = vrot.lane.b32.xlu0 %v6039_v17, %s5451_s29  ;;  %v1586_v47 = vsel %vm481_vm2, %v1580_v40, %v1581_v46  ;;  %v1588_v48 = vsel %vm1583_vm15, %v1577_v20, %v1581_v46 }
 0x191   : > { %v1587_v49 = vsel %vm1583_vm15, %v1575_v50, %v1586_v47  ;;  %1596 = vst [vmem:[#allocation3 + $0x410] sm:$0xf] %v1588_v48  ;;  %v1133_v51 = vpop.permute.xlu1 %1132 }
 0x192   : > { %v1516_v52 = vpop.permute.xlu0 %1515  ;;  %v1139_v53 = vrot.slane %v1133_v51, 4  ;;  %v4799_v55 = vcombine.high %v1584_v44, %v1587_v49  ;;  %v4798_v56 = vcombine.low %v1584_v44, %v1587_v49 }
 0x193   : > { %2096 = vrot.lane.b32.xlu1 %v6051_v19, %s5443_s20  ;;  %v1523_v4 = vrot.slane %v1516_v52, 4  ;;  %s6636_s20 = smov 89  }
 0x194   : > { %2958 = vrot.lane.b32.xlu0 %v6051_v19, %s5451_s29  ;;  %v1142_v57 = vsel %vm481_vm2, %v1138_v29, %v1139_v53  ;;  %v1145_v60 = vsel %vm6611_vm0, %v1133_v51, %v1139_v53  ;;  %4052 = vmatprep.subr.bf16.mxu1 %v4799_v55 }
 0x195   : > { %v1144_v16 = vsel %vm6611_vm0, %v1131_v37, %v1142_v57  ;;  %1154 = vst [vmem:[#allocation3 + $0x278] sm:$0xf] %v1145_v60  ;;  %v1137_v61 = vpop.permute.xlu1 %1136  ;;  %4053 = vmatpush1.bf16.msra.mxu1 %v4798_v56 }
 0x196   : > { %v1520_v54 = vpop.permute.xlu0 %1519  ;;  %v1141_v62 = vrot.slane %v1137_v61, 4 }
 0x197   : > { %2956 = vrot.lane.b32.xlu1 %v6065_v27, %s5451_s29  ;;  %v1525_v7 = vrot.slane %v1520_v54, 4 }
 0x198   : > { %2036 = vrot.lane.b32.xlu0 %v6039_v17, %s5444_s23  ;;  %v1146_v63 = vsel %vm481_vm2, %v1140_v9, %v1141_v62  ;;  %v1148_v1 = vsel %vm6611_vm0, %v1137_v61, %v1141_v62 }
 0x199   : > { %v1147_v36 = vsel %vm6611_vm0, %v1135_v45, %v1146_v63  ;;  %1156 = vst [vmem:[#allocation3 + $0x290] sm:$0xf] %v1148_v1  ;;  %v1518_v0 = vpop.permute.xlu1 %1517  ;;  %vm6613_vm0 = vcmask 736256  }
 0x19a   : > { %v1076_v3 = vpop.permute.xlu0 %1075  ;;  %v1524_v5 = vrot.slane %v1518_v0, 4  ;;  %v4751_v15 = vcombine.high %v1144_v16, %v1147_v36  ;;  %v4750_v6 = vcombine.low %v1144_v16, %v1147_v36 }
 0x19b   : > { %2960 = vrot.lane.b32.xlu1 %v6051_v19, %s5451_s29  ;;  %v1083_v26 = vrot.slane %v1076_v3, 4 }
 0x19c   : > { %2040 = vrot.lane.b32.xlu0 %v6051_v19, %s5444_s23  ;;  %v1527_v22 = vsel %vm481_vm2, %v1523_v4, %v1524_v5  ;;  %v1530_v8 = vsel %vm1528_vm1, %v1518_v0, %v1524_v5  ;;  %4027 = vmatprep.subr.bf16.mxu0 %v4751_v15 }
 0x19d   : > { %v1529_v10 = vsel %vm1528_vm1, %v1516_v52, %v1527_v22  ;;  %1539 = vst [vmem:[#allocation3 + $0x3c8] sm:$0xf] %v1530_v8  ;;  %v1522_v11 = vpop.permute.xlu1 %1521  ;;  %4028 = vmatpush2.bf16.msra.mxu0 %v4750_v6 }
 0x19e   : > { %v1080_v12 = vpop.permute.xlu0 %1079  ;;  %v1526_v13 = vrot.slane %v1522_v11, 4 }
 0x19f   : > { %2038 = vrot.lane.b32.xlu1 %v6065_v27, %s5444_s23  ;;  %v1085_v33 = vrot.slane %v1080_v12, 4 }
 0x1a0   : > { %2900 = vrot.lane.b32.xlu0 %v6039_v17, %s5453_s27  ;;  %v1531_v14 = vsel %vm481_vm2, %v1525_v7, %v1526_v13  ;;  %v1533_v21 = vsel %vm1528_vm1, %v1522_v11, %v1526_v13 }
 0x1a1   : > { %v1532_v23 = vsel %vm1528_vm1, %v1520_v54, %v1531_v14  ;;  %1541 = vst [vmem:[#allocation3 + $0x3e0] sm:$0xf] %v1533_v21  ;;  %v1078_v24 = vpop.permute.xlu1 %1077 }
 0x1a2   : > { %v1461_v25 = vpop.permute.xlu0 %1460  ;;  %v1084_v50 = vrot.slane %v1078_v24, 4  ;;  %v4793_v30 = vcombine.high %v1529_v10, %v1532_v23  ;;  %v4792_v32 = vcombine.low %v1529_v10, %v1532_v23 }
 0x1a3   : > { %2042 = vrot.lane.b32.xlu1 %v6051_v19, %s5444_s23  ;;  %v1468_v20 = vrot.slane %v1461_v25, 4 }
 0x1a4   : > { %2904 = vrot.lane.b32.xlu0 %v6051_v19, %s5453_s27  ;;  %v1087_v34 = vsel %vm481_vm2, %v1083_v26, %v1084_v50  ;;  %v1090_v35 = vsel %vm6613_vm0, %v1078_v24, %v1084_v50  ;;  %4054 = vmatprep.subr.bf16.mxu1 %v4793_v30 }
 0x1a5   : > { %v1089_v37 = vsel %vm6613_vm0, %v1076_v3, %v1087_v34  ;;  %1099 = vst [vmem:[#allocation3 + $0x248] sm:$0xf] %v1090_v35  ;;  %v1082_v58 = vpop.permute.xlu1 %1081  ;;  %4055 = vmatpush1.bf16.msra.mxu1 %v4792_v32 }
 0x1a6   : > { %v1465_v38 = vpop.permute.xlu0 %1464  ;;  %v1086_v59 = vrot.slane %v1082_v58, 4 }
 0x1a7   : > { %2902 = vrot.lane.b32.xlu1 %v6065_v27, %s5453_s27  ;;  %v1470_v48 = vrot.slane %v1465_v38, 4 }
 0x1a8   : > { %1982 = vrot.lane.b32.xlu0 %v6039_v17, %s5445_s25  ;;  %v1091_v39 = vsel %vm481_vm2, %v1085_v33, %v1086_v59  ;;  %v1093_v40 = vsel %vm6613_vm0, %v1082_v58, %v1086_v59 }
 0x1a9   : > { %v1092_v41 = vsel %vm6613_vm0, %v1080_v12, %v1091_v39  ;;  %1101 = vst [vmem:[#allocation3 + $0x260] sm:$0xf] %v1093_v40  ;;  %v1463_v42 = vpop.permute.xlu1 %1462  ;;  %vm6615_vm0 = vcmask 744448  }
 0x1aa   : > { %v1021_v44 = vpop.permute.xlu0 %1020  ;;  %v1469_v45 = vrot.slane %v1463_v42, 4  ;;  %v4745_v46 = vcombine.high %v1089_v37, %v1092_v41  ;;  %v4744_v47 = vcombine.low %v1089_v37, %v1092_v41 }
 0x1ab   : > { %2906 = vrot.lane.b32.xlu1 %v6051_v19, %s5453_s27  ;;  %v1028_v61 = vrot.slane %v1021_v44, 4 }
 0x1ac   : > { %1986 = vrot.lane.b32.xlu0 %v6051_v19, %s5445_s25  ;;  %v1472_v49 = vsel %vm481_vm2, %v1468_v20, %v1469_v45  ;;  %v1475_v51 = vsel %vm1473_vm13, %v1463_v42, %v1469_v45  ;;  %4029 = vmatprep.subr.bf16.mxu0 %v4745_v46  ;;  %v6152_v19 = vpack.c.bf16 %v6015_v2, %v6015_v2 }
 0x1ad   : > { %v1474_v52 = vsel %vm1473_vm13, %v1461_v25, %v1472_v49  ;;  %1484 = vst [vmem:[#allocation3 + $0x398] sm:$0xf] %v1475_v51  ;;  %v1467_v29 = vpop.permute.xlu1 %1466  ;;  %4030 = vmatpush2.bf16.msra.mxu0 %v4744_v47 }
 0x1ae   : > { %v1025_v53 = vpop.permute.xlu0 %1024  ;;  %v1471_v55 = vrot.slane %v1467_v29, 4 }
 0x1af   : > { %1984 = vrot.lane.b32.xlu1 %v6065_v27, %s5445_s25  ;;  %v1030_v1 = vrot.slane %v1025_v53, 4 }
 0x1b0   : > { %2846 = vrot.lane.b32.xlu0 %v6039_v17, %s5455_s4  ;;  %v1476_v56 = vsel %vm481_vm2, %v1470_v48, %v1471_v55  ;;  %v1478_v9 = vsel %vm1473_vm13, %v1467_v29, %v1471_v55 }
 0x1b1   : > { %v1477_v57 = vsel %vm1473_vm13, %v1465_v38, %v1476_v56  ;;  %1486 = vst [vmem:[#allocation3 + $0x3b0] sm:$0xf] %v1478_v9  ;;  %v1023_v60 = vpop.permute.xlu1 %1022 }
 0x1b2   : > { %v1406_v16 = vpop.permute.xlu0 %1405  ;;  %v1029_v54 = vrot.slane %v1023_v60, 4  ;;  %v4787_v62 = vcombine.high %v1474_v52, %v1477_v57  ;;  %v4786_v63 = vcombine.low %v1474_v52, %v1477_v57 }
 0x1b3   : > { %1988 = vrot.lane.b32.xlu1 %v6152_v19, %s5445_s25  ;;  %v1413_v11 = vrot.slane %v1406_v16, 4  ;;  %s6637_s25 = smov 90  }
 0x1b4   : > { %2850 = vrot.lane.b32.xlu0 %v6152_v19, %s5455_s4  ;;  %v1032_v36 = vsel %vm481_vm2, %v1028_v61, %v1029_v54  ;;  %v1035_v0 = vsel %vm6615_vm0, %v1023_v60, %v1029_v54  ;;  %4056 = vmatprep.subr.bf16.mxu1 %v4787_v62 }
 0x1b5   : > { %v1034_v3 = vsel %vm6615_vm0, %v1021_v44, %v1032_v36  ;;  %1044 = vst [vmem:[#allocation3 + $0x218] sm:$0xf] %v1035_v0  ;;  %v1027_v4 = vpop.permute.xlu1 %1026  ;;  %4057 = vmatpush1.bf16.msra.mxu1 %v4786_v63 }
 0x1b6   : > { %v1410_v5 = vpop.permute.xlu0 %1409  ;;  %v1031_v15 = vrot.slane %v1027_v4, 4 }
 0x1b7   : > { %2848 = vrot.lane.b32.xlu1 %v6065_v27, %s5455_s4  ;;  %v1415_v21 = vrot.slane %v1410_v5, 4 }
 0x1b8   : > { %1928 = vrot.lane.b32.xlu0 %v6039_v17, %s5446_s28  ;;  %v1036_v6 = vsel %vm481_vm2, %v1030_v1, %v1031_v15  ;;  %v1038_v7 = vsel %vm6615_vm0, %v1027_v4, %v1031_v15 }
 0x1b9   : > { %v1037_v22 = vsel %vm6615_vm0, %v1025_v53, %v1036_v6  ;;  %1046 = vst [vmem:[#allocation3 + $0x230] sm:$0xf] %v1038_v7  ;;  %v1408_v8 = vpop.permute.xlu1 %1407  ;;  %vm6617_vm0 = vcmask 752640  }
 0x1ba   : > { %v966_v10 = vpop.permute.xlu0 %965  ;;  %v1414_v12 = vrot.slane %v1408_v8, 4  ;;  %v4739_v13 = vcombine.high %v1034_v3, %v1037_v22  ;;  %v4738_v14 = vcombine.low %v1034_v3, %v1037_v22 }
 0x1bb   : > { %2852 = vrot.lane.b32.xlu1 %v6152_v19, %s5455_s4  ;;  %v973_v58 = vrot.slane %v966_v10, 4 }
 0x1bc   : > { %1932 = vrot.lane.b32.xlu0 %v6152_v19, %s5446_s28  ;;  %v1417_v23 = vsel %vm481_vm2, %v1413_v11, %v1414_v12  ;;  %v1420_v24 = vsel %vm1418_vm11, %v1408_v8, %v1414_v12  ;;  %4031 = vmatprep.subr.bf16.mxu0 %v4739_v13 }
 0x1bd   : > { %v1419_v25 = vsel %vm1418_vm11, %v1406_v16, %v1417_v23  ;;  %1429 = vst [vmem:[#allocation3 + $0x368] sm:$0xf] %v1420_v24  ;;  %v1412_v26 = vpop.permute.xlu1 %1411  ;;  %4032 = vmatpush2.bf16.msra.mxu0 %v4738_v14 }
 0x1be   : > { %v970_v50 = vpop.permute.xlu0 %969  ;;  %v1416_v30 = vrot.slane %v1412_v26, 4 }
 0x1bf   : > { %1930 = vrot.lane.b32.xlu1 %v6065_v27, %s5446_s28  ;;  %v975_v40 = vrot.slane %v970_v50, 4 }
 0x1c0   : > { %2792 = vrot.lane.b32.xlu0 %v6039_v17, %s5457_s6  ;;  %v1421_v32 = vsel %vm481_vm2, %v1415_v21, %v1416_v30  ;;  %v1423_v33 = vsel %vm1418_vm11, %v1412_v26, %v1416_v30 }
 0x1c1   : > { %v1422_v34 = vsel %vm1418_vm11, %v1410_v5, %v1421_v32  ;;  %1431 = vst [vmem:[#allocation3 + $0x380] sm:$0xf] %v1423_v33  ;;  %v968_v35 = vpop.permute.xlu1 %967 }
 0x1c2   : > { %v1351_v37 = vpop.permute.xlu0 %1350  ;;  %v974_v38 = vrot.slane %v968_v35, 4  ;;  %v4781_v59 = vcombine.high %v1419_v25, %v1422_v34  ;;  %v4780_v39 = vcombine.low %v1419_v25, %v1422_v34 }
 0x1c3   : > { %1934 = vrot.lane.b32.xlu1 %v6152_v19, %s5446_s28  ;;  %v1358_v29 = vrot.slane %v1351_v37, 4  ;;  %s6638_s28 = smov 91  }
 0x1c4   : > { %2796 = vrot.lane.b32.xlu0 %v6152_v19, %s5457_s6  ;;  %v977_v41 = vsel %vm481_vm2, %v973_v58, %v974_v38  ;;  %v980_v42 = vsel %vm6617_vm0, %v968_v35, %v974_v38  ;;  %4058 = vmatprep.subr.bf16.mxu1 %v4781_v59 }
 0x1c5   : > { %v979_v44 = vsel %vm6617_vm0, %v966_v10, %v977_v41  ;;  %989 = vst [vmem:[#allocation3 + $0x1e8] sm:$0xf] %v980_v42  ;;  %v972_v20 = vpop.permute.xlu1 %971  ;;  %4059 = vmatpush1.bf16.msra.mxu1 %v4780_v39 }
 0x1c6   : > { %v1355_v45 = vpop.permute.xlu0 %1354  ;;  %v976_v46 = vrot.slane %v972_v20, 4 }
 0x1c7   : > { %2794 = vrot.lane.b32.xlu1 %v6065_v27, %s5457_s6  ;;  %v1360_v9 = vrot.slane %v1355_v45, 4 }
 0x1c8   : > { %1874 = vrot.lane.b32.xlu0 %v6039_v17, %s5447_s7  ;;  %v981_v47 = vsel %vm481_vm2, %v975_v40, %v976_v46  ;;  %v983_v48 = vsel %vm6617_vm0, %v972_v20, %v976_v46  ;;  %v2602_v46 = vld [vmem:[#allocation2 + $0x40] sm:$0xff] }
 0x1c9   : > { %v982_v49 = vsel %vm6617_vm0, %v970_v50, %v981_v47  ;;  %991 = vst [vmem:[#allocation3 + $0x200] sm:$0xf] %v983_v48  ;;  %v1353_v51 = vpop.permute.xlu1 %1352  ;;  %vm6619_vm0 = vcmask 867328   ;;  %v2603_v47 = vld [vmem:[#allocation2 + $0x48] sm:$0xff] }
 0x1ca   : > { %v911_v52 = vpop.permute.xlu0 %910  ;;  %v1359_v53 = vrot.slane %v1353_v51, 4  ;;  %v4733_v55 = vcombine.high %v979_v44, %v982_v49  ;;  %v4732_v56 = vcombine.low %v979_v44, %v982_v49 }
 0x1cb   : > { %2798 = vrot.lane.b32.xlu1 %v6152_v19, %s5457_s6  ;;  %v918_v4 = vrot.slane %v911_v52, 4 }
 0x1cc   : > { %1878 = vrot.lane.b32.xlu0 %v6152_v19, %s5447_s7  ;;  %v1362_v57 = vsel %vm481_vm2, %v1358_v29, %v1359_v53  ;;  %v1365_v60 = vsel %vm6618_vm9, %v1353_v51, %v1359_v53  ;;  %4033 = vmatprep.subr.bf16.mxu0 %v4733_v55 }
 0x1cd   : > { %v1364_v16 = vsel %vm6618_vm9, %v1351_v37, %v1362_v57  ;;  %1374 = vst [vmem:[#allocation3 + $0x338] sm:$0xf] %v1365_v60  ;;  %v1357_v61 = vpop.permute.xlu1 %1356  ;;  %4034 = vmatpush2.bf16.msra.mxu0 %v4732_v56  ;;  %v6248_v56 = vpack.c.bf16 %v2603_v47, %v2602_v46 }
 0x1ce   : > { %v915_v54 = vpop.permute.xlu0 %914  ;;  %v1361_v62 = vrot.slane %v1357_v61, 4 }
 0x1cf   : > { %1876 = vrot.lane.b32.xlu1 %v6065_v27, %s5447_s7  ;;  %v920_v7 = vrot.slane %v915_v54, 4 }
 0x1d0   : > { %2738 = vrot.lane.b32.xlu0 %v6039_v17, %s5459_s19  ;;  %v1366_v63 = vsel %vm481_vm2, %v1360_v9, %v1361_v62  ;;  %v1368_v1 = vsel %vm6618_vm9, %v1357_v61, %v1361_v62 }
 0x1d1   : > { %v1367_v36 = vsel %vm6618_vm9, %v1355_v45, %v1366_v63  ;;  %1376 = vst [vmem:[#allocation3 + $0x350] sm:$0xf] %v1368_v1  ;;  %v913_v0 = vpop.permute.xlu1 %912  ;;  %vm6620_vm9 = vcmask 596992   ;;  %v2604_v1 = vld [vmem:[#allocation2 + $0x50] sm:$0xff] }
 0x1d2   : > { %v1296_v3 = vpop.permute.xlu0 %1295  ;;  %v919_v5 = vrot.slane %v913_v0, 4  ;;  %v4775_v15 = vcombine.high %v1364_v16, %v1367_v36  ;;  %v4774_v6 = vcombine.low %v1364_v16, %v1367_v36 }
 0x1d3   : > { %1880 = vrot.lane.b32.xlu1 %v6152_v19, %s5447_s7  ;;  %v1303_v26 = vrot.slane %v1296_v3, 4  ;;  %s6639_s7 = smov 92  }
 0x1d4   : > { %2742 = vrot.lane.b32.xlu0 %v6152_v19, %s5459_s19  ;;  %v922_v22 = vsel %vm481_vm2, %v918_v4, %v919_v5  ;;  %v925_v8 = vsel %vm6619_vm0, %v913_v0, %v919_v5  ;;  %4060 = vmatprep.subr.bf16.mxu1 %v4775_v15  ;;  %v6265_v5 = vcombine.low %v6069_v28, %v6069_v28 }
 0x1d5   : > { %v924_v10 = vsel %vm6619_vm0, %v911_v52, %v922_v22  ;;  %934 = vst [vmem:[#allocation3 + $0x1b8] sm:$0xf] %v925_v8  ;;  %v917_v11 = vpop.permute.xlu1 %916  ;;  %4061 = vmatpush1.bf16.msra.mxu1 %v4774_v6  ;;  %v6269_v22 = vpack.c.bf16 %v6015_v2, %v2604_v1 }
 0x1d6   : > { %v1300_v12 = vpop.permute.xlu0 %1299  ;;  %v921_v13 = vrot.slane %v917_v11, 4 }
 0x1d7   : > { %2740 = vrot.lane.b32.xlu1 %v6065_v27, %s5459_s19  ;;  %v1305_v33 = vrot.slane %v1300_v12, 4 }
 0x1d8   : > { %1820 = vrot.lane.b32.xlu0 %v6039_v17, %s5448_s16  ;;  %v926_v14 = vsel %vm481_vm2, %v920_v7, %v921_v13  ;;  %v928_v21 = vsel %vm6619_vm0, %v917_v11, %v921_v13 }
 0x1d9   : > { %v927_v23 = vsel %vm6619_vm0, %v915_v54, %v926_v14  ;;  %936 = vst [vmem:[#allocation3 + $0x1d0] sm:$0xf] %v928_v21  ;;  %v1298_v24 = vpop.permute.xlu1 %1297  ;;  %vm868_vm0 = vcmask 875520  }
 0x1da   : > { %v856_v25 = vpop.permute.xlu0 %855  ;;  %v1304_v50 = vrot.slane %v1298_v24, 4  ;;  %v4727_v30 = vcombine.high %v924_v10, %v927_v23  ;;  %v4726_v32 = vcombine.low %v924_v10, %v927_v23 }
 0x1db   : > { %2744 = vrot.lane.b32.xlu1 %v6152_v19, %s5459_s19  ;;  %v863_v20 = vrot.slane %v856_v25, 4 }
 0x1dc   : > { %1824 = vrot.lane.b32.xlu0 %v6152_v19, %s5448_s16  ;;  %v1307_v34 = vsel %vm481_vm2, %v1303_v26, %v1304_v50  ;;  %v1310_v35 = vsel %vm6620_vm9, %v1298_v24, %v1304_v50  ;;  %4035 = vmatprep.subr.bf16.mxu0 %v4727_v30  ;;  %v6289_v50 = vcombine.low %v6049_v43, %v6049_v43 }
 0x1dd   : > { %v1309_v37 = vsel %vm6620_vm9, %v1296_v3, %v1307_v34  ;;  %1319 = vst [vmem:[#allocation3 + $0x308] sm:$0xf] %v1310_v35  ;;  %v1302_v58 = vpop.permute.xlu1 %1301  ;;  %4036 = vmatpush2.bf16.msra.mxu0 %v4726_v32 }
 0x1de   : > { %v860_v38 = vpop.permute.xlu0 %859  ;;  %v1306_v59 = vrot.slane %v1302_v58, 4 }
 0x1df   : > { %1822 = vrot.lane.b32.xlu1 %v6065_v27, %s5448_s16 }
 0x1e0   : > { %2684 = vrot.lane.b32.xlu0 %v6039_v17, %s5461_s8  ;;  %v1311_v39 = vsel %vm481_vm2, %v1305_v33, %v1306_v59  ;;  %v1313_v40 = vsel %vm6620_vm9, %v1302_v58, %v1306_v59  ;;  %v865_v17 = vrot.slane %v860_v38, 4 }
 0x1e1   : > { %v1312_v41 = vsel %vm6620_vm9, %v1300_v12, %v1311_v39  ;;  %1321 = vst [vmem:[#allocation3 + $0x320] sm:$0xf] %v1313_v40  ;;  %v858_v42 = vpop.permute.xlu1 %857  ;;  %vm1748_vm9 = vcmask 424960  }
 0x1e2   : > { %v1736_v44 = vpop.permute.xlu0 %1735  ;;  %v864_v45 = vrot.slane %v858_v42, 4  ;;  %v4769_v48 = vcombine.high %v1309_v37, %v1312_v41  ;;  %v4768_v49 = vcombine.low %v1309_v37, %v1312_v41 }
 0x1e3   : > { %1826 = vrot.lane.b32.xlu1 %v6152_v19, %s5448_s16  ;;  %v1743_v62 = vrot.slane %v1736_v44, 4 }
 0x1e4   : > { %2688 = vrot.lane.b32.xlu0 %v6152_v19, %s5461_s8  ;;  %v867_v51 = vsel %vm481_vm2, %v863_v20, %v864_v45  ;;  %v870_v52 = vsel %vm868_vm0, %v858_v42, %v864_v45  ;;  %4062 = vmatprep.subr.bf16.mxu1 %v4769_v48 }
 0x1e5   : > { %v869_v29 = vsel %vm868_vm0, %v856_v25, %v867_v51  ;;  %879 = vst [vmem:[#allocation3 + $0x188] sm:$0xf] %v870_v52  ;;  %v862_v53 = vpop.permute.xlu1 %861  ;;  %4063 = vmatpush1.bf16.msra.mxu1 %v4768_v49  ;;  %v5140_v52 = vld [vmem:[#allocation3 + $0x158] ss:$24 sps:$4 sm:$0xff]  }
 0x1e6   : > { %v1740_v55 = vpop.permute.xlu0 %1739  ;;  %v866_v9 = vrot.slane %v862_v53, 4 }
 0x1e7   : > { %2686 = vrot.lane.b32.xlu1 %v6065_v27, %s5461_s8  ;;  %v1745_v27 = vrot.slane %v1740_v55, 4 }
 0x1e8   : > { %2630 = vrot.lane.b32.xlu0 %v6248_v56, %s5463_s5  ;;  %v871_v57 = vsel %vm481_vm2, %v865_v17, %v866_v9  ;;  %v873_v60 = vsel %vm868_vm0, %v862_v53, %v866_v9 }
 0x1e9   : > { %v872_v16 = vsel %vm868_vm0, %v860_v38, %v871_v57  ;;  %881 = vst [vmem:[#allocation3 + $0x1a0] sm:$0xf] %v873_v60  ;;  %v1738_v61 = vpop.permute.xlu1 %1737 }
 0x1ea   : > { %v2145_v54 = vpop.permute.xlu0 %2144  ;;  %v1744_v63 = vrot.slane %v1738_v61, 4  ;;  %v4721_v36 = vcombine.high %v869_v29, %v872_v16  ;;  %v4720_v0 = vcombine.low %v869_v29, %v872_v16 }
 0x1eb   : > { %2690 = vrot.lane.b32.xlu1 %v6152_v19, %s5461_s8  ;;  %v2152_v13 = vrot.slane %v2145_v54, 4 }
 0x1ec   : > { %2634 = vrot.lane.b32.xlu0 %v6152_v19, %s5463_s5  ;;  %v1747_v3 = vsel %vm481_vm2, %v1743_v62, %v1744_v63  ;;  %v1750_v4 = vsel %vm1748_vm9, %v1738_v61, %v1744_v63  ;;  %4037 = vmatprep.subr.bf16.mxu0 %v4721_v36 }
 0x1ed   : > { %v1749_v15 = vsel %vm1748_vm9, %v1736_v44, %v1747_v3  ;;  %1759 = vst [vmem:[#allocation3 + $0x488] sm:$0xf] %v1750_v4  ;;  %v1742_v6 = vpop.permute.xlu1 %1741  ;;  %4038 = vmatpush2.bf16.msra.mxu0 %v4720_v0  ;;  %v5146_v3 = vld [vmem:[#allocation3 + $0x458] ss:$24 sps:$4 sm:$0xff]  }
 0x1ee   : > { %v2149_v7 = vpop.permute.xlu0 %2148  ;;  %v1746_v8 = vrot.slane %v1742_v6, 4 }
 0x1ef   : > { %2632 = vrot.lane.b32.xlu1 %v6269_v22, %s5463_s5  ;;  %v2154_v24 = vrot.slane %v2149_v7, 4 }
 0x1f0   : > { %2576 = vrot.lane.b32.xlu0 %v6248_v56, %s5450_s26  ;;  %v1751_v10 = vsel %vm481_vm2, %v1745_v27, %v1746_v8  ;;  %v1753_v28 = vsel %vm1748_vm9, %v1742_v6, %v1746_v8  ;;  %4040 = vmatmul.mubr.bf16.vlgmr.msra.gmra.mxu0 %v6265_v5 }
 0x1f1   : > { %v1752_v11 = vsel %vm1748_vm9, %v1740_v55, %v1751_v10  ;;  %1761 = vst [vmem:[#allocation3 + $0x4a0] sm:$0xf] %v1753_v28  ;;  %v2147_v12 = vpop.permute.xlu1 %2146  ;;  %4823 = vmatprep.mubr.msk.bf16.mxu0 %vm4003_vm14, %v6059_v18 }
 0x1f2   : > { %v3009_v2 = vpop.permute.xlu0 %3008  ;;  %v2153_v14 = vrot.slane %v2147_v12, 4  ;;  %v4817_v21 = vcombine.high %v1749_v15, %v1752_v11  ;;  %v4816_v23 = vcombine.low %v1749_v15, %v1752_v11 }
 0x1f3   : > { %2636 = vrot.lane.b32.xlu1 %v6152_v19, %s5463_s5  ;;  %v3016_v59 = vrot.slane %v3009_v2, 4  ;;  %s5466_s5 = smov [#allocation9]  }
 0x1f4   : > { %2580 = vrot.lane.b32.xlu0 %v6152_v19, %s5450_s26  ;;  %v2156_v25 = vsel %vm481_vm2, %v2152_v13, %v2153_v14  ;;  %v2158_v26 = vsel %vm813_vm3, %v2147_v12, %v2153_v14  ;;  %4078 = vmatprep.subr.bf16.mxu1 %v4817_v21  ;;  %s5354_s6 = sshll.u32 %s5466_s5, 4  ;;  %s5355_s6 = int_to_ptr.vmem [resolvable:$false] %s5354_s6 }
 0x1f5   : > { %v2157_v30 = vsel %vm813_vm3, %v2145_v54, %v2156_v25  ;;  %2167 = vst [vmem:[#allocation3 + $0x164] sm:$0xf] %v2158_v26  ;;  %v2151_v32 = vpop.permute.xlu1 %2150  ;;  %4079 = vmatpush2.bf16.msra.mxu1 %v4816_v23  ;;  %v5149_v25 = vld [vmem:[#allocation3 + $0x128] ss:$24 sps:$4 sm:$0xff]   ;;  %s5356_s8 = scalar_lea.vmem %s5355_s6, 1024 }
 0x1f6   : > { %v3013_v33 = vpop.permute.xlu0 %3012  ;;  %2166 = vst [vmem:[#allocation3 + $0x15c] sm:$0xff] %v2157_v30  ;;  %v2155_v34 = vrot.slane %v2151_v32, 4 }
 0x1f7   : > { %2578 = vrot.lane.b32.xlu1 %v6269_v22, %s5450_s26  ;;  %v3018_v40 = vrot.slane %v3013_v33, 4 }
 0x1f8   : > { %3062 = vrot.lane.b32.xlu0 %v6248_v56, %s5465_s30  ;;  %v2159_v35 = vsel %vm481_vm2, %v2154_v24, %v2155_v34  ;;  %v2161_v37 = vsel %vm813_vm3, %v2151_v32, %v2155_v34  ;;  %4081 = vmatmul.mubr.bf16.vlgmr.msra.gmra.mxu1 %v6289_v50 }
 0x1f9   : > { %v2160_v43 = vsel %vm813_vm3, %v2149_v7, %v2159_v35  ;;  %2169 = vst [vmem:[#allocation3 + $0x17c] sm:$0xf] %v2161_v37  ;;  %v3011_v58 = vpop.permute.xlu1 %3010  ;;  %4121 = vmatprep.mubr.bf16.mxu1 %v6073_v31  ;;  %vm6641_vm3 = vcmask 1039360  }
 0x1fa   : > { %v2091_v38 = vpop.permute.xlu0 %2090  ;;  %2168 = vst [vmem:[#allocation3 + $0x174] sm:$0xff] %v2160_v43  ;;  %v3017_v39 = vrot.slane %v3011_v58, 4 }
 0x1fb   : > { %2582 = vrot.lane.b32.xlu1 %v6152_v19, %s5450_s26  ;;  %v2098_v53 = vrot.slane %v2091_v38, 4 }
 0x1fc   : > { %3066 = vrot.lane.b32.xlu0 %v6152_v19, %s5465_s30  ;;  %v3020_v41 = vsel %vm481_vm2, %v3016_v59, %v3017_v39  ;;  %v3022_v42 = vsel %vm1693_vm10, %v3011_v58, %v3017_v39 }
 0x1fd   : > { %v3021_v44 = vsel %vm1693_vm10, %v3009_v2, %v3020_v41  ;;  %3031 = vst [vmem:[#allocation3 + $0x464] sm:$0xf] %v3022_v42  ;;  %v3015_v20 = vpop.permute.xlu1 %3014  ;;  %v5152_v42 = vld [vmem:[#allocation3 + $0x428] ss:$24 sps:$4 sm:$0xff]  }
 0x1fe   : > { %v2095_v45 = vpop.permute.xlu0 %2094  ;;  %3030 = vst [vmem:[#allocation3 + $0x45c] sm:$0xff] %v3021_v44  ;;  %v3019_v46 = vrot.slane %v3015_v20, 4 }
 0x1ff   : > { %3064 = vrot.lane.b32.xlu1 %v6269_v22, %s5465_s30  ;;  %v2100_v9 = vrot.slane %v2095_v45, 4 }
 0x200   : > { %2522 = vrot.lane.b32.xlu0 %v6248_v56, %s6635_s24  ;;  %v3023_v47 = vsel %vm481_vm2, %v3018_v40, %v3019_v46  ;;  %v3025_v48 = vsel %vm1693_vm10, %v3015_v20, %v3019_v46  ;;  %v6357_v46 = vld [vmem:[#allocation3 + $0x24] sm:$0xff] }
 0x201   : > { %v3024_v49 = vsel %vm1693_vm10, %v3013_v33, %v3023_v47  ;;  %3033 = vst [vmem:[#allocation3 + $0x47c] sm:$0xf] %v3025_v48  ;;  %v2093_v17 = vpop.permute.xlu1 %2092  ;;  %v5142_v29 = vld [vmem:[#allocation3 + $0x15c] ss:$24 sps:$4 sm:$0xff]  }
 0x202   : > { %v2955_v51 = vpop.permute.xlu0 %2954  ;;  %3032 = vst [vmem:[#allocation3 + $0x474] sm:$0xff] %v3024_v49  ;;  %v2099_v55 = vrot.slane %v2093_v17, 4  ;;  %4089 = vmatprep.subr.bf16.mxu1 %v5142_v29 }
 0x203   : > { %3068 = vrot.lane.b32.xlu1 %v6152_v19, %s5465_s30  ;;  %4090 = vmatpush1.bf16.msra.mxu1 %v5140_v52  ;;  %v2962_v15 = vrot.slane %v2955_v51, 4  ;;  %s5036_s30 = sshll.u32 %s5505_s13, 9  ;;  %s4343_s13 = scalar_lea.sflag [#allocation6], %s5604_s14 }
 0x204   : > { %2526 = vrot.lane.b32.xlu0 %v6152_v19, %s6635_s24  ;;  %v2102_v57 = vsel %vm481_vm2, %v2098_v53, %v2099_v55  ;;  %v2104_v60 = vsel %vm758_vm4, %v2093_v17, %v2099_v55 }
 0x205   : > { %v2103_v16 = vsel %vm758_vm4, %v2091_v38, %v2102_v57  ;;  %2113 = vst [vmem:[#allocation3 + $0x134] sm:$0xf] %v2104_v60  ;;  %v2097_v61 = vpop.permute.xlu1 %2096 }
 0x206   : > { %v2959_v54 = vpop.permute.xlu0 %2958  ;;  %2112 = vst [vmem:[#allocation3 + $0x12c] sm:$0xff] %v2103_v16  ;;  %v2101_v62 = vrot.slane %v2097_v61, 4  ;;  %v5155_v16 = vld [vmem:[#allocation3 + $0xf8] ss:$24 sps:$4 sm:$0xff]  }
 0x207   : > { %2524 = vrot.lane.b32.xlu1 %v6269_v22, %s6635_s24  ;;  %v2964_v7 = vrot.slane %v2959_v54, 4 }
 0x208   : > { %2468 = vrot.lane.b32.xlu0 %v6248_v56, %s6636_s20  ;;  %v2105_v63 = vsel %vm481_vm2, %v2100_v9, %v2101_v62  ;;  %v2107_v1 = vsel %vm758_vm4, %v2097_v61, %v2101_v62 }
 0x209   : > { %v2106_v36 = vsel %vm758_vm4, %v2095_v45, %v2105_v63  ;;  %2115 = vst [vmem:[#allocation3 + $0x14c] sm:$0xf] %v2107_v1  ;;  %v2957_v0 = vpop.permute.xlu1 %2956  ;;  %v5148_v4 = vld [vmem:[#allocation3 + $0x45c] ss:$24 sps:$4 sm:$0xff]   ;;  %vm6642_vm4 = vmmov %vm6641_vm3 }
 0x20a   : > { %v2037_v27 = vpop.permute.xlu0 %2036  ;;  %2114 = vst [vmem:[#allocation3 + $0x144] sm:$0xff] %v2106_v36  ;;  %v2963_v6 = vrot.slane %v2957_v0, 4  ;;  %4130 = vmatprep.subr.bf16.mxu0 %v5148_v4 }
 0x20b   : > { %2528 = vrot.lane.b32.xlu1 %v6152_v19, %s6635_s24  ;;  %4131 = vmatpush1.bf16.msra.mxu0 %v5146_v3  ;;  %v2044_v30 = vrot.slane %v2037_v27, 4 }
 0x20c   : > { %2472 = vrot.lane.b32.xlu0 %v6152_v19, %s6636_s20  ;;  %v2966_v8 = vsel %vm481_vm2, %v2962_v15, %v2963_v6  ;;  %v2968_v10 = vsel %vm1638_vm12, %v2957_v0, %v2963_v6 }
 0x20d   : > { %v2967_v28 = vsel %vm1638_vm12, %v2955_v51, %v2966_v8  ;;  %2977 = vst [vmem:[#allocation3 + $0x434] sm:$0xf] %v2968_v10  ;;  %v2961_v11 = vpop.permute.xlu1 %2960 }
 0x20e   : > { %v2041_v12 = vpop.permute.xlu0 %2040  ;;  %2976 = vst [vmem:[#allocation3 + $0x42c] sm:$0xff] %v2967_v28  ;;  %v2965_v2 = vrot.slane %v2961_v11, 4  ;;  %v5158_v28 = vld [vmem:[#allocation3 + $0x3f8] ss:$24 sps:$4 sm:$0xff]  }
 0x20f   : > { %2470 = vrot.lane.b32.xlu1 %v6269_v22, %s6636_s20  ;;  %v2046_v33 = vrot.slane %v2041_v12, 4 }
 0x210   : > { %2414 = vrot.lane.b32.xlu0 %v6248_v56, %s6637_s25  ;;  %v2969_v13 = vsel %vm481_vm2, %v2964_v7, %v2965_v2  ;;  %v2971_v14 = vsel %vm1638_vm12, %v2961_v11, %v2965_v2 }
 0x211   : > { %v2970_v21 = vsel %vm1638_vm12, %v2959_v54, %v2969_v13  ;;  %2979 = vst [vmem:[#allocation3 + $0x44c] sm:$0xf] %v2971_v14  ;;  %v2039_v23 = vpop.permute.xlu1 %2038  ;;  %v5151_v26 = vld [vmem:[#allocation3 + $0x12c] ss:$24 sps:$4 sm:$0xff]  }
 0x212   : > { %v2901_v24 = vpop.permute.xlu0 %2900  ;;  %2978 = vst [vmem:[#allocation3 + $0x444] sm:$0xff] %v2970_v21  ;;  %v2045_v32 = vrot.slane %v2039_v23, 4  ;;  %4091 = vmatprep.subr.bf16.mxu1 %v5151_v26 }
 0x213   : > { %2474 = vrot.lane.b32.xlu1 %v6152_v19, %s6636_s20  ;;  %4092 = vmatpush1.bf16.msra.mxu1 %v5149_v25  ;;  %v2908_v20 = vrot.slane %v2901_v24, 4 }
 0x214   : > { %2418 = vrot.lane.b32.xlu0 %v6152_v19, %s6637_s25  ;;  %v2048_v34 = vsel %vm481_vm2, %v2044_v30, %v2045_v32  ;;  %v2050_v35 = vsel %vm703_vm5, %v2039_v23, %v2045_v32 }
 0x215   : > { %v2049_v37 = vsel %vm703_vm5, %v2037_v27, %v2048_v34  ;;  %2059 = vst [vmem:[#allocation3 + $0x104] sm:$0xf] %v2050_v35  ;;  %v2043_v43 = vpop.permute.xlu1 %2042 }
 0x216   : > { %v2905_v58 = vpop.permute.xlu0 %2904  ;;  %2058 = vst [vmem:[#allocation3 + $0xfc] sm:$0xff] %v2049_v37  ;;  %v2047_v38 = vrot.slane %v2043_v43, 4  ;;  %v5161_v37 = vld [vmem:[#allocation3 + $0xc8] ss:$24 sps:$4 sm:$0xff]  }
 0x217   : > { %2416 = vrot.lane.b32.xlu1 %v6269_v22, %s6637_s25  ;;  %v2910_v47 = vrot.slane %v2905_v58, 4 }
 0x218   : > { %2360 = vrot.lane.b32.xlu0 %v6248_v56, %s6638_s28  ;;  %v2051_v19 = vsel %vm481_vm2, %v2046_v33, %v2047_v38  ;;  %v2053_v59 = vsel %vm703_vm5, %v2043_v43, %v2047_v38 }
 0x219   : > { %v2052_v39 = vsel %vm703_vm5, %v2041_v12, %v2051_v19  ;;  %2061 = vst [vmem:[#allocation3 + $0x11c] sm:$0xf] %v2053_v59  ;;  %v2903_v40 = vpop.permute.xlu1 %2902  ;;  %v5154_v44 = vld [vmem:[#allocation3 + $0x42c] ss:$24 sps:$4 sm:$0xff]  }
 0x21a   : > { %v1983_v41 = vpop.permute.xlu0 %1982  ;;  %2060 = vst [vmem:[#allocation3 + $0x114] sm:$0xff] %v2052_v39  ;;  %v2909_v45 = vrot.slane %v2903_v40, 4  ;;  %4132 = vmatprep.subr.bf16.mxu0 %v5154_v44 }
 0x21b   : > { %2420 = vrot.lane.b32.xlu1 %v6357_v46, %s6637_s25  ;;  %4133 = vmatpush1.bf16.msra.mxu0 %v5152_v42  ;;  %v1990_v54 = vrot.slane %v1983_v41, 4 }
 0x21c   : > { %2364 = vrot.lane.b32.xlu0 %v6357_v46, %s6638_s28  ;;  %v2912_v48 = vsel %vm481_vm2, %v2908_v20, %v2909_v45  ;;  %v2914_v49 = vsel %vm1583_vm15, %v2903_v40, %v2909_v45 }
 0x21d   : > { %v2913_v17 = vsel %vm1583_vm15, %v2901_v24, %v2912_v48  ;;  %2923 = vst [vmem:[#allocation3 + $0x404] sm:$0xf] %v2914_v49  ;;  %v2907_v51 = vpop.permute.xlu1 %2906  ;;  %v5164_v49 = vld [vmem:[#allocation3 + $0x3c8] ss:$24 sps:$4 sm:$0xff]  }
 0x21e   : > { %v1987_v52 = vpop.permute.xlu0 %1986  ;;  %2922 = vst [vmem:[#allocation3 + $0x3fc] sm:$0xff] %v2913_v17  ;;  %v2911_v29 = vrot.slane %v2907_v51, 4 }
 0x21f   : > { %2362 = vrot.lane.b32.xlu1 %v6269_v22, %s6638_s28  ;;  %v1992_v63 = vrot.slane %v1987_v52, 4 }
 0x220   : > { %2306 = vrot.lane.b32.xlu0 %v6248_v56, %s6639_s7  ;;  %v2915_v53 = vsel %vm481_vm2, %v2910_v47, %v2911_v29  ;;  %v2917_v55 = vsel %vm1583_vm15, %v2907_v51, %v2911_v29 }
 0x221   : > { %v2916_v9 = vsel %vm1583_vm15, %v2905_v58, %v2915_v53  ;;  %2925 = vst [vmem:[#allocation3 + $0x41c] sm:$0xf] %v2917_v55  ;;  %v1985_v57 = vpop.permute.xlu1 %1984  ;;  %v5157_v61 = vld [vmem:[#allocation3 + $0xfc] ss:$24 sps:$4 sm:$0xff]  }
 0x222   : > { %v2847_v60 = vpop.permute.xlu0 %2846  ;;  %2924 = vst [vmem:[#allocation3 + $0x414] sm:$0xff] %v2916_v9  ;;  %v1991_v62 = vrot.slane %v1985_v57, 4  ;;  %4093 = vmatprep.subr.bf16.mxu1 %v5157_v61 }
 0x223   : > { %2366 = vrot.lane.b32.xlu1 %v6357_v46, %s6638_s28  ;;  %4094 = vmatpush1.bf16.msra.mxu1 %v5155_v16  ;;  %v2854_v12 = vrot.slane %v2847_v60, 4 }
 0x224   : > { %2310 = vrot.lane.b32.xlu0 %v6357_v46, %s6639_s7  ;;  %v1994_v1 = vsel %vm481_vm2, %v1990_v54, %v1991_v62  ;;  %v1996_v36 = vsel %vm648_vm6, %v1985_v57, %v1991_v62 }
 0x225   : > { %v1995_v0 = vsel %vm648_vm6, %v1983_v41, %v1994_v1  ;;  %2005 = vst [vmem:[#allocation3 + $0xd4] sm:$0xf] %v1996_v36  ;;  %v1989_v27 = vpop.permute.xlu1 %1988 }
 0x226   : > { %v2851_v3 = vpop.permute.xlu0 %2850  ;;  %2004 = vst [vmem:[#allocation3 + $0xcc] sm:$0xff] %v1995_v0  ;;  %v1993_v4 = vrot.slane %v1989_v27, 4 }
 0x227   : > { %2308 = vrot.lane.b32.xlu1 %v6269_v22, %s6639_s7  ;;  %v2856_v13 = vrot.slane %v2851_v3, 4 }
 0x228   : > { %2252 = vrot.lane.b32.xlu0 %v6248_v56, %s6640_s17  ;;  %v1997_v15 = vsel %vm481_vm2, %v1992_v63, %v1993_v4  ;;  %v1999_v6 = vsel %vm648_vm6, %v1989_v27, %v1993_v4  ;;  %v5167_v63 = vld [vmem:[#allocation3 + $0x98] ss:$24 sps:$4 sm:$0xff]  }
 0x229   : > { %v1998_v7 = vsel %vm648_vm6, %v1987_v52, %v1997_v15  ;;  %2007 = vst [vmem:[#allocation3 + $0xec] sm:$0xf] %v1999_v6  ;;  %v2849_v8 = vpop.permute.xlu1 %2848  ;;  %v5160_v11 = vld [vmem:[#allocation3 + $0x3fc] ss:$24 sps:$4 sm:$0xff]   ;;  %vm6643_vm6 = vmmov %vm6641_vm3 }
 0x22a   : > { %v1929_v10 = vpop.permute.xlu0 %1928  ;;  %2006 = vst [vmem:[#allocation3 + $0xe4] sm:$0xff] %v1998_v7  ;;  %v2855_v2 = vrot.slane %v2849_v8, 4  ;;  %4134 = vmatprep.subr.bf16.mxu0 %v5160_v11 }
 0x22b   : > { %2312 = vrot.lane.b32.xlu1 %v6357_v46, %s6639_s7  ;;  %4135 = vmatpush1.bf16.msra.mxu0 %v5158_v28  ;;  %v1936_v58 = vrot.slane %v1929_v10, 4 }
 0x22c   : > { %2256 = vrot.lane.b32.xlu0 %v6357_v46, %s6640_s17  ;;  %v2858_v14 = vsel %vm481_vm2, %v2854_v12, %v2855_v2  ;;  %v2860_v21 = vsel %vm1528_vm1, %v2849_v8, %v2855_v2 }
 0x22d   : > { %v2859_v23 = vsel %vm1528_vm1, %v2847_v60, %v2858_v14  ;;  %2869 = vst [vmem:[#allocation3 + $0x3d4] sm:$0xf] %v2860_v21  ;;  %v2853_v24 = vpop.permute.xlu1 %2852 }
 0x22e   : > { %v1933_v25 = vpop.permute.xlu0 %1932  ;;  %2868 = vst [vmem:[#allocation3 + $0x3cc] sm:$0xff] %v2859_v23  ;;  %v2857_v26 = vrot.slane %v2853_v24, 4 }
 0x22f   : > { %2254 = vrot.lane.b32.xlu1 %v6269_v22, %s6640_s17  ;;  %v1938_v19 = vrot.slane %v1933_v25, 4 }
 0x230   : > { %2198 = vrot.lane.b32.xlu0 %v6248_v56, %s5464_s3  ;;  %v2861_v30 = vsel %vm481_vm2, %v2856_v13, %v2857_v26  ;;  %v2863_v32 = vsel %vm1528_vm1, %v2853_v24, %v2857_v26  ;;  %v5170_v13 = vld [vmem:[#allocation3 + $0x398] ss:$24 sps:$4 sm:$0xff]  }
 0x231   : > { %v2862_v33 = vsel %vm1528_vm1, %v2851_v3, %v2861_v30  ;;  %2871 = vst [vmem:[#allocation3 + $0x3ec] sm:$0xf] %v2863_v32  ;;  %v1931_v34 = vpop.permute.xlu1 %1930  ;;  %v5163_v43 = vld [vmem:[#allocation3 + $0xcc] ss:$24 sps:$4 sm:$0xff]  }
 0x232   : > { %v2793_v35 = vpop.permute.xlu0 %2792  ;;  %2870 = vst [vmem:[#allocation3 + $0x3e4] sm:$0xff] %v2862_v33  ;;  %v1937_v38 = vrot.slane %v1931_v34, 4  ;;  %4095 = vmatprep.subr.bf16.mxu1 %v5163_v43 }
 0x233   : > { %2258 = vrot.lane.b32.xlu1 %v6357_v46, %s6640_s17  ;;  %4096 = vmatpush1.bf16.msra.mxu1 %v5161_v37  ;;  %v2800_v51 = vrot.slane %v2793_v35, 4 }
 0x234   : > { %v1940_v56 = vsel %vm481_vm2, %v1936_v58, %v1937_v38  ;;  %v1942_v59 = vsel %vm593_vm7, %v1931_v34, %v1937_v38  ;;  %2202 = vrot.lane.b32.xlu0 %v6357_v46, %s5464_s3 }
 0x235   : > { %v1941_v39 = vsel %vm593_vm7, %v1929_v10, %v1940_v56  ;;  %1951 = vst [vmem:[#allocation3 + $0xa4] sm:$0xf] %v1942_v59  ;;  %v1935_v40 = vpop.permute.xlu1 %1934 }
 0x236   : > { %v2797_v41 = vpop.permute.xlu0 %2796  ;;  %1950 = vst [vmem:[#allocation3 + $0x9c] sm:$0xff] %v1941_v39  ;;  %v1939_v42 = vrot.slane %v1935_v40, 4 }
 0x237   : > { %2200 = vrot.lane.b32.xlu1 %v6269_v22, %s5464_s3  ;;  %v2802_v29 = vrot.slane %v2797_v41, 4 }
 0x238   : > { %v1943_v44 = vsel %vm481_vm2, %v1938_v19, %v1939_v42  ;;  %v1945_v20 = vsel %vm593_vm7, %v1935_v40, %v1939_v42  ;;  %v5173_v19 = vld [vmem:[#allocation3 + $0x68] ss:$24 sps:$4 sm:$0xff]  }
 0x239   : > { %v1944_v45 = vsel %vm593_vm7, %v1933_v25, %v1943_v44  ;;  %1953 = vst [vmem:[#allocation3 + $0xbc] sm:$0xf] %v1945_v20  ;;  %v2795_v47 = vpop.permute.xlu1 %2794  ;;  %v5166_v17 = vld [vmem:[#allocation3 + $0x3cc] ss:$24 sps:$4 sm:$0xff]   ;;  %vm6644_vm7 = vmmov %vm6641_vm3 }
 0x23a   : > { %v1875_v48 = vpop.permute.xlu0 %1874  ;;  %1952 = vst [vmem:[#allocation3 + $0xb4] sm:$0xff] %v1944_v45  ;;  %v2801_v52 = vrot.slane %v2795_v47, 4  ;;  %4136 = vmatprep.subr.bf16.mxu0 %v5166_v17 }
 0x23b   : > { %2204 = vrot.lane.b32.xlu1 %v6357_v46, %s5464_s3  ;;  %4137 = vmatpush1.bf16.msra.mxu0 %v5164_v49  ;;  %v1882_v36 = vrot.slane %v1875_v48, 4  ;;  %s6547_s3 = scalar_lea.hbm %s6592_s2, %s5036_s30 }
 0x23c   : > { %v2804_v22 = vsel %vm481_vm2, %v2800_v51, %v2801_v52  ;;  %v2806_v53 = vsel %vm1473_vm13, %v2795_v47, %v2801_v52 }
 0x23d   : > { %v2805_v55 = vsel %vm1473_vm13, %v2793_v35, %v2804_v22  ;;  %2815 = vst [vmem:[#allocation3 + $0x3a4] sm:$0xf] %v2806_v53  ;;  %v2799_v9 = vpop.permute.xlu1 %2798 }
 0x23e   : > { %v1879_v57 = vpop.permute.xlu0 %1878  ;;  %2814 = vst [vmem:[#allocation3 + $0x39c] sm:$0xff] %v2805_v55  ;;  %v2803_v60 = vrot.slane %v2799_v9, 4 }
 0x23f   : > { %v1884_v27 = vrot.slane %v1879_v57, 4 }
 0x240   : > { %v2807_v16 = vsel %vm481_vm2, %v2802_v29, %v2803_v60  ;;  %v2809_v61 = vsel %vm1473_vm13, %v2799_v9, %v2803_v60  ;;  %v5176_v29 = vld [vmem:[#allocation3 + $0x368] ss:$24 sps:$4 sm:$0xff]  }
 0x241   : > { %v2808_v46 = vsel %vm1473_vm13, %v2797_v41, %v2807_v16  ;;  %2817 = vst [vmem:[#allocation3 + $0x3bc] sm:$0xf] %v2809_v61  ;;  %v1877_v54 = vpop.permute.xlu1 %1876  ;;  %v5169_v1 = vld [vmem:[#allocation3 + $0x9c] ss:$24 sps:$4 sm:$0xff]   ;;  %vm6649_vm13 = vcmask 596992  }
 0x242   : > { %v2739_v62 = vpop.permute.xlu0 %2738  ;;  %2816 = vst [vmem:[#allocation3 + $0x3b4] sm:$0xff] %v2808_v46  ;;  %v1883_v0 = vrot.slane %v1877_v54, 4  ;;  %4097 = vmatprep.subr.bf16.mxu1 %v5169_v1  ;;  %vm6650_vm15 = vmmov %vm6649_vm13 }
 0x243   : > { %4098 = vmatpush1.bf16.msra.mxu1 %v5167_v63  ;;  %v2746_v21 = vrot.slane %v2739_v62, 4  ;;  %vm6651_vm1 = vmmov %vm6649_vm13 }
 0x244   : > { %v1886_v3 = vsel %vm481_vm2, %v1882_v36, %v1883_v0  ;;  %v1888_v4 = vsel %vm538_vm8, %v1877_v54, %v1883_v0 }
 0x245   : > { %v1887_v15 = vsel %vm538_vm8, %v1875_v48, %v1886_v3  ;;  %1897 = vst [vmem:[#allocation3 + $0x74] sm:$0xf] %v1888_v4  ;;  %v1881_v6 = vpop.permute.xlu1 %1880 }
 0x246   : > { %v2743_v7 = vpop.permute.xlu0 %2742  ;;  %1896 = vst [vmem:[#allocation3 + $0x6c] sm:$0xff] %v1887_v15  ;;  %v1885_v8 = vrot.slane %v1881_v6, 4 }
 0x247   : > { %v2748_v24 = vrot.slane %v2743_v7, 4 }
 0x248   : > { %v1889_v10 = vsel %vm481_vm2, %v1884_v27, %v1885_v8  ;;  %v1891_v28 = vsel %vm538_vm8, %v1881_v6, %v1885_v8  ;;  %v5179_v27 = vld [vmem:[#allocation3 + $0x38] ss:$24 sps:$4 sm:$0xff]   ;;  %v5184_v6 = vld [vmem:[#allocation3 + $0xc] ss:$24 sps:$4 sm:$0xff]  }
 0x249   : > { %v1890_v11 = vsel %vm538_vm8, %v1879_v57, %v1889_v10  ;;  %1899 = vst [vmem:[#allocation3 + $0x8c] sm:$0xf] %v1891_v28  ;;  %v2741_v12 = vpop.permute.xlu1 %2740  ;;  %v5172_v14 = vld [vmem:[#allocation3 + $0x39c] ss:$24 sps:$4 sm:$0xff]   ;;  %vm6645_vm8 = vcmask 588800  }
 0x24a   : > { %v1821_v2 = vpop.permute.xlu0 %1820  ;;  %1898 = vst [vmem:[#allocation3 + $0x84] sm:$0xff] %v1890_v11  ;;  %v2747_v23 = vrot.slane %v2741_v12, 4  ;;  %4138 = vmatprep.subr.bf16.mxu0 %v5172_v14  ;;  %vm6646_vm10 = vmmov %vm6645_vm8 }
 0x24b   : > { %4139 = vmatpush1.bf16.msra.mxu0 %v5170_v13  ;;  %v1828_v59 = vrot.slane %v1821_v2, 4  ;;  %vm6648_vm12 = vmmov %vm6645_vm8  ;;  %v5182_v13 = vld [vmem:[#allocation3 + $0x8] ss:$24 sps:$4 sm:$0xff]  }
 0x24c   : > { %v2750_v25 = vsel %vm481_vm2, %v2746_v21, %v2747_v23  ;;  %v2752_v26 = vsel %vm1418_vm11, %v2741_v12, %v2747_v23 }
 0x24d   : > { %v2751_v30 = vsel %vm1418_vm11, %v2739_v62, %v2750_v25  ;;  %2761 = vst [vmem:[#allocation3 + $0x374] sm:$0xf] %v2752_v26  ;;  %v2745_v32 = vpop.permute.xlu1 %2744  ;;  %v5185_v26 = vld [vmem:[#allocation3 + $0x338] ss:$24 sps:$4 sm:$0xff]  }
 0x24e   : > { %v1825_v33 = vpop.permute.xlu0 %1824  ;;  %2760 = vst [vmem:[#allocation3 + $0x36c] sm:$0xff] %v2751_v30  ;;  %v2749_v34 = vrot.slane %v2745_v32, 4 }
 0x24f   : > { %v1830_v40 = vrot.slane %v1825_v33, 4 }
 0x250   : > { %v2753_v35 = vsel %vm481_vm2, %v2748_v24, %v2749_v34  ;;  %v2755_v37 = vsel %vm1418_vm11, %v2745_v32, %v2749_v34 }
 0x251   : > { %v2754_v43 = vsel %vm1418_vm11, %v2743_v7, %v2753_v35  ;;  %2763 = vst [vmem:[#allocation3 + $0x38c] sm:$0xf] %v2755_v37  ;;  %v1823_v58 = vpop.permute.xlu1 %1822  ;;  %v5175_v56 = vld [vmem:[#allocation3 + $0x6c] ss:$24 sps:$4 sm:$0xff]   ;;  %vm6647_vm11 = vmmov %vm6645_vm8 }
 0x252   : > { %v2685_v38 = vpop.permute.xlu0 %2684  ;;  %2762 = vst [vmem:[#allocation3 + $0x384] sm:$0xff] %v2754_v43  ;;  %v1829_v39 = vrot.slane %v1823_v58, 4  ;;  %4099 = vmatprep.subr.bf16.mxu1 %v5175_v56 }
 0x253   : > { %4100 = vmatpush1.bf16.msra.mxu1 %v5173_v19  ;;  %v2692_v53 = vrot.slane %v2685_v38, 4 }
 0x254   : > { %v1832_v41 = vsel %vm481_vm2, %v1828_v59, %v1829_v39  ;;  %v1834_v42 = vsel %vm6641_vm3, %v1823_v58, %v1829_v39  ;;  %vm6652_vm3 = vmmov %vm6651_vm1 }
 0x255   : > { %v1833_v44 = vsel %vm6642_vm4, %v1821_v2, %v1832_v41  ;;  %1843 = vst [vmem:[#allocation3 + $0x44] sm:$0xf] %v1834_v42  ;;  %v1827_v20 = vpop.permute.xlu1 %1826  ;;  %vm6653_vm4 = vcmask 605184   ;;  %v5188_v42 = vld [vmem:[#allocation3 + $0x308] ss:$24 sps:$4 sm:$0xff]  }
 0x256   : > { %v2689_v45 = vpop.permute.xlu0 %2688  ;;  %1842 = vst [vmem:[#allocation3 + $0x3c] sm:$0xff] %v1833_v44  ;;  %v1831_v47 = vrot.slane %v1827_v20, 4 }
 0x257   : > { %v2694_v9 = vrot.slane %v2689_v45, 4 }
 0x258   : > { %v1835_v48 = vsel %vm481_vm2, %v1830_v40, %v1831_v47  ;;  %v1837_v49 = vsel %vm6643_vm6, %v1827_v20, %v1831_v47  ;;  %vm6654_vm6 = vmmov %vm6653_vm4 }
 0x259   : > { %v1836_v17 = vsel %vm6644_vm7, %v1825_v33, %v1835_v48  ;;  %1845 = vst [vmem:[#allocation3 + $0x5c] sm:$0xf] %v1837_v49  ;;  %v2687_v51 = vpop.permute.xlu1 %2686  ;;  %v5178_v22 = vld [vmem:[#allocation3 + $0x36c] ss:$24 sps:$4 sm:$0xff]   ;;  %vm6655_vm7 = vmmov %vm6653_vm4 }
 0x25a   : > { %v2631_v52 = vpop.permute.xlu0 %2630  ;;  %1844 = vst [vmem:[#allocation3 + $0x54] sm:$0xff] %v1836_v17  ;;  %v2693_v55 = vrot.slane %v2687_v51, 4  ;;  %4140 = vmatprep.subr.bf16.mxu0 %v5178_v22 }
 0x25b   : > { %4141 = vmatpush1.bf16.msra.mxu0 %v5176_v29  ;;  %v2638_v4 = vrot.slane %v2631_v52, 4 }
 0x25c   : > { %v2696_v57 = vsel %vm481_vm2, %v2692_v53, %v2693_v55  ;;  %v2698_v60 = vsel %vm6645_vm8, %v2687_v51, %v2693_v55  ;;  %vm6656_vm8 = vmmov %vm6653_vm4 }
 0x25d   : > { %v2697_v16 = vsel %vm6646_vm10, %v2685_v38, %v2696_v57  ;;  %2707 = vst [vmem:[#allocation3 + $0x344] sm:$0xf] %v2698_v60  ;;  %v2691_v61 = vpop.permute.xlu1 %2690  ;;  %v5191_v60 = vld [vmem:[#allocation3 + $0x2d8] ss:$24 sps:$4 sm:$0xff]   ;;  %vm6657_vm10 = vcmask 719872  }
 0x25e   : > { %v2635_v46 = vpop.permute.xlu0 %2634  ;;  %2706 = vst [vmem:[#allocation3 + $0x33c] sm:$0xff] %v2697_v16  ;;  %v2695_v54 = vrot.slane %v2691_v61, 4 }
 0x25f   : > { %v2640_v7 = vrot.slane %v2635_v46, 4 }
 0x260   : > { %v2699_v62 = vsel %vm481_vm2, %v2694_v9, %v2695_v54  ;;  %v2701_v63 = vsel %vm6647_vm11, %v2691_v61, %v2695_v54  ;;  %vm6658_vm11 = vmmov %vm6657_vm10 }
 0x261   : > { %v2700_v1 = vsel %vm6648_vm12, %v2689_v45, %v2699_v62  ;;  %2709 = vst [vmem:[#allocation3 + $0x35c] sm:$0xf] %v2701_v63  ;;  %v2633_v36 = vpop.permute.xlu1 %2632  ;;  %v5181_v3 = vld [vmem:[#allocation3 + $0x3c] ss:$24 sps:$4 sm:$0xff]  }
 0x262   : > { %v2577_v0 = vpop.permute.xlu0 %2576  ;;  %2708 = vst [vmem:[#allocation3 + $0x354] sm:$0xff] %v2700_v1  ;;  %v2639_v15 = vrot.slane %v2633_v36, 4  ;;  %4101 = vmatprep.subr.bf16.mxu1 %v5181_v3 }
 0x263   : > { %4102 = vmatpush1.bf16.msra.mxu1 %v5179_v27  ;;  %v2584_v32 = vrot.slane %v2577_v0, 4 }
 0x264   : > { %v2642_v8 = vsel %vm481_vm2, %v2638_v4, %v2639_v15  ;;  %v2644_v10 = vsel %vm6649_vm13, %v2633_v36, %v2639_v15  ;;  %4103 = vmatprep.subr.bf16.mxu1 %v5184_v6  ;;  %vm6661_vm13 = vcmask 728064  }
 0x265   : > { %v2643_v28 = vsel %vm6650_vm15, %v2631_v52, %v2642_v8  ;;  %2653 = vst [vmem:[#allocation3 + $0x314] sm:$0xf] %v2644_v10  ;;  %v2637_v11 = vpop.permute.xlu1 %2636  ;;  %v5194_v8 = vld [vmem:[#allocation3 + $0x488] ss:$24 sps:$4 sm:$0xff]   ;;  %vm6662_vm15 = vmmov %vm6661_vm13 }
 0x266   : > { %v2581_v12 = vpop.permute.xlu0 %2580  ;;  %2652 = vst [vmem:[#allocation3 + $0x30c] sm:$0xff] %v2643_v28  ;;  %v2641_v2 = vrot.slane %v2637_v11, 4 }
 0x267   : > { %4104 = vmatpush1.bf16.msra.mxu1 %v5182_v13  ;;  %v2586_v34 = vrot.slane %v2581_v12, 4 }
 0x268   : > { %v2645_v14 = vsel %vm481_vm2, %v2640_v7, %v2641_v2  ;;  %v2647_v21 = vsel %vm6651_vm1, %v2637_v11, %v2641_v2  ;;  %vm6663_vm1 = vmmov %vm6661_vm13 }
 0x269   : > { %v2646_v23 = vsel %vm6652_vm3, %v2635_v46, %v2645_v14  ;;  %2655 = vst [vmem:[#allocation3 + $0x32c] sm:$0xf] %v2647_v21  ;;  %v2579_v24 = vpop.permute.xlu1 %2578  ;;  %v5187_v30 = vld [vmem:[#allocation3 + $0x33c] ss:$24 sps:$4 sm:$0xff]   ;;  %vm6664_vm3 = vmmov %vm6663_vm1 }
 0x26a   : > { %v3063_v25 = vpop.permute.xlu0 %3062  ;;  %2654 = vst [vmem:[#allocation3 + $0x324] sm:$0xff] %v2646_v23  ;;  %v2585_v33 = vrot.slane %v2579_v24, 4  ;;  %4142 = vmatprep.subr.bf16.mxu0 %v5187_v30  ;;  %v5202_v30 = vld [vmem:[#allocation3 + $0x134] ss:$24 sps:$4 sm:$0xff]  }
 0x26b   : > { %4143 = vmatpush1.bf16.msra.mxu0 %v5185_v26  ;;  %v3070_v20 = vrot.slane %v3063_v25, 4  ;;  %v5197_v26 = vld [vmem:[#allocation3 + $0x160] ss:$24 sps:$4 sm:$0xff]  }
 0x26c   : > { %v2588_v35 = vsel %vm481_vm2, %v2584_v32, %v2585_v33  ;;  %v2590_v37 = vsel %vm6653_vm4, %v2579_v24, %v2585_v33  ;;  %vm6665_vm4 = vcmask 736256  }
 0x26d   : > { %v2589_v43 = vsel %vm6654_vm6, %v2577_v0, %v2588_v35  ;;  %2599 = vst [vmem:[#allocation3 + $0x2e4] sm:$0xf] %v2590_v37  ;;  %v2583_v58 = vpop.permute.xlu1 %2582  ;;  %vm6666_vm6 = vmmov %vm6665_vm4 }
 0x26e   : > { %v3067_v38 = vpop.permute.xlu0 %3066  ;;  %2598 = vst [vmem:[#allocation3 + $0x2dc] sm:$0xff] %v2589_v43  ;;  %v2587_v19 = vrot.slane %v2583_v58, 4  ;;  %v5203_v43 = vld [vmem:[#allocation3 + $0x2a8] ss:$24 sps:$4 sm:$0xff]  }
 0x26f   : > { %v3072_v47 = vrot.slane %v3067_v38, 4 }
 0x270   : > { %v2591_v56 = vsel %vm481_vm2, %v2586_v34, %v2587_v19  ;;  %v2593_v59 = vsel %vm6655_vm7, %v2583_v58, %v2587_v19  ;;  %vm6667_vm7 = vmmov %vm6665_vm4 }
 0x271   : > { %v2592_v39 = vsel %vm6656_vm8, %v2581_v12, %v2591_v56  ;;  %2601 = vst [vmem:[#allocation3 + $0x2fc] sm:$0xf] %v2593_v59  ;;  %v3065_v40 = vpop.permute.xlu1 %3064  ;;  %v5190_v44 = vld [vmem:[#allocation3 + $0x30c] ss:$24 sps:$4 sm:$0xff]   ;;  %v5200_v56 = vld [vmem:[#allocation3 + $0x130] ss:$24 sps:$4 sm:$0xff]   ;;  %vm6668_vm8 = vmmov %vm6665_vm4 }
 0x272   : > { %v2523_v41 = vpop.permute.xlu0 %2522  ;;  %2600 = vst [vmem:[#allocation3 + $0x2f4] sm:$0xff] %v2592_v39  ;;  %v3071_v45 = vrot.slane %v3065_v40, 4  ;;  %4144 = vmatprep.subr.bf16.mxu0 %v5190_v44  ;;  %v5199_v12 = vld [vmem:[#allocation3 + $0x164] ss:$24 sps:$4 sm:$0xff]  }
 0x273   : > { %4145 = vmatpush1.bf16.msra.mxu0 %v5188_v42  ;;  %v2530_v61 = vrot.slane %v2523_v41, 4  ;;  %v5208_v59 = vld [vmem:[#allocation3 + $0x104] ss:$24 sps:$4 sm:$0xff]  }
 0x274   : > { %v3074_v48 = vsel %vm481_vm2, %v3070_v20, %v3071_v45  ;;  %v3076_v49 = vsel %vm1748_vm9, %v3065_v40, %v3071_v45  ;;  %v5206_v45 = vld [vmem:[#allocation3 + $0x100] ss:$24 sps:$4 sm:$0xff]  }
 0x275   : > { %v3075_v17 = vsel %vm1748_vm9, %v3063_v25, %v3074_v48  ;;  %3085 = vst [vmem:[#allocation3 + $0x494] sm:$0xf] %v3076_v49  ;;  %v3069_v51 = vpop.permute.xlu1 %3068 }
 0x276   : > { %v2527_v52 = vpop.permute.xlu0 %2526  ;;  %3084 = vst [vmem:[#allocation3 + $0x48c] sm:$0xff] %v3075_v17  ;;  %v3073_v29 = vrot.slane %v3069_v51, 4 }
 0x277   : > { %v2532_v54 = vrot.slane %v2527_v52, 4 }
 0x278   : > { %v3077_v22 = vsel %vm481_vm2, %v3072_v47, %v3073_v29  ;;  %v3079_v53 = vsel %vm1748_vm9, %v3069_v51, %v3073_v29  ;;  %v5211_v47 = vld [vmem:[#allocation3 + $0xd4] ss:$24 sps:$4 sm:$0xff]   ;;  %v5212_v29 = vld [vmem:[#allocation3 + $0x278] ss:$24 sps:$4 sm:$0xff]  }
 0x279   : > { %v3078_v55 = vsel %vm1748_vm9, %v3067_v38, %v3077_v22  ;;  %3087 = vst [vmem:[#allocation3 + $0x4ac] sm:$0xf] %v3079_v53  ;;  %v2525_v9 = vpop.permute.xlu1 %2524  ;;  %v5193_v16 = vld [vmem:[#allocation3 + $0x2dc] ss:$24 sps:$4 sm:$0xff]   ;;  %vm6659_vm9 = vmmov %vm6657_vm10 }
 0x27a   : > { %v2469_v57 = vpop.permute.xlu0 %2468  ;;  %3086 = vst [vmem:[#allocation3 + $0x4a4] sm:$0xff] %v3078_v55  ;;  %v2531_v46 = vrot.slane %v2525_v9, 4  ;;  %4105 = vmatprep.subr.bf16.mxu1 %v5193_v16  ;;  %vm6660_vm12 = vmmov %vm6659_vm9 }
 0x27b   : > { %4106 = vmatpush2.bf16.msra.mxu1 %v5191_v60  ;;  %v2476_v28 = vrot.slane %v2469_v57, 4 }
 0x27c   : > { %v2534_v62 = vsel %vm481_vm2, %v2530_v61, %v2531_v46  ;;  %v2536_v63 = vsel %vm6657_vm10, %v2525_v9, %v2531_v46  ;;  %v5209_v9 = vld [vmem:[#allocation3 + $0xd0] ss:$24 sps:$4 sm:$0xff]   ;;  %vm6669_vm10 = vcmask 744448  }
 0x27d   : > { %v2535_v1 = vsel %vm6658_vm11, %v2523_v41, %v2534_v62  ;;  %2545 = vst [vmem:[#allocation3 + $0x2b4] sm:$0xf] %v2536_v63  ;;  %v2529_v36 = vpop.permute.xlu1 %2528  ;;  %vm6670_vm11 = vmmov %vm6669_vm10 }
 0x27e   : > { %v2473_v0 = vpop.permute.xlu0 %2472  ;;  %2544 = vst [vmem:[#allocation3 + $0x2ac] sm:$0xff] %v2535_v1  ;;  %v2533_v27 = vrot.slane %v2529_v36, 4  ;;  %v5215_v1 = vld [vmem:[#allocation3 + $0xa0] ss:$24 sps:$4 sm:$0xff]  }
 0x27f   : > { %v2478_v2 = vrot.slane %v2473_v0, 4 }
 0x280   : > { %v2537_v3 = vsel %vm481_vm2, %v2532_v54, %v2533_v27  ;;  %v2539_v4 = vsel %vm6659_vm9, %v2529_v36, %v2533_v27  ;;  %v5220_v36 = vld [vmem:[#allocation3 + $0x74] ss:$24 sps:$4 sm:$0xff]   ;;  %vm6671_vm9 = vmmov %vm6669_vm10 }
 0x281   : > { %v2538_v15 = vsel %vm6660_vm12, %v2527_v52, %v2537_v3  ;;  %2547 = vst [vmem:[#allocation3 + $0x2cc] sm:$0xf] %v2539_v4  ;;  %v2471_v6 = vpop.permute.xlu1 %2470  ;;  %v5196_v10 = vld [vmem:[#allocation3 + $0x48c] ss:$24 sps:$4 sm:$0xff]   ;;  %vm6672_vm12 = vmmov %vm6671_vm9 }
 0x282   : > { %v2415_v7 = vpop.permute.xlu0 %2414  ;;  %2546 = vst [vmem:[#allocation3 + $0x2c4] sm:$0xff] %v2538_v15  ;;  %v2477_v11 = vrot.slane %v2471_v6, 4  ;;  %4160 = vmatprep.subr.bf16.mxu0 %v5196_v10 }
 0x283   : > { %4161 = vmatpush2.bf16.msra.mxu0 %v5194_v8  ;;  %v2422_v38 = vrot.slane %v2415_v7, 4 }
 0x284   : > { %v2480_v13 = vsel %vm481_vm2, %v2476_v28, %v2477_v11  ;;  %v2482_v14 = vsel %vm6661_vm13, %v2471_v6, %v2477_v11  ;;  %4171 = vmatprep.subr.bf16.mxu0 %v5199_v12  ;;  %v5221_v6 = vld [vmem:[#allocation3 + $0x248] ss:$24 sps:$4 sm:$0xff]   ;;  %v5226_v11 = vld [vmem:[#allocation3 + $0x44] ss:$24 sps:$4 sm:$0xff]   ;;  %vm6673_vm13 = vcmask 752640  }
 0x285   : > { %v2481_v21 = vsel %vm6662_vm15, %v2469_v57, %v2480_v13  ;;  %2491 = vst [vmem:[#allocation3 + $0x284] sm:$0xf] %v2482_v14  ;;  %v2475_v23 = vpop.permute.xlu1 %2474  ;;  %v5217_v57 = vld [vmem:[#allocation3 + $0xa4] ss:$24 sps:$4 sm:$0xff]   ;;  %v5218_v28 = vld [vmem:[#allocation3 + $0x70] ss:$24 sps:$4 sm:$0xff]   ;;  %vm6674_vm15 = vmmov %vm6673_vm13 }
 0x286   : > { %v2419_v24 = vpop.permute.xlu0 %2418  ;;  %2490 = vst [vmem:[#allocation3 + $0x27c] sm:$0xff] %v2481_v21  ;;  %v2479_v25 = vrot.slane %v2475_v23, 4  ;;  %4163 = vmatmul.mubr.bf16.vlgmr.msra.gmra.mxu0 %v6289_v50 }
 0x287   : > { %4172 = vmatpush1.bf16.msra.mxu0 %v5197_v26  ;;  %4203 = vmatprep.mubr.bf16.mxu0 %v6073_v31  ;;  %v2424_v39 = vrot.slane %v2419_v24, 4  ;;  %v5229_v26 = vld [vmem:[#allocation3 + $0x14] ss:$24 sps:$4 sm:$0xff]  }
 0x288   : > { %v2483_v32 = vsel %vm481_vm2, %v2478_v2, %v2479_v25  ;;  %v2485_v33 = vsel %vm6663_vm1, %v2475_v23, %v2479_v25  ;;  %4173 = vmatprep.subr.bf16.mxu0 %v5202_v30  ;;  %vm6675_vm1 = vmmov %vm6673_vm13 }
 0x289   : > { %v2484_v34 = vsel %vm6664_vm3, %v2473_v0, %v2483_v32  ;;  %2493 = vst [vmem:[#allocation3 + $0x29c] sm:$0xf] %v2485_v33  ;;  %v2417_v35 = vpop.permute.xlu1 %2416  ;;  %v5205_v58 = vld [vmem:[#allocation3 + $0x2ac] ss:$24 sps:$4 sm:$0xff]   ;;  %vm6676_vm3 = vmmov %vm6675_vm1 }
 0x28a   : > { %v2361_v37 = vpop.permute.xlu0 %2360  ;;  %2492 = vst [vmem:[#allocation3 + $0x294] sm:$0xff] %v2484_v34  ;;  %v2423_v19 = vrot.slane %v2417_v35, 4  ;;  %4107 = vmatprep.subr.bf16.mxu1 %v5205_v58 }
 0x28b   : > { %4108 = vmatpush2.bf16.msra.mxu1 %v5203_v43  ;;  %4174 = vmatpush1.bf16.msra.mxu0 %v5200_v56  ;;  %v2368_v53 = vrot.slane %v2361_v37, 4 }
 0x28c   : > { %v2426_v40 = vsel %vm481_vm2, %v2422_v38, %v2423_v19  ;;  %v2428_v41 = vsel %vm6665_vm4, %v2417_v35, %v2423_v19  ;;  %4175 = vmatprep.subr.bf16.mxu0 %v5208_v59  ;;  %v5230_v35 = vld [vmem:[#allocation3 + $0x218] ss:$24 sps:$4 sm:$0xff]   ;;  %v5235_v19 = vld [vmem:[#allocation3 + $0x2e4] ss:$24 sps:$4 sm:$0xff]   ;;  %vm6677_vm4 = vcmask 867328  }
 0x28d   : > { %v2427_v31 = vsel %vm6666_vm6, %v2415_v7, %v2426_v40  ;;  %2437 = vst [vmem:[#allocation3 + $0x254] sm:$0xf] %v2428_v41  ;;  %v2421_v42 = vpop.permute.xlu1 %2420  ;;  %v5227_v38 = vld [vmem:[#allocation3 + $0x10] ss:$24 sps:$4 sm:$0xff]   ;;  %vm6678_vm6 = vmmov %vm6677_vm4 }
 0x28e   : > { %v2365_v44 = vpop.permute.xlu0 %2364  ;;  %2436 = vst [vmem:[#allocation3 + $0x24c] sm:$0xff] %v2427_v31  ;;  %v2425_v20 = vrot.slane %v2421_v42, 4 }
 0x28f   : > { %4176 = vmatpush1.bf16.msra.mxu0 %v5206_v45  ;;  %v2370_v60 = vrot.slane %v2365_v44, 4 }
 0x290   : > { %v2429_v48 = vsel %vm481_vm2, %v2424_v39, %v2425_v20  ;;  %v2431_v49 = vsel %vm6667_vm7, %v2421_v42, %v2425_v20  ;;  %4177 = vmatprep.subr.bf16.mxu0 %v5211_v47  ;;  %v5238_v20 = vld [vmem:[#allocation3 + $0x2b4] ss:$24 sps:$4 sm:$0xff]   ;;  %vm6679_vm7 = vmmov %vm6677_vm4 }
 0x291   : > { %v2430_v17 = vsel %vm6668_vm8, %v2419_v24, %v2429_v48  ;;  %2439 = vst [vmem:[#allocation3 + $0x26c] sm:$0xf] %v2431_v49  ;;  %v2363_v51 = vpop.permute.xlu1 %2362  ;;  %v5214_v22 = vld [vmem:[#allocation3 + $0x27c] ss:$24 sps:$4 sm:$0xff]   ;;  %v5224_v24 = vld [vmem:[#allocation3 + $0x40] ss:$24 sps:$4 sm:$0xff]   ;;  %vm6680_vm8 = vmmov %vm6677_vm4 }
 0x292   : > { %v2307_v52 = vpop.permute.xlu0 %2306  ;;  %2438 = vst [vmem:[#allocation3 + $0x264] sm:$0xff] %v2430_v17  ;;  %v2369_v55 = vrot.slane %v2363_v51, 4  ;;  %4109 = vmatprep.subr.bf16.mxu1 %v5214_v22  ;;  %v5239_v17 = vld [vmem:[#allocation3 + $0x1e8] ss:$24 sps:$4 sm:$0xff]  }
 0x293   : > { %4110 = vmatpush2.bf16.msra.mxu1 %v5212_v29  ;;  %4178 = vmatpush1.bf16.msra.mxu0 %v5209_v9  ;;  %v2314_v8 = vrot.slane %v2307_v52, 4 }
 0x294   : > { %v2372_v16 = vsel %vm481_vm2, %v2368_v53, %v2369_v55  ;;  %v2374_v61 = vsel %vm6669_vm10, %v2363_v51, %v2369_v55  ;;  %4179 = vmatprep.subr.bf16.mxu0 %v5217_v57  ;;  %v5236_v53 = vld [vmem:[#allocation3 + $0x2b0] ss:$24 sps:$4 sm:$0xff]   ;;  %v5244_v55 = vld [vmem:[#allocation3 + $0x284] ss:$24 sps:$4 sm:$0xff]  }
 0x295   : > { %v2373_v46 = vsel %vm6670_vm11, %v2361_v37, %v2372_v16  ;;  %2383 = vst [vmem:[#allocation3 + $0x224] sm:$0xf] %v2374_v61  ;;  %v2367_v54 = vpop.permute.xlu1 %2366 }
 0x296   : > { %v2311_v62 = vpop.permute.xlu0 %2310  ;;  %2382 = vst [vmem:[#allocation3 + $0x21c] sm:$0xff] %v2373_v46  ;;  %v2371_v63 = vrot.slane %v2367_v54, 4 }
 0x297   : > { %4180 = vmatpush1.bf16.msra.mxu0 %v5215_v1  ;;  %v2316_v12 = vrot.slane %v2311_v62, 4 }
 0x298   : > { %v2375_v0 = vsel %vm481_vm2, %v2370_v60, %v2371_v63  ;;  %v2377_v27 = vsel %vm6671_vm9, %v2367_v54, %v2371_v63  ;;  %4181 = vmatprep.subr.bf16.mxu0 %v5220_v36  ;;  %v5242_v54 = vld [vmem:[#allocation3 + $0x280] ss:$24 sps:$4 sm:$0xff]   ;;  %vm6681_vm9 = vcmask 1039360  }
 0x299   : > { %v2376_v3 = vsel %vm6672_vm12, %v2365_v44, %v2375_v0  ;;  %2385 = vst [vmem:[#allocation3 + $0x23c] sm:$0xf] %v2377_v27  ;;  %v2309_v4 = vpop.permute.xlu1 %2308  ;;  %v5223_v7 = vld [vmem:[#allocation3 + $0x24c] ss:$24 sps:$4 sm:$0xff]   ;;  %v5233_v44 = vld [vmem:[#allocation3 + $0x2e0] ss:$24 sps:$4 sm:$0xff]  }
 0x29a   : > { %v2253_v15 = vpop.permute.xlu0 %2252  ;;  %2384 = vst [vmem:[#allocation3 + $0x234] sm:$0xff] %v2376_v3  ;;  %v2315_v10 = vrot.slane %v2309_v4, 4  ;;  %4111 = vmatprep.subr.bf16.mxu1 %v5223_v7  ;;  %v5248_v27 = vld [vmem:[#allocation3 + $0x1b8] ss:$24 sps:$4 sm:$0xff]  }
 0x29b   : > { %4112 = vmatpush2.bf16.msra.mxu1 %v5221_v6  ;;  %4182 = vmatpush1.bf16.msra.mxu0 %v5218_v28  ;;  %v2260_v43 = vrot.slane %v2253_v15, 4 }
 0x29c   : > { %v2318_v2 = vsel %vm481_vm2, %v2314_v8, %v2315_v10  ;;  %v2320_v13 = vsel %vm6673_vm13, %v2309_v4, %v2315_v10  ;;  %4183 = vmatprep.subr.bf16.mxu0 %v5226_v11  ;;  %v5245_v4 = vld [vmem:[#allocation3 + $0x250] ss:$24 sps:$4 sm:$0xff]   ;;  %vm6682_vm13 = vmmov %vm6681_vm9 }
 0x29d   : > { %v2319_v14 = vsel %vm6674_vm15, %v2307_v52, %v2318_v2  ;;  %2329 = vst [vmem:[#allocation3 + $0x1f4] sm:$0xf] %v2320_v13  ;;  %v2313_v21 = vpop.permute.xlu1 %2312  ;;  %vm6683_vm15 = vmmov %vm6681_vm9 }
 0x29e   : > { %2328 = vst [vmem:[#allocation3 + $0x1ec] sm:$0xff] %v2319_v14  ;;  %v2317_v23 = vrot.slane %v2313_v21, 4  ;;  %v2257_v25 = vpop.permute.xlu0 %2256 }
 0x29f   : > { %4184 = vmatpush1.bf16.msra.mxu0 %v5224_v24  ;;  %v2262_v56 = vrot.slane %v2257_v25, 4 }
 0x2a0   : > { %v2321_v30 = vsel %vm481_vm2, %v2316_v12, %v2317_v23  ;;  %v2323_v32 = vsel %vm6675_vm1, %v2313_v21, %v2317_v23  ;;  %4185 = vmatprep.subr.bf16.mxu0 %v5229_v26  ;;  %v5253_v6 = vld [vmem:[#allocation3 + $0x224] ss:$24 sps:$4 sm:$0xff]   ;;  %v5257_v12 = vld [vmem:[#allocation3 + $0x188] ss:$24 sps:$4 sm:$0xff]   ;;  %vm6684_vm1 = vmmov %vm6681_vm9 }
 0x2a1   : > { %v2322_v33 = vsel %vm6676_vm3, %v2311_v62, %v2321_v30  ;;  %2331 = vst [vmem:[#allocation3 + $0x20c] sm:$0xf] %v2323_v32  ;;  %v2255_v34 = vpop.permute.xlu1 %2254  ;;  %v5232_v37 = vld [vmem:[#allocation3 + $0x21c] ss:$24 sps:$4 sm:$0xff]   ;;  %v5251_v8 = vld [vmem:[#allocation3 + $0x220] ss:$24 sps:$4 sm:$0xff]  }
 0x2a2   : > { %2330 = vst [vmem:[#allocation3 + $0x204] sm:$0xff] %v2322_v33  ;;  %v2261_v58 = vrot.slane %v2255_v34, 4  ;;  %4113 = vmatprep.subr.bf16.mxu1 %v5232_v37  ;;  %v2199_v41 = vpop.permute.xlu0 %2198  ;;  %v5247_v62 = vld [vmem:[#allocation3 + $0x254] ss:$24 sps:$4 sm:$0xff]   ;;  %v5265_v21 = vld [vmem:[#allocation3 + $0x464] ss:$24 sps:$4 sm:$0xff]  }
 0x2a3   : > { %4114 = vmatpush2.bf16.msra.mxu1 %v5230_v35  ;;  %4186 = vmatpush1.bf16.msra.mxu0 %v5227_v38  ;;  %v2206_v29 = vrot.slane %v2199_v41, 4  ;;  %v5263_v35 = vld [vmem:[#allocation3 + $0x460] ss:$24 sps:$4 sm:$0xff]  }
 0x2a4   : > { %v2264_v59 = vsel %vm481_vm2, %v2260_v43, %v2261_v58  ;;  %v2266_v39 = vsel %vm6677_vm4, %v2255_v34, %v2261_v58  ;;  %4187 = vmatprep.subr.bf16.mxu0 %v5235_v19  ;;  %v5271_v58 = vld [vmem:[#allocation3 + $0x434] ss:$24 sps:$4 sm:$0xff]  }
 0x2a5   : > { %v2265_v40 = vsel %vm6678_vm6, %v2253_v15, %v2264_v59  ;;  %2275 = vst [vmem:[#allocation3 + $0x1c4] sm:$0xf] %v2266_v39  ;;  %v2259_v31 = vpop.permute.xlu1 %2258  ;;  %v5274_v59 = vld [vmem:[#allocation3 + $0x404] ss:$24 sps:$4 sm:$0xff]   ;;  %v5272_v39 = vld [vmem:[#allocation3 + $0x400] ss:$24 sps:$4 sm:$0xff]  }
 0x2a6   : > { %2274 = vst [vmem:[#allocation3 + $0x1bc] sm:$0xff] %v2265_v40  ;;  %v2263_v42 = vrot.slane %v2259_v31, 4  ;;  %v2203_v52 = vpop.permute.xlu0 %2202  ;;  %v5277_v40 = vld [vmem:[#allocation3 + $0x3d4] ss:$24 sps:$4 sm:$0xff]  }
 0x2a7   : > { %4188 = vmatpush2.bf16.msra.mxu0 %v5233_v44  ;;  %v2208_v60 = vrot.slane %v2203_v52, 4  ;;  %v5283_v44 = vld [vmem:[#allocation3 + $0x374] ss:$24 sps:$4 sm:$0xff]  }
 0x2a8   : > { %v2267_v45 = vsel %vm481_vm2, %v2262_v56, %v2263_v42  ;;  %v2269_v47 = vsel %vm6679_vm7, %v2259_v31, %v2263_v42  ;;  %4189 = vmatprep.subr.bf16.mxu0 %v5238_v20  ;;  %v5256_v28 = vld [vmem:[#allocation3 + $0x1f4] ss:$24 sps:$4 sm:$0xff]   ;;  %v5269_v56 = vld [vmem:[#allocation3 + $0x430] ss:$24 sps:$4 sm:$0xff]   ;;  %v5280_v31 = vld [vmem:[#allocation3 + $0x3a4] ss:$24 sps:$4 sm:$0xff]  }
 0x2a9   : > { %v2268_v48 = vsel %vm6680_vm8, %v2257_v25, %v2267_v45  ;;  %2277 = vst [vmem:[#allocation3 + $0x1dc] sm:$0xf] %v2269_v47  ;;  %v2201_v49 = vpop.permute.xlu1 %2200  ;;  %v5241_v51 = vld [vmem:[#allocation3 + $0x1ec] ss:$24 sps:$4 sm:$0xff]   ;;  %v5254_v14 = vld [vmem:[#allocation3 + $0x1f0] ss:$24 sps:$4 sm:$0xff]  }
 0x2aa   : > { %2276 = vst [vmem:[#allocation3 + $0x1d4] sm:$0xff] %v2268_v48  ;;  %v2207_v22 = vrot.slane %v2201_v49, 4  ;;  %4115 = vmatprep.subr.bf16.mxu1 %v5241_v51  ;;  %v5278_v42 = vld [vmem:[#allocation3 + $0x3a0] ss:$24 sps:$4 sm:$0xff]   ;;  %v5281_v20 = vld [vmem:[#allocation3 + $0x370] ss:$24 sps:$4 sm:$0xff]  }
 0x2ab   : > { %4116 = vmatpush2.bf16.msra.mxu1 %v5239_v17  ;;  %4190 = vmatpush2.bf16.msra.mxu0 %v5236_v53  ;;  %v5284_v45 = vld [vmem:[#allocation3 + $0x340] ss:$24 sps:$4 sm:$0xff]   ;;  %v5289_v47 = vld [vmem:[#allocation3 + $0x314] ss:$24 sps:$4 sm:$0xff]   ;;  %v5287_v48 = vld [vmem:[#allocation3 + $0x310] ss:$24 sps:$4 sm:$0xff]  }
 0x2ac   : > { %v2210_v9 = vsel %vm481_vm2, %v2206_v29, %v2207_v22  ;;  %v2212_v57 = vsel %vm868_vm0, %v2201_v49, %v2207_v22  ;;  %4191 = vmatprep.subr.bf16.mxu0 %v5244_v55  ;;  %v5290_v49 = vld [vmem:[#allocation3 + $0x490] ss:$24 sps:$4 sm:$0xff]  }
 0x2ad   : > { %v2211_v16 = vsel %vm868_vm0, %v2199_v41, %v2210_v9  ;;  %2221 = vst [vmem:[#allocation3 + $0x194] sm:$0xf] %v2212_v57  ;;  %v2205_v61 = vpop.permute.xlu1 %2204  ;;  %v5275_v41 = vld [vmem:[#allocation3 + $0x3d0] ss:$24 sps:$4 sm:$0xff]  }
 0x2ae   : > { %2220 = vst [vmem:[#allocation3 + $0x18c] sm:$0xff] %v2211_v16  ;;  %v2209_v46 = vrot.slane %v2205_v61, 4 }
 0x2af   : > { %4192 = vmatpush2.bf16.msra.mxu0 %v5242_v54 }
 0x2b0   : > { %v2215_v63 = vsel %vm868_vm0, %v2205_v61, %v2209_v46  ;;  %v2213_v1 = vsel %vm481_vm2, %v2208_v60, %v2209_v46  ;;  %v4041_v36 = vpop.f32.mrf.mxu0  ;;  %4193 = vmatprep.subr.bf16.mxu0 %v5247_v62  ;;  %v5262_v24 = vld [vmem:[#allocation3 + $0x1c4] ss:$24 sps:$4 sm:$0xff]  }
 0x2b1   : > { %2223 = vst [vmem:[#allocation3 + $0x1ac] sm:$0xf] %v2215_v63  ;;  %v2214_v0 = vsel %vm868_vm0, %v2203_v52, %v2213_v1  ;;  %v5250_v3 = vld [vmem:[#allocation3 + $0x1bc] ss:$24 sps:$4 sm:$0xff]   ;;  %v5260_v34 = vld [vmem:[#allocation3 + $0x1c0] ss:$24 sps:$4 sm:$0xff]  }
 0x2b2   : > { %2222 = vst [vmem:[#allocation3 + $0x1a4] sm:$0xff] %v2214_v0  ;;  %v4043_v15 = vpop.f32.mrf.mxu0  ;;  %4117 = vmatprep.subr.bf16.mxu1 %v5250_v3 }
 0x2b3   : > { %4118 = vmatpush2.bf16.msra.mxu1 %v5248_v27  ;;  %4194 = vmatpush2.bf16.msra.mxu0 %v5245_v4 }
 0x2b4   : > { %v4045_v7 = vpop.f32.mrf.mxu0  ;;  %4195 = vmatprep.subr.bf16.mxu0 %v5253_v6 }
 0x2b6   : > { %v4046_v10 = vpop.f32.mrf.mxu0 }
 0x2b7   : > { %4196 = vmatpush2.bf16.msra.mxu0 %v5251_v8 }
 0x2b8   : > { %v4082_v11 = vpop.f32.mrf.mxu1  ;;  %4197 = vmatprep.subr.bf16.mxu0 %v5256_v28  ;;  %v5268_v43 = vld [vmem:[#allocation3 + $0x194] ss:$24 sps:$4 sm:$0xff]  }
 0x2b9   : > { %v5259_v2 = vld [vmem:[#allocation3 + $0x18c] ss:$24 sps:$4 sm:$0xff]   ;;  %v4083_v13 = vadd.f32 %v4082_v11, %v4041_v36  ;;  %v5266_v19 = vld [vmem:[#allocation3 + $0x190] ss:$24 sps:$4 sm:$0xff]  }
 0x2ba   : > { %v4084_v23 = vpop.f32.mrf.mxu1  ;;  %4119 = vmatprep.subr.bf16.mxu1 %v5259_v2 }
 0x2bb   : > { %vm4253_vm2 = vcmp.ge.f32.partialorder %v4083_v13, 0.0  ;;  %v4259_v25 = vmul.f32 0.01, %v4083_v13  ;;  %v4085_v26 = vadd.f32 %v4084_v23, %v4043_v15  ;;  %4120 = vmatpush2.bf16.msra.mxu1 %v5257_v12  ;;  %4198 = vmatpush2.bf16.msra.mxu0 %v5254_v14 }
 0x2bc   : > { %v4086_v30 = vpop.f32.mrf.mxu1  ;;  %4199 = vmatprep.subr.bf16.mxu0 %v5262_v24  ;;  %4212 = vmatprep.subr.bf16.mxu1 %v5265_v21 }
 0x2bd   : > { %vm4254_vm0 = vcmp.ge.f32.partialorder %v4085_v26, 0.0  ;;  %v4260_v32 = vmul.f32 0.01, %v4085_v26  ;;  %v6507_v33 = vsel %vm4253_vm2, %v4083_v13, %v4259_v25 }
 0x2be   : > { %4274 = vrot.lane.b32.xlu0 %v6507_v33, %s5448_s16  ;;  %v4087_v37 = vpop.f32.mrf.mxu1  ;;  %4122 = vmatmul.mubr.bf16.vlgmr.msra.gmra.mxu1 %v6265_v5 }
 0x2bf   : > { %v6512_v38 = vsel %vm4254_vm0, %v4085_v26, %v4260_v32  ;;  %4200 = vmatpush2.bf16.msra.mxu0 %v5260_v34  ;;  %4213 = vmatpush1.bf16.msra.mxu1 %v5263_v35 }
 0x2c0   : > { %4201 = vmatprep.subr.bf16.mxu0 %v5268_v43  ;;  %4214 = vmatprep.subr.bf16.mxu1 %v5271_v58 }
 0x2c1   : > { %4276 = vrot.lane.b32.xlu1 %v6512_v38, %s5448_s16  ;;  %4824 = vmatprep.mubr.msk.bf16.mxu1 %vm4003_vm14, %v6059_v18  ;;  %v5286_v18 = vld [vmem:[#allocation3 + $0x344] ss:$24 sps:$4 sm:$0xff]  }
 0x2c3   : > { %4202 = vmatpush2.bf16.msra.mxu0 %v5266_v19  ;;  %4215 = vmatpush1.bf16.msra.mxu1 %v5269_v56 }
 0x2c4   : > { %4216 = vmatprep.subr.bf16.mxu1 %v5274_v59 }
 0x2c6   : > { %4204 = vmatmul.mubr.bf16.vlgmr.msra.gmra.mxu0 %v6265_v5  ;;  %v5292_v5 = vld [vmem:[#allocation3 + $0x494] ss:$24 sps:$4 sm:$0xff]  }
 0x2c7   : > { %4217 = vmatpush1.bf16.msra.mxu1 %v5272_v39 }
 0x2c8   : > { %4218 = vmatprep.subr.bf16.mxu1 %v5277_v40 }
 0x2cb   : > { %4219 = vmatpush1.bf16.msra.mxu1 %v5275_v41 }
 0x2cc   : > { %4220 = vmatprep.subr.bf16.mxu1 %v5280_v31 }
 0x2cf   : > { %4221 = vmatpush1.bf16.msra.mxu1 %v5278_v42 }
 0x2d0   : > { %4222 = vmatprep.subr.bf16.mxu1 %v5283_v44 }
 0x2d3   : > { %4223 = vmatpush1.bf16.msra.mxu1 %v5281_v20 }
 0x2d4   : > { %4224 = vmatprep.subr.bf16.mxu1 %v5286_v18 }
 0x2d7   : > { %4225 = vmatpush1.bf16.msra.mxu1 %v5284_v45 }
 0x2d8   : > { %4226 = vmatprep.subr.bf16.mxu1 %v5289_v47 }
 0x2db   : > { %4227 = vmatpush1.bf16.msra.mxu1 %v5287_v48 }
 0x2dc   : > { %4242 = vmatprep.subr.bf16.mxu1 %v5292_v5 }
 0x2df   : > { %4243 = vmatpush2.bf16.msra.mxu1 %v5290_v49 }
 0x2e2   : > { %4245 = vmatmul.mubr.bf16.vlgmr.msra.gmra.mxu1 %v6289_v50 }
 0x330   : > { %v4275_v0 = vpop.permute.xlu0 %4274 }
 0x333   : > { %v4277_v3 = vpop.permute.xlu1 %4276 }
 0x334   : > { %v4281_v8 = vsel %vm6681_vm9, %v4275_v0, %v4277_v3 }
 0x335   : > { %v4286_v2 = vmax.f32 %v6507_v33, %v4281_v8 }
 0x346   : > { %v4164_v17 = vpop.f32.mrf.mxu0 }
 0x348   : > { %v4166_v51 = vpop.f32.mrf.mxu0 }
 0x34a   : > { %v4168_v52 = vpop.f32.mrf.mxu0 }
 0x34c   : > { %v4169_v29 = vpop.f32.mrf.mxu0 }
 0x37e   : > { %v4123_v22 = vpop.f32.mrf.mxu1 }
 0x37f   : > { %v4165_v53 = vadd.f32 %v4164_v17, %v4123_v22 }
 0x380   : > { %v4125_v55 = vpop.f32.mrf.mxu1 }
 0x381   : > { %vm4255_vm14 = vcmp.ge.f32.partialorder %v4165_v53, 0.0  ;;  %v4261_v9 = vmul.f32 0.01, %v4165_v53  ;;  %v4167_v57 = vadd.f32 %v4166_v51, %v4125_v55 }
 0x382   : > { %v4127_v60 = vpop.f32.mrf.mxu1 }
 0x383   : > { %vm4256_vm10 = vcmp.ge.f32.partialorder %v4167_v57, 0.0  ;;  %v4262_v16 = vmul.f32 0.01, %v4167_v57  ;;  %v4267_v61 = vsel %vm4255_vm14, %v4165_v53, %v4261_v9 }
 0x384   : > { %v4128_v46 = vpop.f32.mrf.mxu1  ;;  %4278 = vrot.lane.b32.xlu0 %v4267_v61, %s5448_s16 }
 0x385   : > { %v4268_v54 = vsel %vm4256_vm10, %v4167_v57, %v4262_v16 }
 0x386   : > { %4310 = vrot.lane.b32.xlu1 %v4268_v54, %s5448_s16  ;;  %v4205_v50 = vpop.f32.mrf.mxu0 }
 0x388   : > { %v4207_v62 = vpop.f32.mrf.mxu0 }
 0x38a   : > { %v4209_v63 = vpop.f32.mrf.mxu0 }
 0x38c   : > { %v4210_v1 = vpop.f32.mrf.mxu0 }
 0x3a2   : > { %v4246_v36 = vpop.f32.mrf.mxu1 }
 0x3a3   : > { %v4247_v27 = vadd.f32 %v4246_v36, %v4205_v50 }
 0x3a4   : > { %v4248_v4 = vpop.f32.mrf.mxu1 }
 0x3a5   : > { %vm4257_vm11 = vcmp.ge.f32.partialorder %v4247_v27, 0.0  ;;  %v4263_v15 = vmul.f32 0.01, %v4247_v27  ;;  %v4249_v6 = vadd.f32 %v4248_v4, %v4207_v62 }
 0x3a6   : > { %v4250_v7 = vpop.f32.mrf.mxu1 }
 0x3a7   : > { %vm4258_vm12 = vcmp.ge.f32.partialorder %v4249_v6, 0.0  ;;  %v4264_v10 = vmul.f32 0.01, %v4249_v6  ;;  %v4269_v28 = vsel %vm4257_vm11, %v4247_v27, %v4263_v15 }
 0x3a8   : > { %v4251_v11 = vpop.f32.mrf.mxu1  ;;  %4312 = vrot.lane.b32.xlu0 %v4269_v28, %s5448_s16 }
 0x3a9   : > { %v4270_v12 = vsel %vm4258_vm12, %v4249_v6, %v4264_v10 }
 0x3aa   : > { %4314 = vrot.lane.b32.xlu1 %v4270_v12, %s5448_s16  ;;  %s4451_s16 = sshll.u32 %s5604_s14, 5 }
 0x3ab   : > { %s175_s26 = scalar_lea.vmem [#allocation9], %s4451_s16 }
 0x3ac   : > { %4292 = vrot.lane.b32.xlu0 %v4286_v2, %s5444_s23  ;;  %s4357_s29 = sshll.u32 %s175_s26, 4  ;;  %s6541_s29 = int_to_ptr.vmem [resolvable:$true] %s4357_s29 }
 0x3ad   : > { %s5350_s4 = scalar_lea.vmem %s6541_s29, 512  ;;  %p5357_p9 = scmp.lt.s32.totalorder %s6541_s29, %s5355_s6 }
 0x3ae   : > { %p5351_p12 = scmp.ne.s32.totalorder %s6541_s29, %s5350_s4  ;;  %p5358_p10 = scmp.lt.s32.totalorder %s5356_s8, %s5350_s4 }
 0x3b0   : > { %p5352_p7 = pnand %p5351_p12, %p6685_p1  ;;  %p5359_p2 = por %p5358_p10, %p5357_p9 }
 0x3b2   : > { %p5353_p8 = pneg %p5352_p7 }
 0x3b4   : > { %p5360_p0 = pnand %p5359_p2, %p5353_p8 }
 0x3f6   : > { %v4279_v13 = vpop.permute.xlu0 %4278 }
 0x3f7   : > { %v4282_v14 = vsel %vm6682_vm13, %v4277_v3, %v4279_v13  ;;  %v4288_v21 = vmax.f32 %v4267_v61, %v4279_v13 }
 0x3f8   : > { %v4287_v23 = vmax.f32 %v6512_v38, %v4282_v14  ;;  %v4311_v24 = vpop.permute.xlu1 %4310 }
 0x3f9   : > { %4296 = vrot.lane.b32.xlu0 %v4288_v21, %s5444_s23 }
 0x3fa   : > { %4294 = vrot.lane.b32.xlu1 %v4287_v23, %s5444_s23 }
 0x41a   : > { %v4313_v25 = vpop.permute.xlu0 %4312 }
 0x41b   : > { %v4316_v26 = vsel %vm6683_vm15, %v4311_v24, %v4313_v25 }
 0x41c   : > { %v4321_v30 = vmax.f32 %v4268_v54, %v4316_v26  ;;  %v4315_v32 = vpop.permute.xlu1 %4314 }
 0x41d   : > { %v4317_v33 = vsel %vm6684_vm1, %v4313_v25, %v4315_v32  ;;  %v4323_v35 = vmax.f32 %v4270_v12, %v4315_v32 }
 0x41e   : > { %v4322_v34 = vmax.f32 %v4269_v28, %v4317_v33  ;;  %4327 = vrot.lane.b32.xlu1 %v4321_v30, %s5444_s23  ;;  %v4293_v37 = vpop.permute.xlu0 %4292 }
 0x420   : > { %4329 = vrot.lane.b32.xlu0 %v4322_v34, %s5444_s23 }
 0x422   : > { %4331 = vrot.lane.b32.xlu1 %v4323_v35, %s5444_s23 }
 0x46b   : > { %v4297_v43 = vpop.permute.xlu0 %4296 }
 0x46c   : > { %v4295_v58 = vpop.permute.xlu1 %4294 }
 0x46d   : > { %v4299_v38 = vsel %vm703_vm5, %v4293_v37, %v4295_v58  ;;  %v4300_v19 = vsel %vm703_vm5, %v4295_v58, %v4297_v43 }
 0x46e   : > { %v4303_v56 = vmax.f32 %v4286_v2, %v4299_v38  ;;  %v4304_v59 = vmax.f32 %v4287_v23, %v4300_v19 }
 0x470   : > { %4305 = vst [vmem:[%s175_s26] sm:$0xff] %v4303_v56  ;;  %4306 = vst [vmem:[%s175_s26 + $0x8] sm:$0xff] %v4304_v59 }
 0x490   : > { %v4328_v39 = vpop.permute.xlu1 %4327 }
 0x492   : > { %v4330_v40 = vpop.permute.xlu0 %4329 }
 0x493   : > { %v4333_v41 = vsel %vm703_vm5, %v4328_v39, %v4330_v40 }
 0x494   : > { %v4337_v31 = vmax.f32 %v4321_v30, %v4333_v41  ;;  %v4332_v42 = vpop.permute.xlu1 %4331 }
 0x495   : > { %v4334_v44 = vsel %vm703_vm5, %v4330_v40, %v4332_v42 }
 0x496   : > { %4825 = vst [vmem:[%s175_s26 + $0x10] sm:$0xff] %v4337_v31  ;;  %v4338_v20 = vmax.f32 %v4322_v34, %v4334_v44 }
 0x498   : > { %4826 = vst [vmem:[%s175_s26 + $0x18] sm:$0xff] %v4338_v20 }
 0x499   : > { %5363 = shalt.err (!%p5360_p0)
}
 0x49a   : > { %s5364_s19 = scalar_lea.hbm %s6547_s3, 512  ;;  %s5368_s25 = scalar_lea.hbm %s6592_s2, 1024 }
 0x49b   : > { %p5365_p4 = scmp.ne.s32.totalorder %s6547_s3, %s5364_s19  ;;  %p5369_p6 = scmp.lt.s32.totalorder %s6547_s3, %s6592_s2 }
 0x49c   : > { %p5370_p13 = scmp.lt.s32.totalorder %s5368_s25, %s5364_s19 }
 0x49d   : > { %p5366_p11 = pnand %p5365_p4, %p6685_p1 }
 0x49e   : > { %p5371_p3 = por %p5370_p13, %p5369_p6 }
 0x49f   : > { %p5367_p5 = pneg %p5366_p11 }
 0x4a1   : > { %p5372_p12 = pnand %p5371_p3, %p5367_p5 }
 0x4a3   : > { %5375 = shalt.err (!%p5372_p12)
}
 0x4a4   : > { %s5467_s17 = smov 256   ;;  %s5468_s16 = smov 16  }
 0x4a5   : > { %5043 = dma.vmem_to_hbm [thread:$0]  (%p6685_p1), %s6541_s29, 512, %s6547_s3, %s4343_s13, %s5467_s17, %s5467_s17, %s5468_s16  }
 0x4a6 PF: > { %s4372_s26 = sand.u32 1, %s5406_s9   ;;  %p6686_p7 = scmp.ne.s32.totalorder %s6624_s22, 0 }
 0x4a7   : > { %p6687_p8 = scmp.ge.s32.totalorder %s5418_s12, 2  ;;  %s4373_s30 = scalar_lea.sflag [#allocation6], %s4372_s26 }
 0x4a9   : > { %p5054_p9 = pnand %p6687_p8, %p6686_p7 }
 0x4ab   : > { %p5055_p10 = pneg %p5054_p9 }
 0x4ad   : > { %5401 = dma.done.wait (%p5055_p10), %s4373_s30, 512  }
 0x4ae   : > { %5403 = vsyncadd (%p5055_p10), %s4373_s30, 4294966784  ;;  %p16_p2 = scmp.ge.s32.totalorder %s5509_s15, 4   ;;  %s6688_s9 = smov %s5410_s10 }
 0x4af   : > { %s6689_s10 = smov %s5414_s11  ;;  %s6690_s11 = smov %s5521_s18 }
 0x4b0   : > { %s6691_s12 = smov %s5509_s15  ;;  %18 = sbr.rel (!%p16_p2) target bundleno = 6 (0x6), region = 80 }
 0x4b5   :  { %4378 = vsyncpa [#allocation5], 1 }
 0x4b6   :  { %4380 = vsyncpa [#allocation5 + $0x1], 1 }
 0x4b7   :  { %4381 = vsyncpa [#allocation8], 1 }
 0x4b8   :  { %4382 = vsyncpa [#allocation6], 1 }
 0x4b9   :  { %4384 = vsyncpa [#allocation6 + $0x1], 1 }

</bundles_post_ra>
